<compile_context>
chip_gen: v5e
topology: v5e:2x2
jax: 0.10.0
libtpu: 0.0.40
codegen_flags: <defaults>
</compile_context>

<pallas_src>
import math
import functools

import jax
import jax.numpy as jnp
from jax.experimental import pallas as pl
from jax.experimental.pallas import tpu as pltpu


def _round_up(x, m):
    return ((x + m - 1) // m) * m


def _sigmoid(x):
    # One EUP op (tanh) + cheap VPU mul/add, instead of exp + divide.
    return 0.5 * jnp.tanh(0.5 * x) + 0.5


def _vmem_limit_bytes():
    # Budget per generation; leave headroom below physical VMEM.
    try:
        cap = pltpu.get_tpu_info().vmem_capacity_bytes
    except Exception:
        cap = 64 << 20
    return int(min(cap - (8 << 20), 112 << 20))


def _lstm_fused_kernel(x_ref, w_ref, u_ref, hb_ref, v_ref, ob_ref,
                       hseq_ref, out_ref,
                       h_scr, c_scr, gx_scr, hs_scr,
                       *, t_block, bb, nhp):
    """One grid step == one (batch block, time chunk).

    x_ref    : (t_block*bb, num_input)  bf16, time-major rows (row = t*bb + b_local)
    w_ref    : (num_input, 4*nhp) bf16  } grid-invariant parameter blocks
    u_ref    : (nhp, 4*nhp)       bf16  }
    hb_ref   : (1, 4*nhp)         f32   }
    v_ref    : (nhp, nop)         bf16  }
    ob_ref   : (1, nop)           f32   }
    hseq_ref : (bb, t_block, nhp) f32, batch-first output block
    out_ref  : (bb, t_block, nop) f32, batch-first output block
    h_scr/c_scr : (bb, nhp) f32 carries across time chunks
    gx_scr   : (t_block*bb, 4*nhp) f32, per-chunk input projection
    hs_scr   : (t_block*bb, nhp)   f32, per-chunk hidden states (time-major)
    """
    chunk = pl.program_id(1)
    f32 = jnp.float32

    @pl.when(chunk == 0)
    def _():
        h_scr[...] = jnp.zeros_like(h_scr)
        c_scr[...] = jnp.zeros_like(c_scr)

    # ---- phase 1 (off the serial path): gates_x = x @ W + hid_bias, whole chunk ----
    gx_scr[...] = (jnp.dot(x_ref[...], w_ref[...], preferred_element_type=f32)
                   + hb_ref[...])

    # ---- phase 2: serial recurrence over the chunk's timesteps -------------------
    h = h_scr[...]
    c = c_scr[...]
    for t in range(t_block):                       # static unroll -> static slices
        gates = gx_scr[t * bb:(t + 1) * bb, :] + jnp.dot(
            h.astype(u_ref.dtype), u_ref[...], preferred_element_type=f32)
        # 128-lane-aligned gate slices (free views).
        i_t = _sigmoid(gates[:, 0 * nhp:1 * nhp])
        f_t = _sigmoid(gates[:, 1 * nhp:2 * nhp])
        g_t = jnp.tanh(gates[:, 2 * nhp:3 * nhp])
        o_t = _sigmoid(gates[:, 3 * nhp:4 * nhp])
        c = f_t * c + i_t * g_t
        h = o_t * jnp.tanh(c)
        hs_scr[t * bb:(t + 1) * bb, :] = h         # contiguous, sublane-aligned store
    h_scr[...] = h
    c_scr[...] = c

    # ---- phase 3 (off the serial path): output = hidden @ V + out_bias -----------
    out_chunk = (jnp.dot(hs_scr[...].astype(v_ref.dtype), v_ref[...],
                         preferred_element_type=f32) + ob_ref[...])

    # Emit batch-first blocks directly (folds the (1,0,2) transpose of both outputs
    # into the store); static per-timestep stores, off the serial path.
    for t in range(t_block):
        hseq_ref[:, t, :] = hs_scr[t * bb:(t + 1) * bb, :]
        out_ref[:, t, :] = out_chunk[t * bb:(t + 1) * bb, :]


@functools.partial(jax.jit, static_argnames=("t_block",))
def lstm_forward(x, W, U, hid_bias, V, out_bias, t_block=16):
    """x: (batch, seq, num_input). Returns (hidden_seq, output) matching the PyTorch
    module: hidden_seq (batch, seq, num_hid), output (batch, seq, num_out)."""
    batch, seq, num_input = x.shape
    num_hid = U.shape[0]
    num_out = V.shape[1]
    f32, bf16 = jnp.float32, jnp.bfloat16

    nhp = _round_up(num_hid, 128)                  # lane-aligned gate blocks
    nop = _round_up(num_out, 128)                  # lane-dense output projection
    bp = _round_up(batch, 8)                       # sublane-aligned batch
    # timesteps per grid step (multiple of 8; sweep upward for long sequences).
    tb = _round_up(max(1, min(t_block, seq)), 8)
    seq_p = _round_up(seq, tb)
    n_chunks = seq_p // tb
    # 2 batch blocks when possible so v7x's second TensorCore gets half the batch
    # (harmless on single-core v5e/v6e).
    nb = 2 if (bp >= 16 and bp % 16 == 0) else 1
    bb = bp // nb

    # --- parameters, padded gate-wise so every gate starts on a 128-lane boundary ---
    Wp = jnp.zeros((num_input, 4, nhp), f32).at[:, :, :num_hid].set(
        W.astype(f32).reshape(num_input, 4, num_hid)).reshape(num_input, 4 * nhp)
    Up = jnp.zeros((nhp, 4, nhp), f32).at[:num_hid, :, :num_hid].set(
        U.astype(f32).reshape(num_hid, 4, num_hid)).reshape(nhp, 4 * nhp)
    hbp = jnp.zeros((4, nhp), f32).at[:, :num_hid].set(
        hid_bias.astype(f32).reshape(4, num_hid)).reshape(1, 4 * nhp)
    Vp = jnp.zeros((nhp, nop), f32).at[:num_hid, :num_out].set(V.astype(f32))
    obp = jnp.zeros((1, nop), f32).at[0, :num_out].set(out_bias.astype(f32))

    # --- input: pad, then lay out as (nb, seq_p*bb, num_input) with row = t*bb + b,
    #     so each kernel block is a ready-to-matmul 2D (tb*bb, num_input) slab ---
    xp = jnp.zeros((bp, seq_p, num_input), bf16).at[:batch, :seq, :].set(x.astype(bf16))
    x_k = (xp.reshape(nb, bb, seq_p, num_input)
             .transpose(0, 2, 1, 3)
             .reshape(nb, seq_p * bb, num_input))

    kernel = functools.partial(_lstm_fused_kernel, t_block=tb, bb=bb, nhp=nhp)

    hseq_p, out_p = pl.pallas_call(
        kernel,
        out_shape=(
            jax.ShapeDtypeStruct((bp, seq_p, nhp), f32),   # hidden_seq, batch-first
            jax.ShapeDtypeStruct((bp, seq_p, nop), f32),   # output, batch-first
        ),
        grid_spec=pltpu.PrefetchScalarGridSpec(
            num_scalar_prefetch=0,
            grid=(nb, n_chunks),
            in_specs=[
                pl.BlockSpec((None, tb * bb, num_input), lambda b, c: (b, c, 0)),  # x
                pl.BlockSpec((num_input, 4 * nhp), lambda b, c: (0, 0)),           # W
                pl.BlockSpec((nhp, 4 * nhp), lambda b, c: (0, 0)),                 # U
                pl.BlockSpec((1, 4 * nhp), lambda b, c: (0, 0)),                   # hid_bias
                pl.BlockSpec((nhp, nop), lambda b, c: (0, 0)),                     # V
                pl.BlockSpec((1, nop), lambda b, c: (0, 0)),                       # out_bias
            ],
            out_specs=(
                pl.BlockSpec((bb, tb, nhp), lambda b, c: (b, c, 0)),
                pl.BlockSpec((bb, tb, nop), lambda b, c: (b, c, 0)),
            ),
            scratch_shapes=[
                pltpu.VMEM((bb, nhp), f32),              # h carry (f32 across chunks)
                pltpu.VMEM((bb, nhp), f32),              # c carry (f32 across chunks)
                pltpu.VMEM((tb * bb, 4 * nhp), f32),     # gates_x chunk
                pltpu.VMEM((tb * bb, nhp), f32),         # hidden chunk (time-major)
            ],
        ),
        compiler_params=pltpu.CompilerParams(
            dimension_semantics=("parallel", "arbitrary"),   # batch-blocks || , time serial
            vmem_limit_bytes=_vmem_limit_bytes(),
        ),
    )(x_k, Wp.astype(bf16), Up.astype(bf16), hbp, Vp.astype(bf16), obp)

    # Outputs are already batch-first; only slice off the padding.
    hidden_seq = hseq_p[:batch, :seq, :num_hid]
    output = out_p[:batch, :seq, :num_out]
    return hidden_seq, output


def _reference_forward(x, W, U, hid_bias, V, out_bias):
    """Pure-JAX f32 reference mirroring the PyTorch loop (for verification)."""
    batch, seq, _ = x.shape
    nh = U.shape[0]
    h = jnp.zeros((batch, nh), jnp.float32)
    c = jnp.zeros((batch, nh), jnp.float32)
    hs = []
    for t in range(seq):
        x_t = x[:, t, :]
        gates = x_t @ W + h @ U + hid_bias
        i_t = jax.nn.sigmoid(gates[:, :nh])
        f_t = jax.nn.sigmoid(gates[:, nh:2 * nh])
        g_t = jnp.tanh(gates[:, 2 * nh:3 * nh])
        o_t = jax.nn.sigmoid(gates[:, 3 * nh:])
        c = f_t * c + i_t * g_t
        h = o_t * jnp.tanh(c)
        hs.append(h)
    hidden_seq = jnp.stack(hs, axis=1)
    output = hidden_seq @ V + out_bias
    return hidden_seq, output


if __name__ == "__main__":
    # Small shapes consistent with the module's forward: (batch, sequence, feature)
    batch, seq, num_input, num_hid, num_out = 2, 8, 16, 32, 8

    key = jax.random.PRNGKey(0)
    kx, kw, ku, kb, kv, ko = jax.random.split(key, 6)

    stdv = 1.0 / math.sqrt(num_hid)
    W = jax.random.uniform(kw, (num_input, 4 * num_hid), jnp.float32, -stdv, stdv)
    U = jax.random.uniform(ku, (num_hid, 4 * num_hid), jnp.float32, -stdv, stdv)
    hid_bias = jax.random.uniform(kb, (4 * num_hid,), jnp.float32, -stdv, stdv)
    V = jax.random.uniform(kv, (num_hid, num_out), jnp.float32, -stdv, stdv)
    out_bias = jax.random.uniform(ko, (num_out,), jnp.float32, -stdv, stdv)

    x = jax.random.normal(kx, (batch, seq, num_input), jnp.float32)

    hidden_seq, output = lstm_forward(x, W, U, hid_bias, V, out_bias)
    jax.block_until_ready((hidden_seq, output))

    # Correctness vs pure-JAX f32 reference. All MXU matmuls run in bf16 with f32
    # accumulation, hence the loosened tolerance.
    ref_h, ref_o = _reference_forward(x, W, U, hid_bias, V, out_bias)
    assert hidden_seq.shape == (batch, seq, num_hid)
    assert output.shape == (batch, seq, num_out)
    assert jnp.allclose(hidden_seq, ref_h, atol=3e-2, rtol=3e-2)
    assert jnp.allclose(output, ref_o, atol=3e-2, rtol=3e-2)

    print("KERNEL_OK")
</pallas_src>

<mosaic_0001>
module attributes {stable_mosaic.version = 11 : i64} {
  func.func @_lstm_fused_kernel(%arg0: i32, %arg1: i32, %arg2: memref<1x64x16xbf16, #tpu.memory_space<vmem>>, %arg3: memref<16x512xbf16, #tpu.memory_space<vmem>>, %arg4: memref<128x512xbf16, #tpu.memory_space<vmem>>, %arg5: memref<1x512xf32, #tpu.memory_space<vmem>>, %arg6: memref<128x128xbf16, #tpu.memory_space<vmem>>, %arg7: memref<1x128xf32, #tpu.memory_space<vmem>>, %arg8: memref<8x8x128xf32, #tpu.memory_space<vmem>>, %arg9: memref<8x8x128xf32, #tpu.memory_space<vmem>>, %arg10: memref<8x128xf32, #tpu.memory_space<vmem>>, %arg11: memref<8x128xf32, #tpu.memory_space<vmem>>, %arg12: memref<64x512xf32, #tpu.memory_space<vmem>>, %arg13: memref<64x128xf32, #tpu.memory_space<vmem>>) attributes {dimension_semantics = [#tpu.dimension_semantics<parallel>, #tpu.dimension_semantics<arbitrary>], iteration_bounds = array<i64: 1, 1>, scalar_prefetch = 0 : i64, scratch_operands = 4 : i64, tpu.core_type = #tpu.core_type<tc>, window_params = [{transform_indices = @transform_0, window_bounds = array<i64: 1, 64, 16>}, {pipeline_mode = #tpu.pipeline_mode<synchronous>, transform_indices = @transform_1, window_bounds = array<i64: 16, 512>}, {pipeline_mode = #tpu.pipeline_mode<synchronous>, transform_indices = @transform_2, window_bounds = array<i64: 128, 512>}, {pipeline_mode = #tpu.pipeline_mode<synchronous>, transform_indices = @transform_3, window_bounds = array<i64: 1, 512>}, {pipeline_mode = #tpu.pipeline_mode<synchronous>, transform_indices = @transform_4, window_bounds = array<i64: 128, 128>}, {pipeline_mode = #tpu.pipeline_mode<synchronous>, transform_indices = @transform_5, window_bounds = array<i64: 1, 128>}, {transform_indices = @transform_6, window_bounds = array<i64: 8, 8, 128>}, {transform_indices = @transform_7, window_bounds = array<i64: 8, 8, 128>}]} {
    %c0_i32 = arith.constant 0 : i32
    %0 = arith.cmpi eq, %arg1, %c0_i32 : i32
    %1 = arith.extui %0 : i1 to i32
    %c0_i32_0 = arith.constant 0 : i32
    %2 = arith.cmpi ne, %1, %c0_i32_0 : i32
    scf.if %2 {
      %cst_202 = arith.constant 0.000000e+00 : f32
      %382 = vector.broadcast %cst_202 : f32 to vector<8x128xf32>
      %c0_203 = arith.constant 0 : index
      %c0_204 = arith.constant 0 : index
      %383 = vector.load %arg10[%c0_203, %c0_204] : memref<8x128xf32, #tpu.memory_space<vmem>>, vector<8x128xf32>
      tpu.vector_store %arg10[%c0_203, %c0_204], %382 {strides = array<i32>} : memref<8x128xf32, #tpu.memory_space<vmem>>, vector<8x128xf32>,
      %cst_205 = arith.constant 0.000000e+00 : f32
      %384 = vector.broadcast %cst_205 : f32 to vector<8x128xf32>
      %c0_206 = arith.constant 0 : index
      %c0_207 = arith.constant 0 : index
      %385 = vector.load %arg11[%c0_206, %c0_207] : memref<8x128xf32, #tpu.memory_space<vmem>>, vector<8x128xf32>
      tpu.vector_store %arg11[%c0_206, %c0_207], %384 {strides = array<i32>} : memref<8x128xf32, #tpu.memory_space<vmem>>, vector<8x128xf32>,
    } else {
    }
    %c0 = arith.constant 0 : index
    %c0_1 = arith.constant 0 : index
    %c0_2 = arith.constant 0 : index
    %3 = vector.load %arg2[%c0, %c0_1, %c0_2] : memref<1x64x16xbf16, #tpu.memory_space<vmem>>, vector<1x64x16xbf16>
    %4 = vector.shape_cast %3 : vector<1x64x16xbf16> to vector<64x16xbf16>
    %c0_3 = arith.constant 0 : index
    %c0_4 = arith.constant 0 : index
    %5 = vector.load %arg3[%c0_3, %c0_4] : memref<16x512xbf16, #tpu.memory_space<vmem>>, vector<16x512xbf16>
    %cst = arith.constant dense<0.000000e+00> : vector<64x512xf32>
    %6 = tpu.matmul %4, %5, %cst {dimension_numbers = #tpu.dot_dimension_numbers<[1], [0], [0], [1], [0, 0, 1, 1], [], []>} : vector<64x16xbf16>, vector<16x512xbf16>, vector<64x512xf32> -> vector<64x512xf32>
    %c0_5 = arith.constant 0 : index
    %c0_6 = arith.constant 0 : index
    %7 = vector.load %arg5[%c0_5, %c0_6] : memref<1x512xf32, #tpu.memory_space<vmem>>, vector<1x512xf32>
    %8 = vector.broadcast %7 : vector<1x512xf32> to vector<64x512xf32>
    %9 = arith.addf %6, %8 : vector<64x512xf32>
    %c0_7 = arith.constant 0 : index
    %c0_8 = arith.constant 0 : index
    %10 = vector.load %arg12[%c0_7, %c0_8] : memref<64x512xf32, #tpu.memory_space<vmem>>, vector<64x512xf32>
    tpu.vector_store %arg12[%c0_7, %c0_8], %9 {strides = array<i32>} : memref<64x512xf32, #tpu.memory_space<vmem>>, vector<64x512xf32>,
    %c0_9 = arith.constant 0 : index
    %c0_10 = arith.constant 0 : index
    %11 = vector.load %arg10[%c0_9, %c0_10] : memref<8x128xf32, #tpu.memory_space<vmem>>, vector<8x128xf32>
    %c0_11 = arith.constant 0 : index
    %c0_12 = arith.constant 0 : index
    %12 = vector.load %arg11[%c0_11, %c0_12] : memref<8x128xf32, #tpu.memory_space<vmem>>, vector<8x128xf32>
    %c0_13 = arith.constant 0 : index
    %c0_14 = arith.constant 0 : index
    %13 = vector.load %arg12[%c0_13, %c0_14] : memref<64x512xf32, #tpu.memory_space<vmem>>, vector<8x512xf32>
    %14 = arith.truncf %11 : vector<8x128xf32> to vector<8x128xbf16>
    %c0_15 = arith.constant 0 : index
    %c0_16 = arith.constant 0 : index
    %15 = vector.load %arg4[%c0_15, %c0_16] : memref<128x512xbf16, #tpu.memory_space<vmem>>, vector<128x512xbf16>
    %cst_17 = arith.constant dense<0.000000e+00> : vector<8x512xf32>
    %16 = tpu.matmul %14, %15, %cst_17 {dimension_numbers = #tpu.dot_dimension_numbers<[1], [0], [0], [1], [0, 0, 1, 1], [], []>} : vector<8x128xbf16>, vector<128x512xbf16>, vector<8x512xf32> -> vector<8x512xf32>
    %17 = arith.addf %13, %16 : vector<8x512xf32>
    %18 = vector.extract_strided_slice %17 {offsets = [0, 0], sizes = [8, 128], strides = [1, 1]} : vector<8x512xf32> to vector<8x128xf32>
    %cst_18 = arith.constant 5.000000e-01 : f32
    %19 = vector.broadcast %cst_18 : f32 to vector<8x128xf32>
    %20 = arith.mulf %19, %18 : vector<8x128xf32>
    %21 = math.tanh %20 : vector<8x128xf32>
    %cst_19 = arith.constant 5.000000e-01 : f32
    %22 = vector.broadcast %cst_19 : f32 to vector<8x128xf32>
    %23 = arith.mulf %22, %21 : vector<8x128xf32>
    %cst_20 = arith.constant 5.000000e-01 : f32
    %24 = vector.broadcast %cst_20 : f32 to vector<8x128xf32>
    %25 = arith.addf %23, %24 : vector<8x128xf32>
    %26 = vector.extract_strided_slice %17 {offsets = [0, 128], sizes = [8, 128], strides = [1, 1]} : vector<8x512xf32> to vector<8x128xf32>
    %cst_21 = arith.constant 5.000000e-01 : f32
    %27 = vector.broadcast %cst_21 : f32 to vector<8x128xf32>
    %28 = arith.mulf %27, %26 : vector<8x128xf32>
    %29 = math.tanh %28 : vector<8x128xf32>
    %cst_22 = arith.constant 5.000000e-01 : f32
    %30 = vector.broadcast %cst_22 : f32 to vector<8x128xf32>
    %31 = arith.mulf %30, %29 : vector<8x128xf32>
    %cst_23 = arith.constant 5.000000e-01 : f32
    %32 = vector.broadcast %cst_23 : f32 to vector<8x128xf32>
    %33 = arith.addf %31, %32 : vector<8x128xf32>
    %34 = vector.extract_strided_slice %17 {offsets = [0, 256], sizes = [8, 128], strides = [1, 1]} : vector<8x512xf32> to vector<8x128xf32>
    %35 = math.tanh %34 : vector<8x128xf32>
    %36 = vector.extract_strided_slice %17 {offsets = [0, 384], sizes = [8, 128], strides = [1, 1]} : vector<8x512xf32> to vector<8x128xf32>
    %cst_24 = arith.constant 5.000000e-01 : f32
    %37 = vector.broadcast %cst_24 : f32 to vector<8x128xf32>
    %38 = arith.mulf %37, %36 : vector<8x128xf32>
    %39 = math.tanh %38 : vector<8x128xf32>
    %cst_25 = arith.constant 5.000000e-01 : f32
    %40 = vector.broadcast %cst_25 : f32 to vector<8x128xf32>
    %41 = arith.mulf %40, %39 : vector<8x128xf32>
    %cst_26 = arith.constant 5.000000e-01 : f32
    %42 = vector.broadcast %cst_26 : f32 to vector<8x128xf32>
    %43 = arith.addf %41, %42 : vector<8x128xf32>
    %44 = arith.mulf %33, %12 : vector<8x128xf32>
    %45 = arith.mulf %25, %35 : vector<8x128xf32>
    %46 = arith.addf %44, %45 : vector<8x128xf32>
    %47 = math.tanh %46 : vector<8x128xf32>
    %48 = arith.mulf %43, %47 : vector<8x128xf32>
    %c0_27 = arith.constant 0 : index
    %c0_28 = arith.constant 0 : index
    %49 = vector.load %arg13[%c0_27, %c0_28] : memref<64x128xf32, #tpu.memory_space<vmem>>, vector<8x128xf32>
    tpu.vector_store %arg13[%c0_27, %c0_28], %48 {strides = array<i32>} : memref<64x128xf32, #tpu.memory_space<vmem>>, vector<8x128xf32>,
    %c8 = arith.constant 8 : index
    %c0_29 = arith.constant 0 : index
    %50 = vector.load %arg12[%c8, %c0_29] : memref<64x512xf32, #tpu.memory_space<vmem>>, vector<8x512xf32>
    %51 = arith.truncf %48 : vector<8x128xf32> to vector<8x128xbf16>
    %c0_30 = arith.constant 0 : index
    %c0_31 = arith.constant 0 : index
    %52 = vector.load %arg4[%c0_30, %c0_31] : memref<128x512xbf16, #tpu.memory_space<vmem>>, vector<128x512xbf16>
    %cst_32 = arith.constant dense<0.000000e+00> : vector<8x512xf32>
    %53 = tpu.matmul %51, %52, %cst_32 {dimension_numbers = #tpu.dot_dimension_numbers<[1], [0], [0], [1], [0, 0, 1, 1], [], []>} : vector<8x128xbf16>, vector<128x512xbf16>, vector<8x512xf32> -> vector<8x512xf32>
    %54 = arith.addf %50, %53 : vector<8x512xf32>
    %55 = vector.extract_strided_slice %54 {offsets = [0, 0], sizes = [8, 128], strides = [1, 1]} : vector<8x512xf32> to vector<8x128xf32>
    %cst_33 = arith.constant 5.000000e-01 : f32
    %56 = vector.broadcast %cst_33 : f32 to vector<8x128xf32>
    %57 = arith.mulf %56, %55 : vector<8x128xf32>
    %58 = math.tanh %57 : vector<8x128xf32>
    %cst_34 = arith.constant 5.000000e-01 : f32
    %59 = vector.broadcast %cst_34 : f32 to vector<8x128xf32>
    %60 = arith.mulf %59, %58 : vector<8x128xf32>
    %cst_35 = arith.constant 5.000000e-01 : f32
    %61 = vector.broadcast %cst_35 : f32 to vector<8x128xf32>
    %62 = arith.addf %60, %61 : vector<8x128xf32>
    %63 = vector.extract_strided_slice %54 {offsets = [0, 128], sizes = [8, 128], strides = [1, 1]} : vector<8x512xf32> to vector<8x128xf32>
    %cst_36 = arith.constant 5.000000e-01 : f32
    %64 = vector.broadcast %cst_36 : f32 to vector<8x128xf32>
    %65 = arith.mulf %64, %63 : vector<8x128xf32>
    %66 = math.tanh %65 : vector<8x128xf32>
    %cst_37 = arith.constant 5.000000e-01 : f32
    %67 = vector.broadcast %cst_37 : f32 to vector<8x128xf32>
    %68 = arith.mulf %67, %66 : vector<8x128xf32>
    %cst_38 = arith.constant 5.000000e-01 : f32
    %69 = vector.broadcast %cst_38 : f32 to vector<8x128xf32>
    %70 = arith.addf %68, %69 : vector<8x128xf32>
    %71 = vector.extract_strided_slice %54 {offsets = [0, 256], sizes = [8, 128], strides = [1, 1]} : vector<8x512xf32> to vector<8x128xf32>
    %72 = math.tanh %71 : vector<8x128xf32>
    %73 = vector.extract_strided_slice %54 {offsets = [0, 384], sizes = [8, 128], strides = [1, 1]} : vector<8x512xf32> to vector<8x128xf32>
    %cst_39 = arith.constant 5.000000e-01 : f32
    %74 = vector.broadcast %cst_39 : f32 to vector<8x128xf32>
    %75 = arith.mulf %74, %73 : vector<8x128xf32>
    %76 = math.tanh %75 : vector<8x128xf32>
    %cst_40 = arith.constant 5.000000e-01 : f32
    %77 = vector.broadcast %cst_40 : f32 to vector<8x128xf32>
    %78 = arith.mulf %77, %76 : vector<8x128xf32>
    %cst_41 = arith.constant 5.000000e-01 : f32
    %79 = vector.broadcast %cst_41 : f32 to vector<8x128xf32>
    %80 = arith.addf %78, %79 : vector<8x128xf32>
    %81 = arith.mulf %70, %46 : vector<8x128xf32>
    %82 = arith.mulf %62, %72 : vector<8x128xf32>
    %83 = arith.addf %81, %82 : vector<8x128xf32>
    %84 = math.tanh %83 : vector<8x128xf32>
    %85 = arith.mulf %80, %84 : vector<8x128xf32>
    %c8_42 = arith.constant 8 : index
    %c0_43 = arith.constant 0 : index
    %86 = vector.load %arg13[%c8_42, %c0_43] : memref<64x128xf32, #tpu.memory_space<vmem>>, vector<8x128xf32>
    tpu.vector_store %arg13[%c8_42, %c0_43], %85 {strides = array<i32>} : memref<64x128xf32, #tpu.memory_space<vmem>>, vector<8x128xf32>,
    %c16 = arith.constant 16 : index
    %c0_44 = arith.constant 0 : index
    %87 = vector.load %arg12[%c16, %c0_44] : memref<64x512xf32, #tpu.memory_space<vmem>>, vector<8x512xf32>
    %88 = arith.truncf %85 : vector<8x128xf32> to vector<8x128xbf16>
    %c0_45 = arith.constant 0 : index
    %c0_46 = arith.constant 0 : index
    %89 = vector.load %arg4[%c0_45, %c0_46] : memref<128x512xbf16, #tpu.memory_space<vmem>>, vector<128x512xbf16>
    %cst_47 = arith.constant dense<0.000000e+00> : vector<8x512xf32>
    %90 = tpu.matmul %88, %89, %cst_47 {dimension_numbers = #tpu.dot_dimension_numbers<[1], [0], [0], [1], [0, 0, 1, 1], [], []>} : vector<8x128xbf16>, vector<128x512xbf16>, vector<8x512xf32> -> vector<8x512xf32>
    %91 = arith.addf %87, %90 : vector<8x512xf32>
    %92 = vector.extract_strided_slice %91 {offsets = [0, 0], sizes = [8, 128], strides = [1, 1]} : vector<8x512xf32> to vector<8x128xf32>
    %cst_48 = arith.constant 5.000000e-01 : f32
    %93 = vector.broadcast %cst_48 : f32 to vector<8x128xf32>
    %94 = arith.mulf %93, %92 : vector<8x128xf32>
    %95 = math.tanh %94 : vector<8x128xf32>
    %cst_49 = arith.constant 5.000000e-01 : f32
    %96 = vector.broadcast %cst_49 : f32 to vector<8x128xf32>
    %97 = arith.mulf %96, %95 : vector<8x128xf32>
    %cst_50 = arith.constant 5.000000e-01 : f32
    %98 = vector.broadcast %cst_50 : f32 to vector<8x128xf32>
    %99 = arith.addf %97, %98 : vector<8x128xf32>
    %100 = vector.extract_strided_slice %91 {offsets = [0, 128], sizes = [8, 128], strides = [1, 1]} : vector<8x512xf32> to vector<8x128xf32>
    %cst_51 = arith.constant 5.000000e-01 : f32
    %101 = vector.broadcast %cst_51 : f32 to vector<8x128xf32>
    %102 = arith.mulf %101, %100 : vector<8x128xf32>
    %103 = math.tanh %102 : vector<8x128xf32>
    %cst_52 = arith.constant 5.000000e-01 : f32
    %104 = vector.broadcast %cst_52 : f32 to vector<8x128xf32>
    %105 = arith.mulf %104, %103 : vector<8x128xf32>
    %cst_53 = arith.constant 5.000000e-01 : f32
    %106 = vector.broadcast %cst_53 : f32 to vector<8x128xf32>
    %107 = arith.addf %105, %106 : vector<8x128xf32>
    %108 = vector.extract_strided_slice %91 {offsets = [0, 256], sizes = [8, 128], strides = [1, 1]} : vector<8x512xf32> to vector<8x128xf32>
    %109 = math.tanh %108 : vector<8x128xf32>
    %110 = vector.extract_strided_slice %91 {offsets = [0, 384], sizes = [8, 128], strides = [1, 1]} : vector<8x512xf32> to vector<8x128xf32>
    %cst_54 = arith.constant 5.000000e-01 : f32
    %111 = vector.broadcast %cst_54 : f32 to vector<8x128xf32>
    %112 = arith.mulf %111, %110 : vector<8x128xf32>
    %113 = math.tanh %112 : vector<8x128xf32>
    %cst_55 = arith.constant 5.000000e-01 : f32
    %114 = vector.broadcast %cst_55 : f32 to vector<8x128xf32>
    %115 = arith.mulf %114, %113 : vector<8x128xf32>
    %cst_56 = arith.constant 5.000000e-01 : f32
    %116 = vector.broadcast %cst_56 : f32 to vector<8x128xf32>
    %117 = arith.addf %115, %116 : vector<8x128xf32>
    %118 = arith.mulf %107, %83 : vector<8x128xf32>
    %119 = arith.mulf %99, %109 : vector<8x128xf32>
    %120 = arith.addf %118, %119 : vector<8x128xf32>
    %121 = math.tanh %120 : vector<8x128xf32>
    %122 = arith.mulf %117, %121 : vector<8x128xf32>
    %c16_57 = arith.constant 16 : index
    %c0_58 = arith.constant 0 : index
    %123 = vector.load %arg13[%c16_57, %c0_58] : memref<64x128xf32, #tpu.memory_space<vmem>>, vector<8x128xf32>
    tpu.vector_store %arg13[%c16_57, %c0_58], %122 {strides = array<i32>} : memref<64x128xf32, #tpu.memory_space<vmem>>, vector<8x128xf32>,
    %c24 = arith.constant 24 : index
    %c0_59 = arith.constant 0 : index
    %124 = vector.load %arg12[%c24, %c0_59] : memref<64x512xf32, #tpu.memory_space<vmem>>, vector<8x512xf32>
    %125 = arith.truncf %122 : vector<8x128xf32> to vector<8x128xbf16>
    %c0_60 = arith.constant 0 : index
    %c0_61 = arith.constant 0 : index
    %126 = vector.load %arg4[%c0_60, %c0_61] : memref<128x512xbf16, #tpu.memory_space<vmem>>, vector<128x512xbf16>
    %cst_62 = arith.constant dense<0.000000e+00> : vector<8x512xf32>
    %127 = tpu.matmul %125, %126, %cst_62 {dimension_numbers = #tpu.dot_dimension_numbers<[1], [0], [0], [1], [0, 0, 1, 1], [], []>} : vector<8x128xbf16>, vector<128x512xbf16>, vector<8x512xf32> -> vector<8x512xf32>
    %128 = arith.addf %124, %127 : vector<8x512xf32>
    %129 = vector.extract_strided_slice %128 {offsets = [0, 0], sizes = [8, 128], strides = [1, 1]} : vector<8x512xf32> to vector<8x128xf32>
    %cst_63 = arith.constant 5.000000e-01 : f32
    %130 = vector.broadcast %cst_63 : f32 to vector<8x128xf32>
    %131 = arith.mulf %130, %129 : vector<8x128xf32>
    %132 = math.tanh %131 : vector<8x128xf32>
    %cst_64 = arith.constant 5.000000e-01 : f32
    %133 = vector.broadcast %cst_64 : f32 to vector<8x128xf32>
    %134 = arith.mulf %133, %132 : vector<8x128xf32>
    %cst_65 = arith.constant 5.000000e-01 : f32
    %135 = vector.broadcast %cst_65 : f32 to vector<8x128xf32>
    %136 = arith.addf %134, %135 : vector<8x128xf32>
    %137 = vector.extract_strided_slice %128 {offsets = [0, 128], sizes = [8, 128], strides = [1, 1]} : vector<8x512xf32> to vector<8x128xf32>
    %cst_66 = arith.constant 5.000000e-01 : f32
    %138 = vector.broadcast %cst_66 : f32 to vector<8x128xf32>
    %139 = arith.mulf %138, %137 : vector<8x128xf32>
    %140 = math.tanh %139 : vector<8x128xf32>
    %cst_67 = arith.constant 5.000000e-01 : f32
    %141 = vector.broadcast %cst_67 : f32 to vector<8x128xf32>
    %142 = arith.mulf %141, %140 : vector<8x128xf32>
    %cst_68 = arith.constant 5.000000e-01 : f32
    %143 = vector.broadcast %cst_68 : f32 to vector<8x128xf32>
    %144 = arith.addf %142, %143 : vector<8x128xf32>
    %145 = vector.extract_strided_slice %128 {offsets = [0, 256], sizes = [8, 128], strides = [1, 1]} : vector<8x512xf32> to vector<8x128xf32>
    %146 = math.tanh %145 : vector<8x128xf32>
    %147 = vector.extract_strided_slice %128 {offsets = [0, 384], sizes = [8, 128], strides = [1, 1]} : vector<8x512xf32> to vector<8x128xf32>
    %cst_69 = arith.constant 5.000000e-01 : f32
    %148 = vector.broadcast %cst_69 : f32 to vector<8x128xf32>
    %149 = arith.mulf %148, %147 : vector<8x128xf32>
    %150 = math.tanh %149 : vector<8x128xf32>
    %cst_70 = arith.constant 5.000000e-01 : f32
    %151 = vector.broadcast %cst_70 : f32 to vector<8x128xf32>
    %152 = arith.mulf %151, %150 : vector<8x128xf32>
    %cst_71 = arith.constant 5.000000e-01 : f32
    %153 = vector.broadcast %cst_71 : f32 to vector<8x128xf32>
    %154 = arith.addf %152, %153 : vector<8x128xf32>
    %155 = arith.mulf %144, %120 : vector<8x128xf32>
    %156 = arith.mulf %136, %146 : vector<8x128xf32>
    %157 = arith.addf %155, %156 : vector<8x128xf32>
    %158 = math.tanh %157 : vector<8x128xf32>
    %159 = arith.mulf %154, %158 : vector<8x128xf32>
    %c24_72 = arith.constant 24 : index
    %c0_73 = arith.constant 0 : index
    %160 = vector.load %arg13[%c24_72, %c0_73] : memref<64x128xf32, #tpu.memory_space<vmem>>, vector<8x128xf32>
    tpu.vector_store %arg13[%c24_72, %c0_73], %159 {strides = array<i32>} : memref<64x128xf32, #tpu.memory_space<vmem>>, vector<8x128xf32>,
    %c32 = arith.constant 32 : index
    %c0_74 = arith.constant 0 : index
    %161 = vector.load %arg12[%c32, %c0_74] : memref<64x512xf32, #tpu.memory_space<vmem>>, vector<8x512xf32>
    %162 = arith.truncf %159 : vector<8x128xf32> to vector<8x128xbf16>
    %c0_75 = arith.constant 0 : index
    %c0_76 = arith.constant 0 : index
    %163 = vector.load %arg4[%c0_75, %c0_76] : memref<128x512xbf16, #tpu.memory_space<vmem>>, vector<128x512xbf16>
    %cst_77 = arith.constant dense<0.000000e+00> : vector<8x512xf32>
    %164 = tpu.matmul %162, %163, %cst_77 {dimension_numbers = #tpu.dot_dimension_numbers<[1], [0], [0], [1], [0, 0, 1, 1], [], []>} : vector<8x128xbf16>, vector<128x512xbf16>, vector<8x512xf32> -> vector<8x512xf32>
    %165 = arith.addf %161, %164 : vector<8x512xf32>
    %166 = vector.extract_strided_slice %165 {offsets = [0, 0], sizes = [8, 128], strides = [1, 1]} : vector<8x512xf32> to vector<8x128xf32>
    %cst_78 = arith.constant 5.000000e-01 : f32
    %167 = vector.broadcast %cst_78 : f32 to vector<8x128xf32>
    %168 = arith.mulf %167, %166 : vector<8x128xf32>
    %169 = math.tanh %168 : vector<8x128xf32>
    %cst_79 = arith.constant 5.000000e-01 : f32
    %170 = vector.broadcast %cst_79 : f32 to vector<8x128xf32>
    %171 = arith.mulf %170, %169 : vector<8x128xf32>
    %cst_80 = arith.constant 5.000000e-01 : f32
    %172 = vector.broadcast %cst_80 : f32 to vector<8x128xf32>
    %173 = arith.addf %171, %172 : vector<8x128xf32>
    %174 = vector.extract_strided_slice %165 {offsets = [0, 128], sizes = [8, 128], strides = [1, 1]} : vector<8x512xf32> to vector<8x128xf32>
    %cst_81 = arith.constant 5.000000e-01 : f32
    %175 = vector.broadcast %cst_81 : f32 to vector<8x128xf32>
    %176 = arith.mulf %175, %174 : vector<8x128xf32>
    %177 = math.tanh %176 : vector<8x128xf32>
    %cst_82 = arith.constant 5.000000e-01 : f32
    %178 = vector.broadcast %cst_82 : f32 to vector<8x128xf32>
    %179 = arith.mulf %178, %177 : vector<8x128xf32>
    %cst_83 = arith.constant 5.000000e-01 : f32
    %180 = vector.broadcast %cst_83 : f32 to vector<8x128xf32>
    %181 = arith.addf %179, %180 : vector<8x128xf32>
    %182 = vector.extract_strided_slice %165 {offsets = [0, 256], sizes = [8, 128], strides = [1, 1]} : vector<8x512xf32> to vector<8x128xf32>
    %183 = math.tanh %182 : vector<8x128xf32>
    %184 = vector.extract_strided_slice %165 {offsets = [0, 384], sizes = [8, 128], strides = [1, 1]} : vector<8x512xf32> to vector<8x128xf32>
    %cst_84 = arith.constant 5.000000e-01 : f32
    %185 = vector.broadcast %cst_84 : f32 to vector<8x128xf32>
    %186 = arith.mulf %185, %184 : vector<8x128xf32>
    %187 = math.tanh %186 : vector<8x128xf32>
    %cst_85 = arith.constant 5.000000e-01 : f32
    %188 = vector.broadcast %cst_85 : f32 to vector<8x128xf32>
    %189 = arith.mulf %188, %187 : vector<8x128xf32>
    %cst_86 = arith.constant 5.000000e-01 : f32
    %190 = vector.broadcast %cst_86 : f32 to vector<8x128xf32>
    %191 = arith.addf %189, %190 : vector<8x128xf32>
    %192 = arith.mulf %181, %157 : vector<8x128xf32>
    %193 = arith.mulf %173, %183 : vector<8x128xf32>
    %194 = arith.addf %192, %193 : vector<8x128xf32>
    %195 = math.tanh %194 : vector<8x128xf32>
    %196 = arith.mulf %191, %195 : vector<8x128xf32>
    %c32_87 = arith.constant 32 : index
    %c0_88 = arith.constant 0 : index
    %197 = vector.load %arg13[%c32_87, %c0_88] : memref<64x128xf32, #tpu.memory_space<vmem>>, vector<8x128xf32>
    tpu.vector_store %arg13[%c32_87, %c0_88], %196 {strides = array<i32>} : memref<64x128xf32, #tpu.memory_space<vmem>>, vector<8x128xf32>,
    %c40 = arith.constant 40 : index
    %c0_89 = arith.constant 0 : index
    %198 = vector.load %arg12[%c40, %c0_89] : memref<64x512xf32, #tpu.memory_space<vmem>>, vector<8x512xf32>
    %199 = arith.truncf %196 : vector<8x128xf32> to vector<8x128xbf16>
    %c0_90 = arith.constant 0 : index
    %c0_91 = arith.constant 0 : index
    %200 = vector.load %arg4[%c0_90, %c0_91] : memref<128x512xbf16, #tpu.memory_space<vmem>>, vector<128x512xbf16>
    %cst_92 = arith.constant dense<0.000000e+00> : vector<8x512xf32>
    %201 = tpu.matmul %199, %200, %cst_92 {dimension_numbers = #tpu.dot_dimension_numbers<[1], [0], [0], [1], [0, 0, 1, 1], [], []>} : vector<8x128xbf16>, vector<128x512xbf16>, vector<8x512xf32> -> vector<8x512xf32>
    %202 = arith.addf %198, %201 : vector<8x512xf32>
    %203 = vector.extract_strided_slice %202 {offsets = [0, 0], sizes = [8, 128], strides = [1, 1]} : vector<8x512xf32> to vector<8x128xf32>
    %cst_93 = arith.constant 5.000000e-01 : f32
    %204 = vector.broadcast %cst_93 : f32 to vector<8x128xf32>
    %205 = arith.mulf %204, %203 : vector<8x128xf32>
    %206 = math.tanh %205 : vector<8x128xf32>
    %cst_94 = arith.constant 5.000000e-01 : f32
    %207 = vector.broadcast %cst_94 : f32 to vector<8x128xf32>
    %208 = arith.mulf %207, %206 : vector<8x128xf32>
    %cst_95 = arith.constant 5.000000e-01 : f32
    %209 = vector.broadcast %cst_95 : f32 to vector<8x128xf32>
    %210 = arith.addf %208, %209 : vector<8x128xf32>
    %211 = vector.extract_strided_slice %202 {offsets = [0, 128], sizes = [8, 128], strides = [1, 1]} : vector<8x512xf32> to vector<8x128xf32>
    %cst_96 = arith.constant 5.000000e-01 : f32
    %212 = vector.broadcast %cst_96 : f32 to vector<8x128xf32>
    %213 = arith.mulf %212, %211 : vector<8x128xf32>
    %214 = math.tanh %213 : vector<8x128xf32>
    %cst_97 = arith.constant 5.000000e-01 : f32
    %215 = vector.broadcast %cst_97 : f32 to vector<8x128xf32>
    %216 = arith.mulf %215, %214 : vector<8x128xf32>
    %cst_98 = arith.constant 5.000000e-01 : f32
    %217 = vector.broadcast %cst_98 : f32 to vector<8x128xf32>
    %218 = arith.addf %216, %217 : vector<8x128xf32>
    %219 = vector.extract_strided_slice %202 {offsets = [0, 256], sizes = [8, 128], strides = [1, 1]} : vector<8x512xf32> to vector<8x128xf32>
    %220 = math.tanh %219 : vector<8x128xf32>
    %221 = vector.extract_strided_slice %202 {offsets = [0, 384], sizes = [8, 128], strides = [1, 1]} : vector<8x512xf32> to vector<8x128xf32>
    %cst_99 = arith.constant 5.000000e-01 : f32
    %222 = vector.broadcast %cst_99 : f32 to vector<8x128xf32>
    %223 = arith.mulf %222, %221 : vector<8x128xf32>
    %224 = math.tanh %223 : vector<8x128xf32>
    %cst_100 = arith.constant 5.000000e-01 : f32
    %225 = vector.broadcast %cst_100 : f32 to vector<8x128xf32>
    %226 = arith.mulf %225, %224 : vector<8x128xf32>
    %cst_101 = arith.constant 5.000000e-01 : f32
    %227 = vector.broadcast %cst_101 : f32 to vector<8x128xf32>
    %228 = arith.addf %226, %227 : vector<8x128xf32>
    %229 = arith.mulf %218, %194 : vector<8x128xf32>
    %230 = arith.mulf %210, %220 : vector<8x128xf32>
    %231 = arith.addf %229, %230 : vector<8x128xf32>
    %232 = math.tanh %231 : vector<8x128xf32>
    %233 = arith.mulf %228, %232 : vector<8x128xf32>
    %c40_102 = arith.constant 40 : index
    %c0_103 = arith.constant 0 : index
    %234 = vector.load %arg13[%c40_102, %c0_103] : memref<64x128xf32, #tpu.memory_space<vmem>>, vector<8x128xf32>
    tpu.vector_store %arg13[%c40_102, %c0_103], %233 {strides = array<i32>} : memref<64x128xf32, #tpu.memory_space<vmem>>, vector<8x128xf32>,
    %c48 = arith.constant 48 : index
    %c0_104 = arith.constant 0 : index
    %235 = vector.load %arg12[%c48, %c0_104] : memref<64x512xf32, #tpu.memory_space<vmem>>, vector<8x512xf32>
    %236 = arith.truncf %233 : vector<8x128xf32> to vector<8x128xbf16>
    %c0_105 = arith.constant 0 : index
    %c0_106 = arith.constant 0 : index
    %237 = vector.load %arg4[%c0_105, %c0_106] : memref<128x512xbf16, #tpu.memory_space<vmem>>, vector<128x512xbf16>
    %cst_107 = arith.constant dense<0.000000e+00> : vector<8x512xf32>
    %238 = tpu.matmul %236, %237, %cst_107 {dimension_numbers = #tpu.dot_dimension_numbers<[1], [0], [0], [1], [0, 0, 1, 1], [], []>} : vector<8x128xbf16>, vector<128x512xbf16>, vector<8x512xf32> -> vector<8x512xf32>
    %239 = arith.addf %235, %238 : vector<8x512xf32>
    %240 = vector.extract_strided_slice %239 {offsets = [0, 0], sizes = [8, 128], strides = [1, 1]} : vector<8x512xf32> to vector<8x128xf32>
    %cst_108 = arith.constant 5.000000e-01 : f32
    %241 = vector.broadcast %cst_108 : f32 to vector<8x128xf32>
    %242 = arith.mulf %241, %240 : vector<8x128xf32>
    %243 = math.tanh %242 : vector<8x128xf32>
    %cst_109 = arith.constant 5.000000e-01 : f32
    %244 = vector.broadcast %cst_109 : f32 to vector<8x128xf32>
    %245 = arith.mulf %244, %243 : vector<8x128xf32>
    %cst_110 = arith.constant 5.000000e-01 : f32
    %246 = vector.broadcast %cst_110 : f32 to vector<8x128xf32>
    %247 = arith.addf %245, %246 : vector<8x128xf32>
    %248 = vector.extract_strided_slice %239 {offsets = [0, 128], sizes = [8, 128], strides = [1, 1]} : vector<8x512xf32> to vector<8x128xf32>
    %cst_111 = arith.constant 5.000000e-01 : f32
    %249 = vector.broadcast %cst_111 : f32 to vector<8x128xf32>
    %250 = arith.mulf %249, %248 : vector<8x128xf32>
    %251 = math.tanh %250 : vector<8x128xf32>
    %cst_112 = arith.constant 5.000000e-01 : f32
    %252 = vector.broadcast %cst_112 : f32 to vector<8x128xf32>
    %253 = arith.mulf %252, %251 : vector<8x128xf32>
    %cst_113 = arith.constant 5.000000e-01 : f32
    %254 = vector.broadcast %cst_113 : f32 to vector<8x128xf32>
    %255 = arith.addf %253, %254 : vector<8x128xf32>
    %256 = vector.extract_strided_slice %239 {offsets = [0, 256], sizes = [8, 128], strides = [1, 1]} : vector<8x512xf32> to vector<8x128xf32>
    %257 = math.tanh %256 : vector<8x128xf32>
    %258 = vector.extract_strided_slice %239 {offsets = [0, 384], sizes = [8, 128], strides = [1, 1]} : vector<8x512xf32> to vector<8x128xf32>
    %cst_114 = arith.constant 5.000000e-01 : f32
    %259 = vector.broadcast %cst_114 : f32 to vector<8x128xf32>
    %260 = arith.mulf %259, %258 : vector<8x128xf32>
    %261 = math.tanh %260 : vector<8x128xf32>
    %cst_115 = arith.constant 5.000000e-01 : f32
    %262 = vector.broadcast %cst_115 : f32 to vector<8x128xf32>
    %263 = arith.mulf %262, %261 : vector<8x128xf32>
    %cst_116 = arith.constant 5.000000e-01 : f32
    %264 = vector.broadcast %cst_116 : f32 to vector<8x128xf32>
    %265 = arith.addf %263, %264 : vector<8x128xf32>
    %266 = arith.mulf %255, %231 : vector<8x128xf32>
    %267 = arith.mulf %247, %257 : vector<8x128xf32>
    %268 = arith.addf %266, %267 : vector<8x128xf32>
    %269 = math.tanh %268 : vector<8x128xf32>
    %270 = arith.mulf %265, %269 : vector<8x128xf32>
    %c48_117 = arith.constant 48 : index
    %c0_118 = arith.constant 0 : index
    %271 = vector.load %arg13[%c48_117, %c0_118] : memref<64x128xf32, #tpu.memory_space<vmem>>, vector<8x128xf32>
    tpu.vector_store %arg13[%c48_117, %c0_118], %270 {strides = array<i32>} : memref<64x128xf32, #tpu.memory_space<vmem>>, vector<8x128xf32>,
    %c56 = arith.constant 56 : index
    %c0_119 = arith.constant 0 : index
    %272 = vector.load %arg12[%c56, %c0_119] : memref<64x512xf32, #tpu.memory_space<vmem>>, vector<8x512xf32>
    %273 = arith.truncf %270 : vector<8x128xf32> to vector<8x128xbf16>
    %c0_120 = arith.constant 0 : index
    %c0_121 = arith.constant 0 : index
    %274 = vector.load %arg4[%c0_120, %c0_121] : memref<128x512xbf16, #tpu.memory_space<vmem>>, vector<128x512xbf16>
    %cst_122 = arith.constant dense<0.000000e+00> : vector<8x512xf32>
    %275 = tpu.matmul %273, %274, %cst_122 {dimension_numbers = #tpu.dot_dimension_numbers<[1], [0], [0], [1], [0, 0, 1, 1], [], []>} : vector<8x128xbf16>, vector<128x512xbf16>, vector<8x512xf32> -> vector<8x512xf32>
    %276 = arith.addf %272, %275 : vector<8x512xf32>
    %277 = vector.extract_strided_slice %276 {offsets = [0, 0], sizes = [8, 128], strides = [1, 1]} : vector<8x512xf32> to vector<8x128xf32>
    %cst_123 = arith.constant 5.000000e-01 : f32
    %278 = vector.broadcast %cst_123 : f32 to vector<8x128xf32>
    %279 = arith.mulf %278, %277 : vector<8x128xf32>
    %280 = math.tanh %279 : vector<8x128xf32>
    %cst_124 = arith.constant 5.000000e-01 : f32
    %281 = vector.broadcast %cst_124 : f32 to vector<8x128xf32>
    %282 = arith.mulf %281, %280 : vector<8x128xf32>
    %cst_125 = arith.constant 5.000000e-01 : f32
    %283 = vector.broadcast %cst_125 : f32 to vector<8x128xf32>
    %284 = arith.addf %282, %283 : vector<8x128xf32>
    %285 = vector.extract_strided_slice %276 {offsets = [0, 128], sizes = [8, 128], strides = [1, 1]} : vector<8x512xf32> to vector<8x128xf32>
    %cst_126 = arith.constant 5.000000e-01 : f32
    %286 = vector.broadcast %cst_126 : f32 to vector<8x128xf32>
    %287 = arith.mulf %286, %285 : vector<8x128xf32>
    %288 = math.tanh %287 : vector<8x128xf32>
    %cst_127 = arith.constant 5.000000e-01 : f32
    %289 = vector.broadcast %cst_127 : f32 to vector<8x128xf32>
    %290 = arith.mulf %289, %288 : vector<8x128xf32>
    %cst_128 = arith.constant 5.000000e-01 : f32
    %291 = vector.broadcast %cst_128 : f32 to vector<8x128xf32>
    %292 = arith.addf %290, %291 : vector<8x128xf32>
    %293 = vector.extract_strided_slice %276 {offsets = [0, 256], sizes = [8, 128], strides = [1, 1]} : vector<8x512xf32> to vector<8x128xf32>
    %294 = math.tanh %293 : vector<8x128xf32>
    %295 = vector.extract_strided_slice %276 {offsets = [0, 384], sizes = [8, 128], strides = [1, 1]} : vector<8x512xf32> to vector<8x128xf32>
    %cst_129 = arith.constant 5.000000e-01 : f32
    %296 = vector.broadcast %cst_129 : f32 to vector<8x128xf32>
    %297 = arith.mulf %296, %295 : vector<8x128xf32>
    %298 = math.tanh %297 : vector<8x128xf32>
    %cst_130 = arith.constant 5.000000e-01 : f32
    %299 = vector.broadcast %cst_130 : f32 to vector<8x128xf32>
    %300 = arith.mulf %299, %298 : vector<8x128xf32>
    %cst_131 = arith.constant 5.000000e-01 : f32
    %301 = vector.broadcast %cst_131 : f32 to vector<8x128xf32>
    %302 = arith.addf %300, %301 : vector<8x128xf32>
    %303 = arith.mulf %292, %268 : vector<8x128xf32>
    %304 = arith.mulf %284, %294 : vector<8x128xf32>
    %305 = arith.addf %303, %304 : vector<8x128xf32>
    %306 = math.tanh %305 : vector<8x128xf32>
    %307 = arith.mulf %302, %306 : vector<8x128xf32>
    %c56_132 = arith.constant 56 : index
    %c0_133 = arith.constant 0 : index
    %308 = vector.load %arg13[%c56_132, %c0_133] : memref<64x128xf32, #tpu.memory_space<vmem>>, vector<8x128xf32>
    tpu.vector_store %arg13[%c56_132, %c0_133], %307 {strides = array<i32>} : memref<64x128xf32, #tpu.memory_space<vmem>>, vector<8x128xf32>,
    %c0_134 = arith.constant 0 : index
    %c0_135 = arith.constant 0 : index
    %309 = vector.load %arg10[%c0_134, %c0_135] : memref<8x128xf32, #tpu.memory_space<vmem>>, vector<8x128xf32>
    tpu.vector_store %arg10[%c0_134, %c0_135], %307 {strides = array<i32>} : memref<8x128xf32, #tpu.memory_space<vmem>>, vector<8x128xf32>,
    %c0_136 = arith.constant 0 : index
    %c0_137 = arith.constant 0 : index
    %310 = vector.load %arg11[%c0_136, %c0_137] : memref<8x128xf32, #tpu.memory_space<vmem>>, vector<8x128xf32>
    tpu.vector_store %arg11[%c0_136, %c0_137], %305 {strides = array<i32>} : memref<8x128xf32, #tpu.memory_space<vmem>>, vector<8x128xf32>,
    %c0_138 = arith.constant 0 : index
    %c0_139 = arith.constant 0 : index
    %311 = vector.load %arg13[%c0_138, %c0_139] : memref<64x128xf32, #tpu.memory_space<vmem>>, vector<64x128xf32>
    %312 = arith.truncf %311 : vector<64x128xf32> to vector<64x128xbf16>
    %c0_140 = arith.constant 0 : index
    %c0_141 = arith.constant 0 : index
    %313 = vector.load %arg6[%c0_140, %c0_141] : memref<128x128xbf16, #tpu.memory_space<vmem>>, vector<128x128xbf16>
    %cst_142 = arith.constant dense<0.000000e+00> : vector<64x128xf32>
    %314 = tpu.matmul %312, %313, %cst_142 {dimension_numbers = #tpu.dot_dimension_numbers<[1], [0], [0], [1], [0, 0, 1, 1], [], []>} : vector<64x128xbf16>, vector<128x128xbf16>, vector<64x128xf32> -> vector<64x128xf32>
    %c0_143 = arith.constant 0 : index
    %c0_144 = arith.constant 0 : index
    %315 = vector.load %arg7[%c0_143, %c0_144] : memref<1x128xf32, #tpu.memory_space<vmem>>, vector<1x128xf32>
    %316 = vector.broadcast %315 : vector<1x128xf32> to vector<64x128xf32>
    %317 = arith.addf %314, %316 : vector<64x128xf32>
    %c0_145 = arith.constant 0 : index
    %c0_146 = arith.constant 0 : index
    %318 = vector.load %arg13[%c0_145, %c0_146] : memref<64x128xf32, #tpu.memory_space<vmem>>, vector<8x128xf32>
    %c0_147 = arith.constant 0 : index
    %c0_148 = arith.constant 0 : index
    %c0_149 = arith.constant 0 : index
    %319 = vector.load %arg8[%c0_147, %c0_148, %c0_149] : memref<8x8x128xf32, #tpu.memory_space<vmem>>, vector<8x1x128xf32>
    %320 = vector.shape_cast %319 : vector<8x1x128xf32> to vector<8x128xf32>
    %321 = vector.shape_cast %318 : vector<8x128xf32> to vector<8x1x128xf32>
    tpu.vector_store %arg8[%c0_147, %c0_148, %c0_149], %321 {strides = array<i32>} : memref<8x8x128xf32, #tpu.memory_space<vmem>>, vector<8x1x128xf32>,
    %322 = vector.extract_strided_slice %317 {offsets = [0, 0], sizes = [8, 128], strides = [1, 1]} : vector<64x128xf32> to vector<8x128xf32>
    %c0_150 = arith.constant 0 : index
    %c0_151 = arith.constant 0 : index
    %c0_152 = arith.constant 0 : index
    %323 = vector.load %arg9[%c0_150, %c0_151, %c0_152] : memref<8x8x128xf32, #tpu.memory_space<vmem>>, vector<8x1x128xf32>
    %324 = vector.shape_cast %323 : vector<8x1x128xf32> to vector<8x128xf32>
    %325 = vector.shape_cast %322 : vector<8x128xf32> to vector<8x1x128xf32>
    tpu.vector_store %arg9[%c0_150, %c0_151, %c0_152], %325 {strides = array<i32>} : memref<8x8x128xf32, #tpu.memory_space<vmem>>, vector<8x1x128xf32>,
    %c8_153 = arith.constant 8 : index
    %c0_154 = arith.constant 0 : index
    %326 = vector.load %arg13[%c8_153, %c0_154] : memref<64x128xf32, #tpu.memory_space<vmem>>, vector<8x128xf32>
    %c0_155 = arith.constant 0 : index
    %c1 = arith.constant 1 : index
    %c0_156 = arith.constant 0 : index
    %327 = vector.load %arg8[%c0_155, %c1, %c0_156] : memref<8x8x128xf32, #tpu.memory_space<vmem>>, vector<8x1x128xf32>
    %328 = vector.shape_cast %327 : vector<8x1x128xf32> to vector<8x128xf32>
    %329 = vector.shape_cast %326 : vector<8x128xf32> to vector<8x1x128xf32>
    tpu.vector_store %arg8[%c0_155, %c1, %c0_156], %329 {strides = array<i32>} : memref<8x8x128xf32, #tpu.memory_space<vmem>>, vector<8x1x128xf32>,
    %330 = vector.extract_strided_slice %317 {offsets = [8, 0], sizes = [8, 128], strides = [1, 1]} : vector<64x128xf32> to vector<8x128xf32>
    %c0_157 = arith.constant 0 : index
    %c1_158 = arith.constant 1 : index
    %c0_159 = arith.constant 0 : index
    %331 = vector.load %arg9[%c0_157, %c1_158, %c0_159] : memref<8x8x128xf32, #tpu.memory_space<vmem>>, vector<8x1x128xf32>
    %332 = vector.shape_cast %331 : vector<8x1x128xf32> to vector<8x128xf32>
    %333 = vector.shape_cast %330 : vector<8x128xf32> to vector<8x1x128xf32>
    tpu.vector_store %arg9[%c0_157, %c1_158, %c0_159], %333 {strides = array<i32>} : memref<8x8x128xf32, #tpu.memory_space<vmem>>, vector<8x1x128xf32>,
    %c16_160 = arith.constant 16 : index
    %c0_161 = arith.constant 0 : index
    %334 = vector.load %arg13[%c16_160, %c0_161] : memref<64x128xf32, #tpu.memory_space<vmem>>, vector<8x128xf32>
    %c0_162 = arith.constant 0 : index
    %c2 = arith.constant 2 : index
    %c0_163 = arith.constant 0 : index
    %335 = vector.load %arg8[%c0_162, %c2, %c0_163] : memref<8x8x128xf32, #tpu.memory_space<vmem>>, vector<8x1x128xf32>
    %336 = vector.shape_cast %335 : vector<8x1x128xf32> to vector<8x128xf32>
    %337 = vector.shape_cast %334 : vector<8x128xf32> to vector<8x1x128xf32>
    tpu.vector_store %arg8[%c0_162, %c2, %c0_163], %337 {strides = array<i32>} : memref<8x8x128xf32, #tpu.memory_space<vmem>>, vector<8x1x128xf32>,
    %338 = vector.extract_strided_slice %317 {offsets = [16, 0], sizes = [8, 128], strides = [1, 1]} : vector<64x128xf32> to vector<8x128xf32>
    %c0_164 = arith.constant 0 : index
    %c2_165 = arith.constant 2 : index
    %c0_166 = arith.constant 0 : index
    %339 = vector.load %arg9[%c0_164, %c2_165, %c0_166] : memref<8x8x128xf32, #tpu.memory_space<vmem>>, vector<8x1x128xf32>
    %340 = vector.shape_cast %339 : vector<8x1x128xf32> to vector<8x128xf32>
    %341 = vector.shape_cast %338 : vector<8x128xf32> to vector<8x1x128xf32>
    tpu.vector_store %arg9[%c0_164, %c2_165, %c0_166], %341 {strides = array<i32>} : memref<8x8x128xf32, #tpu.memory_space<vmem>>, vector<8x1x128xf32>,
    %c24_167 = arith.constant 24 : index
    %c0_168 = arith.constant 0 : index
    %342 = vector.load %arg13[%c24_167, %c0_168] : memref<64x128xf32, #tpu.memory_space<vmem>>, vector<8x128xf32>
    %c0_169 = arith.constant 0 : index
    %c3 = arith.constant 3 : index
    %c0_170 = arith.constant 0 : index
    %343 = vector.load %arg8[%c0_169, %c3, %c0_170] : memref<8x8x128xf32, #tpu.memory_space<vmem>>, vector<8x1x128xf32>
    %344 = vector.shape_cast %343 : vector<8x1x128xf32> to vector<8x128xf32>
    %345 = vector.shape_cast %342 : vector<8x128xf32> to vector<8x1x128xf32>
    tpu.vector_store %arg8[%c0_169, %c3, %c0_170], %345 {strides = array<i32>} : memref<8x8x128xf32, #tpu.memory_space<vmem>>, vector<8x1x128xf32>,
    %346 = vector.extract_strided_slice %317 {offsets = [24, 0], sizes = [8, 128], strides = [1, 1]} : vector<64x128xf32> to vector<8x128xf32>
    %c0_171 = arith.constant 0 : index
    %c3_172 = arith.constant 3 : index
    %c0_173 = arith.constant 0 : index
    %347 = vector.load %arg9[%c0_171, %c3_172, %c0_173] : memref<8x8x128xf32, #tpu.memory_space<vmem>>, vector<8x1x128xf32>
    %348 = vector.shape_cast %347 : vector<8x1x128xf32> to vector<8x128xf32>
    %349 = vector.shape_cast %346 : vector<8x128xf32> to vector<8x1x128xf32>
    tpu.vector_store %arg9[%c0_171, %c3_172, %c0_173], %349 {strides = array<i32>} : memref<8x8x128xf32, #tpu.memory_space<vmem>>, vector<8x1x128xf32>,
    %c32_174 = arith.constant 32 : index
    %c0_175 = arith.constant 0 : index
    %350 = vector.load %arg13[%c32_174, %c0_175] : memref<64x128xf32, #tpu.memory_space<vmem>>, vector<8x128xf32>
    %c0_176 = arith.constant 0 : index
    %c4 = arith.constant 4 : index
    %c0_177 = arith.constant 0 : index
    %351 = vector.load %arg8[%c0_176, %c4, %c0_177] : memref<8x8x128xf32, #tpu.memory_space<vmem>>, vector<8x1x128xf32>
    %352 = vector.shape_cast %351 : vector<8x1x128xf32> to vector<8x128xf32>
    %353 = vector.shape_cast %350 : vector<8x128xf32> to vector<8x1x128xf32>
    tpu.vector_store %arg8[%c0_176, %c4, %c0_177], %353 {strides = array<i32>} : memref<8x8x128xf32, #tpu.memory_space<vmem>>, vector<8x1x128xf32>,
    %354 = vector.extract_strided_slice %317 {offsets = [32, 0], sizes = [8, 128], strides = [1, 1]} : vector<64x128xf32> to vector<8x128xf32>
    %c0_178 = arith.constant 0 : index
    %c4_179 = arith.constant 4 : index
    %c0_180 = arith.constant 0 : index
    %355 = vector.load %arg9[%c0_178, %c4_179, %c0_180] : memref<8x8x128xf32, #tpu.memory_space<vmem>>, vector<8x1x128xf32>
    %356 = vector.shape_cast %355 : vector<8x1x128xf32> to vector<8x128xf32>
    %357 = vector.shape_cast %354 : vector<8x128xf32> to vector<8x1x128xf32>
    tpu.vector_store %arg9[%c0_178, %c4_179, %c0_180], %357 {strides = array<i32>} : memref<8x8x128xf32, #tpu.memory_space<vmem>>, vector<8x1x128xf32>,
    %c40_181 = arith.constant 40 : index
    %c0_182 = arith.constant 0 : index
    %358 = vector.load %arg13[%c40_181, %c0_182] : memref<64x128xf32, #tpu.memory_space<vmem>>, vector<8x128xf32>
    %c0_183 = arith.constant 0 : index
    %c5 = arith.constant 5 : index
    %c0_184 = arith.constant 0 : index
    %359 = vector.load %arg8[%c0_183, %c5, %c0_184] : memref<8x8x128xf32, #tpu.memory_space<vmem>>, vector<8x1x128xf32>
    %360 = vector.shape_cast %359 : vector<8x1x128xf32> to vector<8x128xf32>
    %361 = vector.shape_cast %358 : vector<8x128xf32> to vector<8x1x128xf32>
    tpu.vector_store %arg8[%c0_183, %c5, %c0_184], %361 {strides = array<i32>} : memref<8x8x128xf32, #tpu.memory_space<vmem>>, vector<8x1x128xf32>,
    %362 = vector.extract_strided_slice %317 {offsets = [40, 0], sizes = [8, 128], strides = [1, 1]} : vector<64x128xf32> to vector<8x128xf32>
    %c0_185 = arith.constant 0 : index
    %c5_186 = arith.constant 5 : index
    %c0_187 = arith.constant 0 : index
    %363 = vector.load %arg9[%c0_185, %c5_186, %c0_187] : memref<8x8x128xf32, #tpu.memory_space<vmem>>, vector<8x1x128xf32>
    %364 = vector.shape_cast %363 : vector<8x1x128xf32> to vector<8x128xf32>
    %365 = vector.shape_cast %362 : vector<8x128xf32> to vector<8x1x128xf32>
    tpu.vector_store %arg9[%c0_185, %c5_186, %c0_187], %365 {strides = array<i32>} : memref<8x8x128xf32, #tpu.memory_space<vmem>>, vector<8x1x128xf32>,
    %c48_188 = arith.constant 48 : index
    %c0_189 = arith.constant 0 : index
    %366 = vector.load %arg13[%c48_188, %c0_189] : memref<64x128xf32, #tpu.memory_space<vmem>>, vector<8x128xf32>
    %c0_190 = arith.constant 0 : index
    %c6 = arith.constant 6 : index
    %c0_191 = arith.constant 0 : index
    %367 = vector.load %arg8[%c0_190, %c6, %c0_191] : memref<8x8x128xf32, #tpu.memory_space<vmem>>, vector<8x1x128xf32>
    %368 = vector.shape_cast %367 : vector<8x1x128xf32> to vector<8x128xf32>
    %369 = vector.shape_cast %366 : vector<8x128xf32> to vector<8x1x128xf32>
    tpu.vector_store %arg8[%c0_190, %c6, %c0_191], %369 {strides = array<i32>} : memref<8x8x128xf32, #tpu.memory_space<vmem>>, vector<8x1x128xf32>,
    %370 = vector.extract_strided_slice %317 {offsets = [48, 0], sizes = [8, 128], strides = [1, 1]} : vector<64x128xf32> to vector<8x128xf32>
    %c0_192 = arith.constant 0 : index
    %c6_193 = arith.constant 6 : index
    %c0_194 = arith.constant 0 : index
    %371 = vector.load %arg9[%c0_192, %c6_193, %c0_194] : memref<8x8x128xf32, #tpu.memory_space<vmem>>, vector<8x1x128xf32>
    %372 = vector.shape_cast %371 : vector<8x1x128xf32> to vector<8x128xf32>
    %373 = vector.shape_cast %370 : vector<8x128xf32> to vector<8x1x128xf32>
    tpu.vector_store %arg9[%c0_192, %c6_193, %c0_194], %373 {strides = array<i32>} : memref<8x8x128xf32, #tpu.memory_space<vmem>>, vector<8x1x128xf32>,
    %c56_195 = arith.constant 56 : index
    %c0_196 = arith.constant 0 : index
    %374 = vector.load %arg13[%c56_195, %c0_196] : memref<64x128xf32, #tpu.memory_space<vmem>>, vector<8x128xf32>
    %c0_197 = arith.constant 0 : index
    %c7 = arith.constant 7 : index
    %c0_198 = arith.constant 0 : index
    %375 = vector.load %arg8[%c0_197, %c7, %c0_198] : memref<8x8x128xf32, #tpu.memory_space<vmem>>, vector<8x1x128xf32>
    %376 = vector.shape_cast %375 : vector<8x1x128xf32> to vector<8x128xf32>
    %377 = vector.shape_cast %374 : vector<8x128xf32> to vector<8x1x128xf32>
    tpu.vector_store %arg8[%c0_197, %c7, %c0_198], %377 {strides = array<i32>} : memref<8x8x128xf32, #tpu.memory_space<vmem>>, vector<8x1x128xf32>,
    %378 = vector.extract_strided_slice %317 {offsets = [56, 0], sizes = [8, 128], strides = [1, 1]} : vector<64x128xf32> to vector<8x128xf32>
    %c0_199 = arith.constant 0 : index
    %c7_200 = arith.constant 7 : index
    %c0_201 = arith.constant 0 : index
    %379 = vector.load %arg9[%c0_199, %c7_200, %c0_201] : memref<8x8x128xf32, #tpu.memory_space<vmem>>, vector<8x1x128xf32>
    %380 = vector.shape_cast %379 : vector<8x1x128xf32> to vector<8x128xf32>
    %381 = vector.shape_cast %378 : vector<8x128xf32> to vector<8x1x128xf32>
    tpu.vector_store %arg9[%c0_199, %c7_200, %c0_201], %381 {strides = array<i32>} : memref<8x8x128xf32, #tpu.memory_space<vmem>>, vector<8x1x128xf32>,
    return
  }
  func.func @transform_0(%arg0: i32, %arg1: i32) -> (i32, i32, i32) {
    %c0_i32 = arith.constant 0 : i32
    %c0_i32_0 = arith.constant 0 : i32
    return %arg0, %arg1, %c0_i32 : i32, i32, i32
  }
  func.func @transform_1(%arg0: i32, %arg1: i32) -> (i32, i32) {
    %c0_i32 = arith.constant 0 : i32
    %c0_i32_0 = arith.constant 0 : i32
    %c0_i32_1 = arith.constant 0 : i32
    return %c0_i32, %c0_i32_0 : i32, i32
  }
  func.func @transform_2(%arg0: i32, %arg1: i32) -> (i32, i32) {
    %c0_i32 = arith.constant 0 : i32
    %c0_i32_0 = arith.constant 0 : i32
    %c0_i32_1 = arith.constant 0 : i32
    return %c0_i32, %c0_i32_0 : i32, i32
  }
  func.func @transform_3(%arg0: i32, %arg1: i32) -> (i32, i32) {
    %c0_i32 = arith.constant 0 : i32
    %c0_i32_0 = arith.constant 0 : i32
    %c0_i32_1 = arith.constant 0 : i32
    return %c0_i32, %c0_i32_0 : i32, i32
  }
  func.func @transform_4(%arg0: i32, %arg1: i32) -> (i32, i32) {
    %c0_i32 = arith.constant 0 : i32
    %c0_i32_0 = arith.constant 0 : i32
    %c0_i32_1 = arith.constant 0 : i32
    return %c0_i32, %c0_i32_0 : i32, i32
  }
  func.func @transform_5(%arg0: i32, %arg1: i32) -> (i32, i32) {
    %c0_i32 = arith.constant 0 : i32
    %c0_i32_0 = arith.constant 0 : i32
    %c0_i32_1 = arith.constant 0 : i32
    return %c0_i32, %c0_i32_0 : i32, i32
  }
  func.func @transform_6(%arg0: i32, %arg1: i32) -> (i32, i32, i32) {
    %c0_i32 = arith.constant 0 : i32
    %c0_i32_0 = arith.constant 0 : i32
    return %arg0, %arg1, %c0_i32 : i32, i32, i32
  }
  func.func @transform_7(%arg0: i32, %arg1: i32) -> (i32, i32, i32) {
    %c0_i32 = arith.constant 0 : i32
    %c0_i32_0 = arith.constant 0 : i32
    return %arg0, %arg1, %c0_i32 : i32, i32, i32
  }
}

</mosaic_0001>

<bundles_post_ra>
// kernel: lstm_forward.1
= control target key start
LH: loop header
LB: loop body
LE: loop exit
PB: predicated region body
PF: predicated region fallthrough
CT: control target
= control target key end

     0   :  { %vm94_vm0 = vcmask 130048   ;;  %s6717_s1 = inlined_call_operand.vmem [shape: bf16[16,512], index: 1, kind: input, shape index: {}]   ;;  %s6718_s0 = inlined_call_operand.vmem [shape: bf16[1,64,16], index: 0, kind: input, shape index: {}]   ;;  %s6719_s2 = inlined_call_operand.vmem [shape: bf16[128,512], index: 2, kind: input, shape index: {}]   ;;  %s6720_s3 = inlined_call_operand.vmem [shape: f32[1,512], index: 3, kind: input, shape index: {}]   ;;  %s6721_s6 = inlined_call_operand.vmem [shape: f32[8,8,128], index: 6, kind: output, shape index: {0}]   ;;  %s6722_s4 = inlined_call_operand.vmem [shape: bf16[128,128], index: 4, kind: input, shape index: {}]   ;;  %s6723_s5 = inlined_call_operand.vmem [shape: f32[1,128], index: 5, kind: input, shape index: {}]   ;;  %s6724_s7 = inlined_call_operand.vmem [shape: f32[8,8,128], index: 7, kind: output, shape index: {1}]  }
   0x1   :  { %v2946_v0 = vld [vmem:[%s6717_s1] sm:$0xf]  ;;  %v4038_v1 = vld [vmem:[%s6717_s1 + $0xc] sm:$0xf0]  ;;  %v2954_v2 = vld [vmem:[%s6717_s1 + $0x8] sm:$0xf] }
   0x2   :  { %v2947_v3 = vor.u32 %v4038_v1, %v2946_v0  ;;  %v4039_v4 = vld [vmem:[%s6717_s1 + $0x14] sm:$0xf0]  ;;  %v4444_v5 = vld [vmem:[%s6718_s0 + $0x10] sm:$0xff]  ;;  %v4036_v8 = vld [vmem:[%s6717_s1 + $0x4] sm:$0xf] }
   0x3   :  { %v4449_v6 = vld [vmem:[%s6718_s0 + $0x18] sm:$0xff]  ;;  %v2955_v7 = vor.u32 %v4039_v4, %v2954_v2  ;;  %v2948_v9 = vld [vmem:[%s6717_s1 + $0x10] sm:$0xf0]  ;;  %v4460_v10 = vld [vmem:[%s6718_s0] sm:$0xff] }
   0x4   :  { %4304 = vmatpush.bf16.msra.mxu1 %v2947_v3  ;;  %4305 = vmatpush.bf16.msra.mxu3 %v2947_v3  ;;  %v2951_v11 = vor.u32 %v4036_v8, %v2948_v9  ;;  %v3090_v12 = vld [vmem:[%s6719_s2 + $0xe0] sm:$0xf]  ;;  %v4070_v13 = vld [vmem:[%s6719_s2 + $0xec] sm:$0xf0]  ;;  %v4037_v14 = vld [vmem:[%s6717_s1 + $0xc] sm:$0xf] }
   0x5   :  { %172 = vmatpush.bf16.msra.mxu2 %v2955_v7  ;;  %v3091_v15 = vor.u32 %v4070_v13, %v3090_v12  ;;  %v2956_v16 = vld [vmem:[%s6717_s1 + $0x18] sm:$0xf0]  ;;  %114 = vmatpush.bf16.msra.mxu0 %v2947_v3  ;;  %v3074_v18 = vld [vmem:[%s6719_s2 + $0xc0] sm:$0xf]  ;;  %v4066_v19 = vld [vmem:[%s6719_s2 + $0xcc] sm:$0xf0] }
   0x6   :  { %v2959_v17 = vor.u32 %v4037_v14, %v2956_v16  ;;  %v4068_v20 = vld [vmem:[%s6719_s2 + $0xe4] sm:$0xf]  ;;  %v3092_v21 = vld [vmem:[%s6719_s2 + $0xf0] sm:$0xf0]  ;;  %v4069_v22 = vld [vmem:[%s6719_s2 + $0xec] sm:$0xf]  ;;  %v3075_v25 = vor.u32 %v4066_v19, %v3074_v18 }
   0x7   :  { %2962 = vmatmul.msk.bf16.vlgmr.msra.gmra.mxu1 %vm94_vm0, %v4444_v5  ;;  %2963 = vmatmul.msk.bf16.vlgmr.msra.gmra.mxu3 %vm94_vm0, %v4449_v6  ;;  %v3095_v23 = vor.u32 %v4068_v20, %v3092_v21  ;;  %v3100_v24 = vld [vmem:[%s6719_s2 + $0xf8] sm:$0xf0]  ;;  %v4064_v27 = vld [vmem:[%s6719_s2 + $0xc4] sm:$0xf]  ;;  %v3076_v28 = vld [vmem:[%s6719_s2 + $0xd0] sm:$0xf0] }
   0x8   :  { %143 = vmatpush.bf16.msrb.mxu1 %v2951_v11  ;;  %2968 = vmatmul.msk.bf16.vlgmr.msra.gmra.mxu2 %vm94_vm0, %v4460_v10  ;;  %v3103_v26 = vor.u32 %v4069_v22, %v3100_v24  ;;  %v4065_v29 = vld [vmem:[%s6719_s2 + $0xcc] sm:$0xf]  ;;  %v3058_v30 = vld [vmem:[%s6719_s2 + $0xa0] sm:$0xf]  ;;  %v4062_v31 = vld [vmem:[%s6719_s2 + $0xac] sm:$0xf0]  ;;  %v3079_v32 = vor.u32 %v4064_v27, %v3076_v28 }
   0x9   :  { %201 = vmatpush.bf16.msrb.mxu3 %v2959_v17  ;;  %454 = vmatpush.bf16.msrb.mxu2 %v3091_v15  ;;  %v3084_v33 = vld [vmem:[%s6719_s2 + $0xd8] sm:$0xf0]  ;;  %v4060_v35 = vld [vmem:[%s6719_s2 + $0xa4] sm:$0xf]  ;;  %v3060_v36 = vld [vmem:[%s6719_s2 + $0xb0] sm:$0xf0]  ;;  %v3059_v39 = vor.u32 %v4062_v31, %v3058_v30 }
   0xa   :  { %2960 = vmatmul.msk.bf16.vlgmr.msra.gmra.mxu0 %vm94_vm0, %v4460_v10  ;;  %v3087_v34 = vor.u32 %v4065_v29, %v3084_v33  ;;  %v4061_v37 = vld [vmem:[%s6719_s2 + $0xac] sm:$0xf]  ;;  %v3068_v38 = vld [vmem:[%s6719_s2 + $0xb8] sm:$0xf0]  ;;  %v3042_v40 = vld [vmem:[%s6719_s2 + $0x80] sm:$0xf]  ;;  %v3063_v42 = vor.u32 %v4060_v35, %v3060_v36 }
   0xb   :  { %v4058_v41 = vld [vmem:[%s6719_s2 + $0x8c] sm:$0xf0]  ;;  %v3071_v43 = vor.u32 %v4061_v37, %v3068_v38  ;;  %v4056_v44 = vld [vmem:[%s6719_s2 + $0x84] sm:$0xf]  ;;  %v3044_v45 = vld [vmem:[%s6719_s2 + $0x90] sm:$0xf0] }
   0xc   :  { %467 = vmatpush.bf16.msra.mxu1 %v3095_v23  ;;  %v3043_v46 = vor.u32 %v4058_v41, %v3042_v40  ;;  %v4057_v47 = vld [vmem:[%s6719_s2 + $0x8c] sm:$0xf]  ;;  %v3052_v48 = vld [vmem:[%s6719_s2 + $0x98] sm:$0xf0]  ;;  %v3026_v49 = vld [vmem:[%s6719_s2 + $0x60] sm:$0xf]  ;;  %v3047_v51 = vor.u32 %v4056_v44, %v3044_v45 }
   0xd   :  { %493 = vmatpush.bf16.msra.mxu3 %v3103_v26  ;;  %455 = vmatpush.bf16.msrb.mxu2 %v3075_v25  ;;  %v4054_v50 = vld [vmem:[%s6719_s2 + $0x6c] sm:$0xf0]  ;;  %v4033_v52 = vld [vmem:[%s6718_s0 + $0x8] sm:$0xff]  ;;  %v3055_v53 = vor.u32 %v4057_v47, %v3052_v48  ;;  %v3010_v55 = vld [vmem:[%s6719_s2 + $0x40] sm:$0xf] }
   0xe   :  { %v3027_v54 = vor.u32 %v4054_v50, %v3026_v49  ;;  %v4050_v56 = vld [vmem:[%s6719_s2 + $0x4c] sm:$0xf0]  ;;  %v4052_v57 = vld [vmem:[%s6719_s2 + $0x64] sm:$0xf]  ;;  %v3028_v58 = vld [vmem:[%s6719_s2 + $0x70] sm:$0xf0] }
   0xf   :  { %v3011_v59 = vor.u32 %v4050_v56, %v3010_v55  ;;  %v2994_v60 = vld [vmem:[%s6719_s2 + $0x20] sm:$0xf]  ;;  %v3031_v61 = vor.u32 %v4052_v57, %v3028_v58  ;;  %v4053_v62 = vld [vmem:[%s6719_s2 + $0x6c] sm:$0xf]  ;;  %v3036_v63 = vld [vmem:[%s6719_s2 + $0x78] sm:$0xf0] }
  0x10   :  { %468 = vmatpush.bf16.msra.mxu1 %v3079_v32  ;;  %v4046_v0 = vld [vmem:[%s6719_s2 + $0x2c] sm:$0xf0]  ;;  %v3039_v1 = vor.u32 %v4053_v62, %v3036_v63  ;;  %v4048_v2 = vld [vmem:[%s6719_s2 + $0x44] sm:$0xf]  ;;  %v3012_v3 = vld [vmem:[%s6719_s2 + $0x50] sm:$0xf0] }
  0x11   :  { %494 = vmatpush.bf16.msra.mxu3 %v3087_v34  ;;  %456 = vmatpush.bf16.msrb.mxu2 %v3059_v39  ;;  %v3015_v4 = vor.u32 %v4048_v2, %v3012_v3  ;;  %v4049_v7 = vld [vmem:[%s6719_s2 + $0x4c] sm:$0xf]  ;;  %v3020_v8 = vld [vmem:[%s6719_s2 + $0x58] sm:$0xf0]  ;;  %v2995_v9 = vor.u32 %v4046_v0, %v2994_v60  ;;  %v2978_v11 = vld [vmem:[%s6719_s2] sm:$0xf] }
  0x12   :  { %v4042_v12 = vld [vmem:[%s6719_s2 + $0xc] sm:$0xf0]  ;;  %v3098_v13 = vld [vmem:[%s6719_s2 + $0xe8] sm:$0xf]  ;;  %v4071_v14 = vld [vmem:[%s6719_s2 + $0xf4] sm:$0xf0] }
  0x13   :  { %v2979_v15 = vor.u32 %v4042_v12, %v2978_v11  ;;  %v3099_v16 = vor.u32 %v4071_v14, %v3098_v13  ;;  %v3082_v17 = vld [vmem:[%s6719_s2 + $0xc8] sm:$0xf]  ;;  %v4067_v18 = vld [vmem:[%s6719_s2 + $0xd4] sm:$0xf0]  ;;  %v4044_v22 = vld [vmem:[%s6719_s2 + $0x24] sm:$0xf] }
  0x14   :  { %469 = vmatpush.bf16.msra.mxu1 %v3063_v42  ;;  %v3083_v19 = vor.u32 %v4067_v18, %v3082_v17  ;;  %v3066_v20 = vld [vmem:[%s6719_s2 + $0xa8] sm:$0xf]  ;;  %v4063_v21 = vld [vmem:[%s6719_s2 + $0xb4] sm:$0xf0]  ;;  %v2996_v23 = vld [vmem:[%s6719_s2 + $0x30] sm:$0xf0] }
  0x15   :  { %495 = vmatpush.bf16.msra.mxu3 %v3071_v43  ;;  %457 = vmatpush.bf16.msrb.mxu2 %v3043_v46  ;;  %v2999_v24 = vor.u32 %v4044_v22, %v2996_v23  ;;  %v4045_v25 = vld [vmem:[%s6719_s2 + $0x2c] sm:$0xf]  ;;  %v3004_v26 = vld [vmem:[%s6719_s2 + $0x38] sm:$0xf0]  ;;  %v3067_v27 = vor.u32 %v4063_v21, %v3066_v20  ;;  %v4040_v29 = vld [vmem:[%s6719_s2 + $0x4] sm:$0xf] }
  0x16   :  { %v3007_v28 = vor.u32 %v4045_v25, %v3004_v26  ;;  %v2980_v30 = vld [vmem:[%s6719_s2 + $0x10] sm:$0xf0]  ;;  %v3050_v31 = vld [vmem:[%s6719_s2 + $0x88] sm:$0xf]  ;;  %v4059_v32 = vld [vmem:[%s6719_s2 + $0x94] sm:$0xf0] }
  0x17   :  { %2964 = vmatmul.msk.bf16.vlgmr.msrb.gmra.mxu1 %vm94_vm0, %v4460_v10  ;;  %2972 = vmatmul.msk.bf16.vlgmr.msrb.gmra.mxu3 %vm94_vm0, %v4460_v10  ;;  %v3023_v10 = vor.u32 %v4049_v7, %v3020_v8  ;;  %v2983_v33 = vor.u32 %v4040_v29, %v2980_v30  ;;  %v4041_v34 = vld [vmem:[%s6719_s2 + $0xc] sm:$0xf]  ;;  %v2988_v35 = vld [vmem:[%s6719_s2 + $0x18] sm:$0xf0]  ;;  %v3051_v37 = vor.u32 %v4059_v32, %v3050_v31  ;;  %v3034_v38 = vld [vmem:[%s6719_s2 + $0x68] sm:$0xf] }
  0x18   :  { %470 = vmatpush.bf16.msra.mxu1 %v3047_v51  ;;  %2969 = vmatmul.msk.bf16.gmra.mxu2 %vm94_vm0, %v4033_v52  ;;  %v2991_v36 = vor.u32 %v4041_v34, %v2988_v35  ;;  %v4055_v39 = vld [vmem:[%s6719_s2 + $0x74] sm:$0xf0]  ;;  %v3018_v41 = vld [vmem:[%s6719_s2 + $0x48] sm:$0xf]  ;;  %v4388_v49 = vmov 0.0|0.0  }
  0x19   :  { %496 = vmatpush.bf16.msra.mxu3 %v3055_v53  ;;  %458 = vmatpush.bf16.msrb.mxu2 %v3027_v54  ;;  %v3035_v40 = vor.u32 %v4055_v39, %v3034_v38  ;;  %v4051_v42 = vld [vmem:[%s6719_s2 + $0x54] sm:$0xf0]  ;;  %v3002_v44 = vld [vmem:[%s6719_s2 + $0x28] sm:$0xf]  ;;  %v4102_v17 = vld [vmem:[%s6719_s2 + $0xec] sm:$0xf0] }
  0x1a   :  { %2961 = vmatmul.msk.bf16.gmra.mxu0 %vm94_vm0, %v4033_v52  ;;  %v3019_v43 = vor.u32 %v4051_v42, %v3018_v41  ;;  %v4047_v45 = vld [vmem:[%s6719_s2 + $0x34] sm:$0xf0]  ;;  %v2986_v47 = vld [vmem:[%s6719_s2 + $0x8] sm:$0xf]  ;;  %v4100_v18 = vld [vmem:[%s6719_s2 + $0xe4] sm:$0xf] }
  0x1b   :  { %v3003_v46 = vor.u32 %v4047_v45, %v3002_v44  ;;  %v3220_v22 = vld [vmem:[%s6719_s2 + $0xf0] sm:$0xf0]  ;;  %v3226_v23 = vld [vmem:[%s6719_s2 + $0xe8] sm:$0xf]  ;;  %v4101_v29 = vld [vmem:[%s6719_s2 + $0xec] sm:$0xf] }
  0x1c   :  { %471 = vmatpush.bf16.msra.mxu1 %v3031_v61  ;;  %v3228_v30 = vld [vmem:[%s6719_s2 + $0xf8] sm:$0xf0]  ;;  %v4098_v34 = vld [vmem:[%s6719_s2 + $0xcc] sm:$0xf0]  ;;  %v4096_v35 = vld [vmem:[%s6719_s2 + $0xc4] sm:$0xf] }
  0x1d   :  { %497 = vmatpush.bf16.msra.mxu3 %v3039_v1  ;;  %459 = vmatpush.bf16.msrb.mxu2 %v3011_v59  ;;  %v3231_v32 = vor.u32 %v4101_v29, %v3228_v30  ;;  %v3210_v38 = vld [vmem:[%s6719_s2 + $0xc8] sm:$0xf]  ;;  %v4099_v39 = vld [vmem:[%s6719_s2 + $0xd4] sm:$0xf0]  ;;  %v4097_v42 = vld [vmem:[%s6719_s2 + $0xcc] sm:$0xf] }
  0x1e   :  { %v3211_v41 = vor.u32 %v4099_v39, %v3210_v38  ;;  %v3180_v38 = vld [vmem:[%s6719_s2 + $0x98] sm:$0xf0] }
  0x20   :  { %472 = vmatpush.bf16.msra.mxu1 %v3015_v4 }
  0x21   :  { %498 = vmatpush.bf16.msra.mxu3 %v3023_v10  ;;  %460 = vmatpush.bf16.msrb.mxu2 %v2995_v9 }
  0x24   :  { %473 = vmatpush.bf16.msra.mxu1 %v2999_v24  ;;  %v4103_v24 = vld [vmem:[%s6719_s2 + $0xf4] sm:$0xf0] }
  0x25   :  { %461 = vmatpush.bf16.msrb.mxu2 %v2979_v15  ;;  %499 = vmatpush.bf16.msra.mxu3 %v3007_v28  ;;  %v3227_v28 = vor.u32 %v4103_v24, %v3226_v23 }
  0x27   :  { %2965 = vmatmul.msk.bf16.gmra.mxu1 %vm94_vm0, %v4033_v52  ;;  %2973 = vmatmul.msk.bf16.gmra.mxu3 %vm94_vm0, %v4033_v52 }
  0x28   :  { %2970 = vmatmul.msk.bf16.gmra.mxu2 %vm94_vm0, %v4444_v5  ;;  %474 = vmatpush.bf16.msra.mxu1 %v2983_v33  ;;  %v3202_v33 = vld [vmem:[%s6719_s2 + $0xc0] sm:$0xf] }
  0x29   :  { %480 = vmatpush.bf16.msra.mxu2 %v3099_v16  ;;  %500 = vmatpush.bf16.msra.mxu3 %v2991_v36  ;;  %v3218_v16 = vld [vmem:[%s6719_s2 + $0xe0] sm:$0xf]  ;;  %v3203_v36 = vor.u32 %v4098_v34, %v3202_v33  ;;  %v3178_v33 = vld [vmem:[%s6719_s2 + $0x88] sm:$0xf]  ;;  %v4091_v34 = vld [vmem:[%s6719_s2 + $0x94] sm:$0xf0] }
  0x2a   :  { %v3219_v21 = vor.u32 %v4102_v17, %v3218_v16  ;;  %v4093_v17 = vld [vmem:[%s6719_s2 + $0xac] sm:$0xf] }
  0x2c   :  { %726 = vmatpush.bf16.msrb.mxu0 %v3219_v21 }
  0x2d   :  { %481 = vmatpush.bf16.msra.mxu2 %v3083_v19  ;;  %765 = vmatpush.bf16.msrb.mxu3 %v3231_v32  ;;  %v3172_v32 = vld [vmem:[%s6719_s2 + $0x90] sm:$0xf0] }
  0x30   :  { %727 = vmatpush.bf16.msrb.mxu0 %v3203_v36  ;;  %v3179_v36 = vor.u32 %v4091_v34, %v3178_v33  ;;  %v4081_v34 = vld [vmem:[%s6719_s2 + $0x4c] sm:$0xf] }
  0x31   :  { %482 = vmatpush.bf16.msra.mxu2 %v3067_v27  ;;  %v3223_v27 = vor.u32 %v4100_v18, %v3220_v22  ;;  %v3196_v18 = vld [vmem:[%s6719_s2 + $0xb8] sm:$0xf0] }
  0x32   :  { %v3199_v22 = vor.u32 %v4093_v17, %v3196_v18  ;;  %v3138_v17 = vld [vmem:[%s6719_s2 + $0x40] sm:$0xf]  ;;  %v4082_v18 = vld [vmem:[%s6719_s2 + $0x4c] sm:$0xf0] }
  0x33   :  { %739 = vmatpush.bf16.msrb.mxu1 %v3223_v27  ;;  %v4090_v27 = vld [vmem:[%s6719_s2 + $0x8c] sm:$0xf0] }
  0x35   :  { %483 = vmatpush.bf16.msra.mxu2 %v3051_v37  ;;  %v3204_v37 = vld [vmem:[%s6719_s2 + $0xd0] sm:$0xf0] }
  0x37   :  { %2966 = vmatmul.msk.bf16.gmra.mxu1 %vm94_vm0, %v4444_v5  ;;  %2974 = vmatmul.msk.bf16.gmra.mxu3 %vm94_vm0, %v4444_v5  ;;  %v4043_v5 = vld [vmem:[%s6719_s2 + $0x14] sm:$0xf0] }
  0x38   :  { %2971 = vmatmul.msk.bf16.gmra.mxu2 %vm94_vm0, %v4449_v6  ;;  %v2987_v48 = vor.u32 %v4043_v5, %v2986_v47 }
  0x39   :  { %484 = vmatpush.bf16.msra.mxu2 %v3035_v40  ;;  %v3207_v40 = vor.u32 %v4096_v35, %v3204_v37  ;;  %v4089_v37 = vld [vmem:[%s6719_s2 + $0x8c] sm:$0xf] }
  0x3b   :  { %740 = vmatpush.bf16.msrb.mxu1 %v3207_v40 }
  0x3d   :  { %485 = vmatpush.bf16.msra.mxu2 %v3019_v43  ;;  %v3212_v43 = vld [vmem:[%s6719_s2 + $0xd8] sm:$0xf0] }
  0x3e   :  { %v3215_v44 = vor.u32 %v4097_v42, %v3212_v43  ;;  %v3154_v42 = vld [vmem:[%s6719_s2 + $0x60] sm:$0xf]  ;;  %v4086_v43 = vld [vmem:[%s6719_s2 + $0x6c] sm:$0xf0] }
  0x40   :  { %766 = vmatpush.bf16.msrb.mxu3 %v3215_v44  ;;  %v4084_v44 = vld [vmem:[%s6719_s2 + $0x64] sm:$0xf] }
  0x41   :  { %486 = vmatpush.bf16.msra.mxu2 %v3003_v46 }
  0x44   :  { %767 = vmatpush.bf16.msrb.mxu3 %v3199_v22 }
  0x45   :  { %487 = vmatpush.bf16.msra.mxu2 %v2987_v48 }
  0x47   :  { %2967 = vmatmul.msk.bf16.gmra.mxu1 %vm94_vm0, %v4449_v6  ;;  %2975 = vmatmul.msk.bf16.gmra.mxu3 %vm94_vm0, %v4449_v6  ;;  %v4708_v6 = vld [vmem:[%s6720_s3] sm:$0xf] }
  0x48   :  { %462 = vmatmul.bf16.vlgmr.msrb.gmra.mxu2 %v4388_v49  ;;  %v4711_v57 = vperm.slane %v4708_v6, 2  ;;  %v4716_v59 = vperm.slane %v4708_v6, 1  ;;  %v4725_v0 = vperm.slane %v4708_v6, 3  ;;  %v4869_v39 = vperm.slane %v4708_v6, 0 }
  0x49   :  { %752 = vmatpush.bf16.msrb.mxu2 %v3227_v28  ;;  %v4088_v28 = vld [vmem:[%s6719_s2 + $0x84] sm:$0xf]  ;;  %v3155_v6 = vor.u32 %v4086_v43, %v3154_v42  ;;  %v3124_v42 = vld [vmem:[%s6719_s2 + $0x30] sm:$0xf0]  ;;  %v3130_v43 = vld [vmem:[%s6719_s2 + $0x28] sm:$0xf] }
  0x4a   :  { %v3175_v35 = vor.u32 %v4088_v28, %v3172_v32  ;;  %v4083_v28 = vld [vmem:[%s6719_s2 + $0x54] sm:$0xf0] }
  0x4d   :  { %753 = vmatpush.bf16.msrb.mxu2 %v3211_v41  ;;  %v3183_v41 = vor.u32 %v4089_v37, %v3180_v38  ;;  %v3122_v37 = vld [vmem:[%s6719_s2 + $0x20] sm:$0xf]  ;;  %v4078_v38 = vld [vmem:[%s6719_s2 + $0x2c] sm:$0xf0] }
  0x4f   :  { %768 = vmatpush.bf16.msrb.mxu3 %v3183_v41  ;;  %v3123_v41 = vor.u32 %v4078_v38, %v3122_v37 }
  0x57   :  { %475 = vmatmul.bf16.vlgmr.msra.gmra.mxu1 %v4388_v49  ;;  %501 = vmatmul.bf16.vlgmr.msra.gmra.mxu3 %v4388_v49 }
  0x58   :  { %488 = vmatmul.bf16.vlgmr.msra.gmra.mxu2 %v4388_v49 }
  0x84   :  { %v4691_v50 = vpop.f32.mrf.mxu1 }
  0x87   :  { %v116_v40 = vpop.f32.mrf.mxu0 }
  0x8a   :  { %v4693_v51 = vpop.f32.mrf.mxu3 }
  0x8b   :  { %v4695_v52 = vpop.f32.mrf.mxu2 }
  0x8c   :  { %v4697_v53 = vpop.f32.mrf.mxu1 }
  0x92   :  { %v4699_v54 = vpop.f32.mrf.mxu3 }
  0x93   :  { %v4701_v55 = vpop.f32.mrf.mxu2 }
  0x94   :  { %v4703_v56 = vpop.f32.mrf.mxu1 }
  0x9a   :  { %v4713_v58 = vpop.f32.mrf.mxu3 }
  0x9b   :  { %v179_v60 = vpop.f32.mrf.mxu2 }
  0x9c   :  { %v4719_v61 = vadd.f32 %v179_v60, %v4711_v57  ;;  %v147_v62 = vpop.f32.mrf.mxu1  ;;  %v3186_v60 = vld [vmem:[%s6719_s2 + $0xa0] sm:$0xf] }
  0x9d   :  { %v4722_v63 = vadd.f32 %v147_v62, %v4716_v59  ;;  %v4094_v62 = vld [vmem:[%s6719_s2 + $0xac] sm:$0xf0] }
  0xa2   :  { %v205_v1 = vpop.f32.mrf.mxu3 }
  0xa3   :  { %v181_v2 = vpop.f32.mrf.mxu2  ;;  %v4728_v3 = vadd.f32 %v205_v1, %v4725_v0  ;;  %v4092_v1 = vld [vmem:[%s6719_s2 + $0xa4] sm:$0xf] }
  0xa4   :  { %v4731_v4 = vadd.f32 %v181_v2, %v4711_v57  ;;  %v150_v7 = vpop.f32.mrf.mxu1  ;;  %v3187_v2 = vor.u32 %v4094_v62, %v3186_v60  ;;  %v117_v60 = vadd.f32 %v116_v40, %v4869_v39  ;;  %v4076_v40 = vld [vmem:[%s6719_s2 + $0x24] sm:$0xf] }
  0xa5   :  { %v4734_v8 = vadd.f32 %v150_v7, %v4716_v59  ;;  %v3188_v7 = vld [vmem:[%s6719_s2 + $0xb0] sm:$0xf0] }
  0xa6   :  { %728 = vmatpush.bf16.msrb.mxu0 %v3187_v2 }
  0xaa   :  { %v208_v9 = vpop.f32.mrf.mxu3 }
  0xab   :  { %v184_v10 = vpop.f32.mrf.mxu2  ;;  %v4737_v11 = vadd.f32 %v208_v9, %v4725_v0  ;;  %v3194_v9 = vld [vmem:[%s6719_s2 + $0xa8] sm:$0xf] }
  0xac   :  { %v4740_v12 = vadd.f32 %v184_v10, %v4711_v57  ;;  %v152_v13 = vpop.f32.mrf.mxu1  ;;  %v4095_v10 = vld [vmem:[%s6719_s2 + $0xb4] sm:$0xf0] }
  0xad   :  { %v4743_v14 = vadd.f32 %v152_v13, %v4716_v59  ;;  %v3195_v16 = vor.u32 %v4095_v10, %v3194_v9  ;;  %v3164_v9 = vld [vmem:[%s6719_s2 + $0x78] sm:$0xf0] }
  0xaf   :  { %754 = vmatpush.bf16.msrb.mxu2 %v3195_v16 }
  0xb2   :  { %v210_v15 = vpop.f32.mrf.mxu3 }
  0xb3   :  { %v186_v19 = vpop.f32.mrf.mxu2  ;;  %v4755_v20 = vadd.f32 %v210_v15, %v4725_v0  ;;  %v3191_v15 = vor.u32 %v4092_v1, %v3188_v7  ;;  %755 = vmatpush.bf16.msrb.mxu2 %v3179_v36  ;;  %v4085_v7 = vld [vmem:[%s6719_s2 + $0x6c] sm:$0xf] }
  0xb4   :  { %v4767_v25 = vadd.f32 %v186_v19, %v4711_v57  ;;  %v155_v26 = vpop.f32.mrf.mxu1 }
  0xb5   :  { %v4776_v31 = vadd.f32 %v155_v26, %v4716_v59  ;;  %741 = vmatpush.bf16.msrb.mxu1 %v3191_v15  ;;  %v3170_v26 = vld [vmem:[%s6719_s2 + $0x80] sm:$0xf]  ;;  %v3167_v15 = vor.u32 %v4085_v7, %v3164_v9 }
  0xb6   :  { %v3171_v30 = vor.u32 %v4090_v27, %v3170_v26  ;;  %v3140_v26 = vld [vmem:[%s6719_s2 + $0x50] sm:$0xf0]  ;;  %v3146_v27 = vld [vmem:[%s6719_s2 + $0x48] sm:$0xf] }
  0xb7   :  { %769 = vmatpush.bf16.msrb.mxu3 %v3167_v15  ;;  %v3147_v33 = vor.u32 %v4083_v28, %v3146_v27  ;;  %v3106_v15 = vld [vmem:[%s6719_s2] sm:$0xf]  ;;  %v4073_v28 = vld [vmem:[%s6719_s2 + $0xc] sm:$0xf] }
  0xb8   :  { %729 = vmatpush.bf16.msrb.mxu0 %v3171_v30 }
  0xb9   :  { %742 = vmatpush.bf16.msrb.mxu1 %v3175_v35  ;;  %v3148_v35 = vld [vmem:[%s6719_s2 + $0x58] sm:$0xf0] }
  0xba   :  { %v213_v45 = vpop.f32.mrf.mxu3  ;;  %v3151_v36 = vor.u32 %v4081_v34, %v3148_v35  ;;  %v204_v34 = vadd.f32 %v4713_v58, %v4725_v0  ;;  %v175_v35 = vadd.f32 %v4695_v52, %v4711_v57 }
  0xbb   :  { %v189_v46 = vpop.f32.mrf.mxu2  ;;  %v4803_v47 = vadd.f32 %v213_v45, %v4725_v0  ;;  %v3156_v45 = vld [vmem:[%s6719_s2 + $0x70] sm:$0xf0] }
  0xbc   :  { %v4806_v5 = vadd.f32 %v189_v46, %v4711_v57  ;;  %v157_v48 = vpop.f32.mrf.mxu1  ;;  %v3162_v46 = vld [vmem:[%s6719_s2 + $0x68] sm:$0xf]  ;;  %v3159_v1 = vor.u32 %v4084_v44, %v3156_v45  ;;  %730 = vmatpush.bf16.msrb.mxu0 %v3155_v6  ;;  %770 = vmatpush.bf16.msrb.mxu3 %v3151_v36  ;;  %v4079_v44 = vld [vmem:[%s6719_s2 + $0x34] sm:$0xf0] }
  0xbd   :  { %v4809_v49 = vadd.f32 %v157_v48, %v4716_v59  ;;  %v4087_v48 = vld [vmem:[%s6719_s2 + $0x74] sm:$0xf0] }
  0xbe   :  { %v3163_v2 = vor.u32 %v4087_v48, %v3162_v46  ;;  %743 = vmatpush.bf16.msrb.mxu1 %v3159_v1  ;;  %v3127_v46 = vor.u32 %v4076_v40, %v3124_v42  ;;  %v3131_v48 = vor.u32 %v4079_v44, %v3130_v43  ;;  %v146_v1 = vadd.f32 %v4703_v56, %v4716_v59  ;;  %v4072_v56 = vld [vmem:[%s6719_s2 + $0x4] sm:$0xf] }
  0xc0   :  { %756 = vmatpush.bf16.msrb.mxu2 %v3163_v2 }
  0xc2   :  { %v215_v13 = vpop.f32.mrf.mxu3 }
  0xc3   :  { %v191_v19 = vpop.f32.mrf.mxu2  ;;  %v4836_v21 = vadd.f32 %v215_v13, %v4725_v0 }
  0xc4   :  { %v4839_v23 = vadd.f32 %v191_v19, %v4711_v57  ;;  %v160_v24 = vpop.f32.mrf.mxu1  ;;  %v4080_v19 = vld [vmem:[%s6719_s2 + $0x44] sm:$0xf]  ;;  %757 = vmatpush.bf16.msrb.mxu2 %v3147_v33 }
  0xc5   :  { %v4851_v29 = vadd.f32 %v160_v24, %v4716_v59  ;;  %v3139_v24 = vor.u32 %v4082_v18, %v3138_v17  ;;  %v3143_v32 = vor.u32 %v4080_v19, %v3140_v26  ;;  %v3108_v18 = vld [vmem:[%s6719_s2 + $0x10] sm:$0xf0]  ;;  %v3114_v19 = vld [vmem:[%s6719_s2 + $0x8] sm:$0xf] }
  0xc6   :  { %v3111_v26 = vor.u32 %v4072_v56, %v3108_v18 }
  0xc7   :  { %731 = vmatpush.bf16.msrb.mxu0 %v3139_v24  ;;  %744 = vmatpush.bf16.msrb.mxu1 %v3143_v32  ;;  %v4075_v24 = vld [vmem:[%s6719_s2 + $0x14] sm:$0xf0] }
  0xc8   :  { %758 = vmatpush.bf16.msrb.mxu2 %v3131_v48  ;;  %v3115_v27 = vor.u32 %v4075_v24, %v3114_v19 }
  0xca   :  { %v218_v62 = vpop.f32.mrf.mxu3 }
  0xcb   :  { %v4897_v10 = vadd.f32 %v218_v62, %v4725_v0  ;;  %v463_v13 = vpop.f32.mrf.mxu2  ;;  %v3132_v62 = vld [vmem:[%s6719_s2 + $0x38] sm:$0xf0]  ;;  %732 = vmatpush.bf16.msrb.mxu0 %v3123_v41  ;;  %745 = vmatpush.bf16.msrb.mxu1 %v3127_v46 }
  0xcc   :  { %v162_v16 = vpop.f32.mrf.mxu1  ;;  %v506_v30 = vadd.f32 %v463_v13, %v117_v60  ;;  %v4077_v60 = vld [vmem:[%s6719_s2 + $0x2c] sm:$0xf]  ;;  %759 = vmatpush.bf16.msrb.mxu2 %v3115_v27 }
  0xcd   :  { %v4909_v22 = vadd.f32 %v162_v16, %v4716_v59  ;;  %v3135_v9 = vor.u32 %v4077_v60, %v3132_v62  ;;  %v4074_v16 = vld [vmem:[%s6719_s2 + $0xc] sm:$0xf0] }
  0xce   :  { %v510_v6 = vmul.f32 0.5, %v506_v30  ;;  %v3107_v17 = vor.u32 %v4074_v16, %v3106_v15  ;;  %v3116_v30 = vld [vmem:[%s6719_s2 + $0x18] sm:$0xf0] }
  0xcf   :  { %771 = vmatpush.bf16.msrb.mxu3 %v3135_v9  ;;  %v3119_v33 = vor.u32 %v4073_v28, %v3116_v30  ;;  %746 = vmatpush.bf16.msrb.mxu1 %v3111_v26  ;;  %v3346_v28 = vld [vmem:[%s6719_s2 + $0xe0] sm:$0xf]  ;;  %v4134_v30 = vld [vmem:[%s6719_s2 + $0xec] sm:$0xf0] }
  0xd0   :  { %4308 = vtanh.f32 %v510_v6  ;;  %733 = vmatpush.bf16.msrb.mxu0 %v3107_v17 }
  0xd2   :  { %v220_v45 = vpop.f32.mrf.mxu3 }
  0xd3   :  { %v4953_v2 = vadd.f32 %v220_v45, %v4725_v0  ;;  %v465_v7 = vpop.f32.mrf.mxu2  ;;  %772 = vmatpush.bf16.msrb.mxu3 %v3119_v33  ;;  %v3347_v33 = vor.u32 %v4134_v30, %v3346_v28  ;;  %v4125_v28 = vld [vmem:[%s6719_s2 + $0xac] sm:$0xf]  ;;  %v3324_v30 = vld [vmem:[%s6719_s2 + $0xb8] sm:$0xf0] }
  0xd4   :  { %v476_v13 = vpop.f32.mrf.mxu1 }
  0xd5   :  { %v507_v59 = vadd.f32 %v476_v13, %v146_v1  ;;  %998 = vmatpush.bf16.msra.mxu0 %v3347_v33  ;;  %v3298_v33 = vld [vmem:[%s6719_s2 + $0x80] sm:$0xf] }
  0xd6   :  { %v4309_v40 = vpop.eup %4308 }
  0xd7   :  { %v514_v32 = vmul.f32 0.5, %v507_v59  ;;  %v512_v6 = vmul.f32 0.5, %v4309_v40  ;;  %v4133_v40 = vld [vmem:[%s6719_s2 + $0xec] sm:$0xf] }
  0xd9   :  { %4310 = vtanh.f32 %v514_v32  ;;  %v513_v58 = vadd.f32 0.5, %v512_v6  ;;  %v4132_v32 = vld [vmem:[%s6719_s2 + $0xe4] sm:$0xf]  ;;  %v4130_v6 = vld [vmem:[%s6719_s2 + $0xcc] sm:$0xf0] }
  0xda   :  { %v502_v36 = vpop.f32.mrf.mxu3 }
  0xdb   :  { %v489_v37 = vpop.f32.mrf.mxu2  ;;  %v509_v38 = vadd.f32 %v502_v36, %v204_v34  ;;  %v3348_v34 = vld [vmem:[%s6719_s2 + $0xf0] sm:$0xf0]  ;;  %v4135_v36 = vld [vmem:[%s6719_s2 + $0xf4] sm:$0xf0] }
  0xdc   :  { %v508_v41 = vadd.f32 %v489_v37, %v175_v35  ;;  %v478_v42 = vpop.f32.mrf.mxu1  ;;  %v3354_v35 = vld [vmem:[%s6719_s2 + $0xe8] sm:$0xf]  ;;  %v3351_v37 = vor.u32 %v4132_v32, %v3348_v34  ;;  %v3327_v32 = vor.u32 %v4125_v28, %v3324_v30  ;;  %v4122_v34 = vld [vmem:[%s6719_s2 + $0x8c] sm:$0xf0]  ;;  %v4115_v30 = vld [vmem:[%s6719_s2 + $0x54] sm:$0xf0] }
  0xdd   :  { %v519_v43 = vmul.f32 0.5, %v509_v38  ;;  %v3355_v38 = vor.u32 %v4135_v36, %v3354_v35  ;;  %v4120_v35 = vld [vmem:[%s6719_s2 + $0x84] sm:$0xf]  ;;  %v3299_v36 = vor.u32 %v4122_v34, %v3298_v33  ;;  %v3274_v28 = vld [vmem:[%s6719_s2 + $0x48] sm:$0xf] }
  0xde   :  { %4312 = vtanh.f32 %v508_v41  ;;  %v3356_v41 = vld [vmem:[%s6719_s2 + $0xf8] sm:$0xf0]  ;;  %1011 = vmatpush.bf16.msra.mxu1 %v3351_v37  ;;  %v3300_v37 = vld [vmem:[%s6719_s2 + $0x90] sm:$0xf0]  ;;  %v3275_v33 = vor.u32 %v4115_v30, %v3274_v28  ;;  %v4113_v34 = vld [vmem:[%s6719_s2 + $0x4c] sm:$0xf] }
  0xdf   :  { %v4311_v44 = vpop.eup %4310  ;;  %4314 = vtanh.f32 %v519_v43  ;;  %v3359_v42 = vor.u32 %v4133_v40, %v3356_v41  ;;  %v5046_v43 = vpop.f32.mrf.mxu0  ;;  %1024 = vmatpush.bf16.msra.mxu2 %v3355_v38  ;;  %v3306_v38 = vld [vmem:[%s6719_s2 + $0x88] sm:$0xf]  ;;  %v4123_v40 = vld [vmem:[%s6719_s2 + $0x94] sm:$0xf0]  ;;  %v3303_v41 = vor.u32 %v4120_v35, %v3300_v37  ;;  %v3276_v35 = vld [vmem:[%s6719_s2 + $0x58] sm:$0xf0] }
  0xe0   :  { %v516_v45 = vmul.f32 0.5, %v4311_v44  ;;  %v3330_v44 = vld [vmem:[%s6719_s2 + $0xc0] sm:$0xf]  ;;  %v3244_v28 = vld [vmem:[%s6719_s2 + $0x18] sm:$0xf0] }
  0xe1   :  { %1037 = vmatpush.bf16.msra.mxu3 %v3359_v42  ;;  %v3307_v42 = vor.u32 %v4123_v40, %v3306_v38  ;;  %v3250_v37 = vld [vmem:[%s6719_s2 + $0x20] sm:$0xf]  ;;  %v4110_v38 = vld [vmem:[%s6719_s2 + $0x2c] sm:$0xf0]  ;;  %v4108_v40 = vld [vmem:[%s6719_s2 + $0x24] sm:$0xf] }
  0xe2   :  { %v517_v46 = vadd.f32 0.5, %v516_v45  ;;  %v504_v48 = vpop.f32.mrf.mxu3  ;;  %v4128_v45 = vld [vmem:[%s6719_s2 + $0xc4] sm:$0xf] }
  0xe3   :  { %v491_v0 = vpop.f32.mrf.mxu2  ;;  %v3332_v48 = vld [vmem:[%s6719_s2 + $0xd0] sm:$0xf0] }
  0xe4   :  { %v4313_v60 = vpop.eup %4312  ;;  %v523_v62 = vmul.f32 0.0, %v517_v46  ;;  %v3331_v46 = vor.u32 %v4130_v6, %v3330_v44  ;;  %v4131_v0 = vld [vmem:[%s6719_s2 + $0xd4] sm:$0xf0]  ;;  %v4121_v44 = vld [vmem:[%s6719_s2 + $0x8c] sm:$0xf] }
  0xe5   :  { %v524_v1 = vmul.f32 %v4313_v60, %v513_v58  ;;  %v4315_v52 = vpop.eup %4314  ;;  %v3338_v58 = vld [vmem:[%s6719_s2 + $0xc8] sm:$0xf]  ;;  %v3335_v60 = vor.u32 %v4128_v45, %v3332_v48  ;;  %v3308_v6 = vld [vmem:[%s6719_s2 + $0x98] sm:$0xf0]  ;;  %v4118_v48 = vld [vmem:[%s6719_s2 + $0x6c] sm:$0xf0] }
  0xe6   :  { %v521_v9 = vmul.f32 0.5, %v4315_v52  ;;  %v3340_v52 = vld [vmem:[%s6719_s2 + $0xd8] sm:$0xf0]  ;;  %999 = vmatpush.bf16.msra.mxu0 %v3331_v46  ;;  %v3311_v45 = vor.u32 %v4121_v44, %v3308_v6  ;;  %v3282_v46 = vld [vmem:[%s6719_s2 + $0x60] sm:$0xf] }
  0xe7   :  { %v4983_v7 = vadd.f32 %v524_v1, %v523_v62  ;;  %v3339_v62 = vor.u32 %v4131_v0, %v3338_v58  ;;  %v4129_v1 = vld [vmem:[%s6719_s2 + $0xcc] sm:$0xf]  ;;  %1012 = vmatpush.bf16.msra.mxu1 %v3335_v60  ;;  %v4116_v58 = vld [vmem:[%s6719_s2 + $0x64] sm:$0xf]  ;;  %v3283_v0 = vor.u32 %v4118_v48, %v3282_v46  ;;  %v3284_v60 = vld [vmem:[%s6719_s2 + $0x70] sm:$0xf0] }
  0xe8   :  { %v522_v13 = vadd.f32 0.5, %v521_v9  ;;  %v3343_v9 = vor.u32 %v4129_v1, %v3340_v52  ;;  %v4119_v1 = vld [vmem:[%s6719_s2 + $0x74] sm:$0xf0]  ;;  %v3287_v52 = vor.u32 %v4116_v58, %v3284_v60  ;;  %v3258_v44 = vld [vmem:[%s6719_s2 + $0x28] sm:$0xf] }
  0xe9   :  { %4316 = vtanh.f32 %v4983_v7  ;;  %1025 = vmatpush.bf16.msra.mxu2 %v3339_v62  ;;  %v3290_v62 = vld [vmem:[%s6719_s2 + $0x68] sm:$0xf]  ;;  %v4111_v6 = vld [vmem:[%s6719_s2 + $0x34] sm:$0xf0]  ;;  %v4109_v48 = vld [vmem:[%s6719_s2 + $0x2c] sm:$0xf] }
  0xea   :  { %1038 = vmatpush.bf16.msra.mxu3 %v3343_v9  ;;  %v3291_v9 = vor.u32 %v4119_v1, %v3290_v62  ;;  %v3259_v46 = vor.u32 %v4111_v6, %v3258_v44  ;;  %v3260_v58 = vld [vmem:[%s6719_s2 + $0x38] sm:$0xf0] }
  0xeb   :  { %v3263_v60 = vor.u32 %v4109_v48, %v3260_v58 }
  0xee   :  { %1039 = vmatpush.bf16.msra.mxu3 %v3327_v32 }
  0xef   :  { %v4317_v15 = vpop.eup %4316 }
  0xf0   :  { %v4986_v16 = vmul.f32 %v4317_v15, %v522_v13  ;;  %v3314_v13 = vld [vmem:[%s6719_s2 + $0xa0] sm:$0xf]  ;;  %v4126_v15 = vld [vmem:[%s6719_s2 + $0xac] sm:$0xf0] }
  0xf2   :  { %v2546_v56 = vrot.slane %v4986_v16, 1  ;;  %v2547_v59 = vrot.slane %v4986_v16, 2  ;;  %v2548_v17 = vrot.slane %v4986_v16, 3  ;;  %2560 = vst [vmem:[%s6721_s6] sm:$0x1] %v4986_v16  ;;  %v2549_v18 = vrot.slane %v4986_v16, 4  ;;  %1040 = vmatpush.bf16.msra.mxu3 %v3311_v45 }
  0xf3   :  { %v533_v19 = vpack.c.bf16 %v4986_v16, %v4986_v16  ;;  %v2550_v24 = vrot.slane %v4986_v16, 5  ;;  %v2551_v26 = vrot.slane %v4986_v16, 6  ;;  %v2552_v27 = vrot.slane %v4986_v16, 7 }
  0xf4   :  { %2561 = vst [vmem:[%s6721_s6 + $0x8] sm:$0x1] %v2546_v56  ;;  %v4124_v56 = vld [vmem:[%s6719_s2 + $0xa4] sm:$0xf] }
  0xf5   :  { %2562 = vst [vmem:[%s6721_s6 + $0x10] sm:$0x1] %v2547_v59  ;;  %734 = vmatmul.bf16.vlgmr.msrb.gmra.mxu0 %v533_v19  ;;  %747 = vmatmul.bf16.vlgmr.msrb.gmra.mxu1 %v533_v19  ;;  %v3315_v59 = vor.u32 %v4126_v15, %v3314_v13  ;;  %v4117_v13 = vld [vmem:[%s6719_s2 + $0x6c] sm:$0xf]  ;;  %v3292_v15 = vld [vmem:[%s6719_s2 + $0x78] sm:$0xf0] }
  0xf6   :  { %2563 = vst [vmem:[%s6721_s6 + $0x18] sm:$0x1] %v2548_v17  ;;  %760 = vmatmul.bf16.vlgmr.msrb.gmra.mxu2 %v533_v19  ;;  %773 = vmatmul.bf16.vlgmr.msrb.gmra.mxu3 %v533_v19  ;;  %v3316_v17 = vld [vmem:[%s6719_s2 + $0xb0] sm:$0xf0]  ;;  %v4127_v19 = vld [vmem:[%s6719_s2 + $0xb4] sm:$0xf0] }
  0xf7   :  { %2564 = vst [vmem:[%s6721_s6 + $0x20] sm:$0x1] %v2549_v18  ;;  %v3322_v18 = vld [vmem:[%s6719_s2 + $0xa8] sm:$0xf]  ;;  %1000 = vmatpush.bf16.msra.mxu0 %v3315_v59 }
  0xf8   :  { %2565 = vst [vmem:[%s6721_s6 + $0x28] sm:$0x1] %v2550_v24  ;;  %v5090_v24 = vpop.f32.mrf.mxu0 }
  0xf9   :  { %2566 = vst [vmem:[%s6721_s6 + $0x30] sm:$0x1] %v2551_v26  ;;  %v3319_v26 = vor.u32 %v4124_v56, %v3316_v17  ;;  %v3295_v56 = vor.u32 %v4117_v13, %v3292_v15  ;;  %v3266_v17 = vld [vmem:[%s6719_s2 + $0x40] sm:$0xf]  ;;  %v4104_v13 = vld [vmem:[%s6719_s2 + $0x4] sm:$0xf] }
  0xfa   :  { %2567 = vst [vmem:[%s6721_s6 + $0x38] sm:$0x1] %v2552_v27  ;;  %v3323_v27 = vor.u32 %v4127_v19, %v3322_v18  ;;  %v4114_v18 = vld [vmem:[%s6719_s2 + $0x4c] sm:$0xf0]  ;;  %v4112_v19 = vld [vmem:[%s6719_s2 + $0x44] sm:$0xf] }
  0xfb   :  { %1013 = vmatpush.bf16.msra.mxu1 %v3319_v26  ;;  %1001 = vmatpush.bf16.msra.mxu0 %v3299_v36  ;;  %v3267_v26 = vor.u32 %v4114_v18, %v3266_v17  ;;  %v3279_v36 = vor.u32 %v4113_v34, %v3276_v35  ;;  %v3236_v17 = vld [vmem:[%s6719_s2 + $0x10] sm:$0xf0]  ;;  %v3242_v18 = vld [vmem:[%s6719_s2 + $0x8] sm:$0xf]  ;;  %v177_v34 = vadd.f32 %v4701_v55, %v4711_v57 }
  0xfc   :  { %1026 = vmatpush.bf16.msra.mxu2 %v3323_v27  ;;  %1041 = vmatpush.bf16.msra.mxu3 %v3295_v56  ;;  %v3268_v27 = vld [vmem:[%s6719_s2 + $0x50] sm:$0xf0] }
  0xfd   :  { %v3271_v32 = vor.u32 %v4112_v19, %v3268_v27  ;;  %v4107_v19 = vld [vmem:[%s6719_s2 + $0x14] sm:$0xf0] }
  0xfe   :  { %v3243_v27 = vor.u32 %v4107_v19, %v3242_v18 }
  0xff   :  { %1014 = vmatpush.bf16.msra.mxu1 %v3303_v41  ;;  %1002 = vmatpush.bf16.msra.mxu0 %v3283_v0  ;;  %v3251_v41 = vor.u32 %v4110_v38, %v3250_v37  ;;  %v119_v0 = vadd.f32 %v5046_v43, %v4869_v39 }
 0x100   :  { %1027 = vmatpush.bf16.msra.mxu2 %v3307_v42  ;;  %v5146_v59 = vpop.f32.mrf.mxu0  ;;  %1042 = vmatpush.bf16.msra.mxu3 %v3279_v36  ;;  %v3252_v42 = vld [vmem:[%s6719_s2 + $0x30] sm:$0xf0] }
 0x101   :  { %v3255_v45 = vor.u32 %v4108_v40, %v3252_v42 }
 0x103   :  { %1015 = vmatpush.bf16.msra.mxu1 %v3287_v52  ;;  %1003 = vmatpush.bf16.msra.mxu0 %v3267_v26  ;;  %v3234_v52 = vld [vmem:[%s6719_s2] sm:$0xf]  ;;  %v3239_v26 = vor.u32 %v4104_v13, %v3236_v17 }
 0x104   :  { %1028 = vmatpush.bf16.msra.mxu2 %v3291_v9  ;;  %v4106_v9 = vld [vmem:[%s6719_s2 + $0xc] sm:$0xf0]  ;;  %1043 = vmatpush.bf16.msra.mxu3 %v3263_v60 }
 0x105   :  { %v3235_v56 = vor.u32 %v4106_v9, %v3234_v52 }
 0x107   :  { %1016 = vmatpush.bf16.msra.mxu1 %v3271_v32  ;;  %1004 = vmatpush.bf16.msra.mxu0 %v3251_v41 }
 0x108   :  { %1029 = vmatpush.bf16.msra.mxu2 %v3275_v33 }
 0x10b   :  { %1017 = vmatpush.bf16.msra.mxu1 %v3255_v45  ;;  %1005 = vmatpush.bf16.msra.mxu0 %v3235_v56 }
 0x10c   :  { %1030 = vmatpush.bf16.msra.mxu2 %v3259_v46 }
 0x10f   :  { %1018 = vmatpush.bf16.msra.mxu1 %v3239_v26 }
 0x110   :  { %1031 = vmatpush.bf16.msra.mxu2 %v3243_v27 }
 0x172   :  { %v735_v62 = vpop.f32.mrf.mxu0  ;;  %v748_v1 = vpop.f32.mrf.mxu1 }
 0x173   :  { %v778_v15 = vadd.f32 %v735_v62, %v119_v0  ;;  %v779_v43 = vadd.f32 %v748_v1, %v4722_v63  ;;  %v4105_v63 = vld [vmem:[%s6719_s2 + $0xc] sm:$0xf] }
 0x174   :  { %v3247_v33 = vor.u32 %v4105_v63, %v3244_v28  ;;  %v3474_v63 = vld [vmem:[%s6719_s2 + $0xe0] sm:$0xf]  ;;  %v4166_v28 = vld [vmem:[%s6719_s2 + $0xec] sm:$0xf0] }
 0x175   :  { %v782_v30 = vmul.f32 0.5, %v778_v15  ;;  %v786_v32 = vmul.f32 0.5, %v779_v43 }
 0x176   :  { %1044 = vmatpush.bf16.msra.mxu3 %v3247_v33  ;;  %v3476_v33 = vld [vmem:[%s6719_s2 + $0xf0] sm:$0xf0] }
 0x177   :  { %4318 = vtanh.f32 %v782_v30  ;;  %v4164_v30 = vld [vmem:[%s6719_s2 + $0xe4] sm:$0xf] }
 0x178   :  { %4320 = vtanh.f32 %v786_v32  ;;  %v3475_v32 = vor.u32 %v4166_v28, %v3474_v63  ;;  %v3426_v63 = vld [vmem:[%s6719_s2 + $0x80] sm:$0xf]  ;;  %v4154_v28 = vld [vmem:[%s6719_s2 + $0x8c] sm:$0xf0] }
 0x179   :  { %v761_v35 = vpop.f32.mrf.mxu2  ;;  %v774_v36 = vpop.f32.mrf.mxu3 }
 0x17a   :  { %v780_v37 = vadd.f32 %v761_v35, %v177_v34  ;;  %v781_v38 = vadd.f32 %v774_v36, %v4728_v3  ;;  %v737_v40 = vpop.f32.mrf.mxu0  ;;  %v750_v41 = vpop.f32.mrf.mxu1  ;;  %v3482_v34 = vld [vmem:[%s6719_s2 + $0xe8] sm:$0xf]  ;;  %v4167_v35 = vld [vmem:[%s6719_s2 + $0xf4] sm:$0xf0]  ;;  %v3479_v36 = vor.u32 %v4164_v30, %v3476_v33  ;;  %1270 = vmatpush.bf16.msrb.mxu0 %v3475_v32  ;;  %v4152_v30 = vld [vmem:[%s6719_s2 + $0x84] sm:$0xf]  ;;  %v3427_v32 = vor.u32 %v4154_v28, %v3426_v63 }
 0x17b   :  { %v3484_v40 = vld [vmem:[%s6719_s2 + $0xf8] sm:$0xf0]  ;;  %v3428_v33 = vld [vmem:[%s6719_s2 + $0x90] sm:$0xf0]  ;;  %v3378_v63 = vld [vmem:[%s6719_s2 + $0x20] sm:$0xf] }
 0x17c   :  { %4322 = vtanh.f32 %v780_v37  ;;  %v791_v42 = vmul.f32 0.5, %v781_v38  ;;  %v3483_v37 = vor.u32 %v4167_v35, %v3482_v34  ;;  %v4165_v38 = vld [vmem:[%s6719_s2 + $0xec] sm:$0xf]  ;;  %1283 = vmatpush.bf16.msrb.mxu1 %v3479_v36  ;;  %v3434_v34 = vld [vmem:[%s6719_s2 + $0x88] sm:$0xf]  ;;  %v3431_v36 = vor.u32 %v4152_v30, %v3428_v33 }
 0x17d   :  { %v4319_v44 = vpop.eup %4318  ;;  %v3487_v41 = vor.u32 %v4165_v38, %v3484_v40  ;;  %v4155_v35 = vld [vmem:[%s6719_s2 + $0x94] sm:$0xf0]  ;;  %v4153_v38 = vld [vmem:[%s6719_s2 + $0x8c] sm:$0xf]  ;;  %v3436_v40 = vld [vmem:[%s6719_s2 + $0x98] sm:$0xf0] }
 0x17e   :  { %v4321_v6 = vpop.eup %4320  ;;  %v784_v45 = vmul.f32 0.5, %v4319_v44  ;;  %4324 = vtanh.f32 %v791_v42  ;;  %1296 = vmatpush.bf16.msrb.mxu2 %v3483_v37  ;;  %v3458_v42 = vld [vmem:[%s6719_s2 + $0xc0] sm:$0xf]  ;;  %v4162_v44 = vld [vmem:[%s6719_s2 + $0xcc] sm:$0xf0]  ;;  %v3435_v37 = vor.u32 %v4155_v35, %v3434_v34 }
 0x17f   :  { %v788_v46 = vmul.f32 0.5, %v4321_v6  ;;  %v4160_v6 = vld [vmem:[%s6719_s2 + $0xc4] sm:$0xf]  ;;  %1309 = vmatpush.bf16.msrb.mxu3 %v3487_v41  ;;  %v3439_v41 = vor.u32 %v4153_v38, %v3436_v40  ;;  %v4142_v28 = vld [vmem:[%s6719_s2 + $0x2c] sm:$0xf0] }
 0x180   :  { %v785_v48 = vadd.f32 0.5, %v784_v45  ;;  %v3459_v45 = vor.u32 %v4162_v44, %v3458_v42  ;;  %v3410_v42 = vld [vmem:[%s6719_s2 + $0x60] sm:$0xf]  ;;  %v4150_v44 = vld [vmem:[%s6719_s2 + $0x6c] sm:$0xf0] }
 0x181   :  { %v789_v58 = vadd.f32 0.5, %v788_v46  ;;  %v763_v0 = vpop.f32.mrf.mxu2  ;;  %v776_v60 = vpop.f32.mrf.mxu3  ;;  %v3460_v46 = vld [vmem:[%s6719_s2 + $0xd0] sm:$0xf0]  ;;  %v4140_v30 = vld [vmem:[%s6719_s2 + $0x24] sm:$0xf] }
 0x182   :  { %v4323_v55 = vpop.eup %4322  ;;  %v3463_v0 = vor.u32 %v4160_v6, %v3460_v46  ;;  %1271 = vmatpush.bf16.msrb.mxu0 %v3459_v45  ;;  %v4148_v6 = vld [vmem:[%s6719_s2 + $0x64] sm:$0xf]  ;;  %v3411_v45 = vor.u32 %v4150_v44, %v3410_v42  ;;  %v3412_v46 = vld [vmem:[%s6719_s2 + $0x70] sm:$0xf0]  ;;  %v3386_v34 = vld [vmem:[%s6719_s2 + $0x28] sm:$0xf] }
 0x183   :  { %v795_v57 = vmul.f32 %v789_v58, %v4983_v7  ;;  %v796_v62 = vmul.f32 %v4323_v55, %v785_v48  ;;  %v3466_v48 = vld [vmem:[%s6719_s2 + $0xc8] sm:$0xf]  ;;  %v4163_v58 = vld [vmem:[%s6719_s2 + $0xd4] sm:$0xf0]  ;;  %v4161_v55 = vld [vmem:[%s6719_s2 + $0xcc] sm:$0xf] }
 0x184   :  { %v4325_v1 = vpop.eup %4324  ;;  %v3467_v60 = vor.u32 %v4163_v58, %v3466_v48  ;;  %1284 = vmatpush.bf16.msrb.mxu1 %v3463_v0  ;;  %v3418_v48 = vld [vmem:[%s6719_s2 + $0x68] sm:$0xf]  ;;  %v4151_v58 = vld [vmem:[%s6719_s2 + $0x74] sm:$0xf0]  ;;  %v3415_v0 = vor.u32 %v4148_v6, %v3412_v46  ;;  %v3380_v33 = vld [vmem:[%s6719_s2 + $0x30] sm:$0xf0] }
 0x185   :  { %v5227_v52 = vadd.f32 %v796_v62, %v795_v57  ;;  %v793_v3 = vmul.f32 0.5, %v4325_v1  ;;  %v3468_v57 = vld [vmem:[%s6719_s2 + $0xd8] sm:$0xf0]  ;;  %v3442_v1 = vld [vmem:[%s6719_s2 + $0xa0] sm:$0xf] }
 0x186   :  { %v3471_v62 = vor.u32 %v4161_v55, %v3468_v57  ;;  %1297 = vmatpush.bf16.msrb.mxu2 %v3467_v60  ;;  %v3419_v60 = vor.u32 %v4151_v58, %v3418_v48  ;;  %v4149_v55 = vld [vmem:[%s6719_s2 + $0x6c] sm:$0xf]  ;;  %v3420_v57 = vld [vmem:[%s6719_s2 + $0x78] sm:$0xf0]  ;;  %v4143_v35 = vld [vmem:[%s6719_s2 + $0x34] sm:$0xf0] }
 0x187   :  { %4326 = vtanh.f32 %v5227_v52  ;;  %v794_v9 = vadd.f32 0.5, %v793_v3  ;;  %v4158_v3 = vld [vmem:[%s6719_s2 + $0xac] sm:$0xf0]  ;;  %v4141_v38 = vld [vmem:[%s6719_s2 + $0x2c] sm:$0xf] }
 0x188   :  { %1310 = vmatpush.bf16.msrb.mxu3 %v3471_v62  ;;  %v3423_v62 = vor.u32 %v4149_v55, %v3420_v57  ;;  %v3388_v40 = vld [vmem:[%s6719_s2 + $0x38] sm:$0xf0]  ;;  %v4138_v46 = vld [vmem:[%s6719_s2 + $0xc] sm:$0xf0]  ;;  %v4136_v48 = vld [vmem:[%s6719_s2 + $0x4] sm:$0xf] }
 0x189   :  { %v3391_v42 = vor.u32 %v4141_v38, %v3388_v40  ;;  %v3370_v55 = vld [vmem:[%s6719_s2 + $0x8] sm:$0xf]  ;;  %v4139_v57 = vld [vmem:[%s6719_s2 + $0x14] sm:$0xf0] }
 0x18d   :  { %v4327_v13 = vpop.eup %4326 }
 0x18e   :  { %v5230_v15 = vmul.f32 %v4327_v13, %v794_v9  ;;  %v4156_v9 = vld [vmem:[%s6719_s2 + $0xa4] sm:$0xf]  ;;  %v3443_v13 = vor.u32 %v4158_v3, %v3442_v1  ;;  %v3394_v1 = vld [vmem:[%s6719_s2 + $0x40] sm:$0xf]  ;;  %v4146_v3 = vld [vmem:[%s6719_s2 + $0x4c] sm:$0xf0] }
 0x190   :  { %v2593_v43 = vrot.slane %v5230_v15, 1  ;;  %v2594_v56 = vrot.slane %v5230_v15, 2  ;;  %v2595_v17 = vrot.slane %v5230_v15, 3  ;;  %2607 = vst [vmem:[%s6721_s6 + $0x1] sm:$0x1] %v5230_v15  ;;  %v2596_v7 = vrot.slane %v5230_v15, 4  ;;  %1272 = vmatpush.bf16.msrb.mxu0 %v3443_v13 }
 0x191   :  { %v805_v18 = vpack.c.bf16 %v5230_v15, %v5230_v15  ;;  %v2597_v19 = vrot.slane %v5230_v15, 5  ;;  %v2598_v26 = vrot.slane %v5230_v15, 6  ;;  %v2599_v27 = vrot.slane %v5230_v15, 7 }
 0x192   :  { %2608 = vst [vmem:[%s6721_s6 + $0x9] sm:$0x1] %v2593_v43  ;;  %v3444_v43 = vld [vmem:[%s6719_s2 + $0xb0] sm:$0xf0]  ;;  %v3395_v13 = vor.u32 %v4146_v3, %v3394_v1  ;;  %v3371_v1 = vor.u32 %v4139_v57, %v3370_v55  ;;  %v3372_v3 = vld [vmem:[%s6719_s2 + $0x18] sm:$0xf0] }
 0x193   :  { %2609 = vst [vmem:[%s6721_s6 + $0x11] sm:$0x1] %v2594_v56  ;;  %1006 = vmatmul.bf16.vlgmr.msra.gmra.mxu0 %v805_v18  ;;  %1019 = vmatmul.bf16.vlgmr.msra.gmra.mxu1 %v805_v18  ;;  %v3450_v56 = vld [vmem:[%s6719_s2 + $0xa8] sm:$0xf]  ;;  %v3602_v55 = vld [vmem:[%s6719_s2 + $0xe0] sm:$0xf] }
 0x194   :  { %2610 = vst [vmem:[%s6721_s6 + $0x19] sm:$0x1] %v2595_v17  ;;  %1032 = vmatmul.bf16.vlgmr.msra.gmra.mxu2 %v805_v18  ;;  %1045 = vmatmul.bf16.vlgmr.msra.gmra.mxu3 %v805_v18  ;;  %v4159_v17 = vld [vmem:[%s6719_s2 + $0xb4] sm:$0xf0]  ;;  %v4198_v57 = vld [vmem:[%s6719_s2 + $0xec] sm:$0xf0] }
 0x195   :  { %2611 = vst [vmem:[%s6721_s6 + $0x21] sm:$0x1] %v2596_v7  ;;  %v3447_v7 = vor.u32 %v4156_v9, %v3444_v43  ;;  %v3451_v18 = vor.u32 %v4159_v17, %v3450_v56  ;;  %1273 = vmatpush.bf16.msrb.mxu0 %v3427_v32  ;;  %v4144_v9 = vld [vmem:[%s6719_s2 + $0x44] sm:$0xf]  ;;  %v3396_v43 = vld [vmem:[%s6719_s2 + $0x50] sm:$0xf0]  ;;  %v3379_v32 = vor.u32 %v4142_v28, %v3378_v63 }
 0x196   :  { %2612 = vst [vmem:[%s6721_s6 + $0x29] sm:$0x1] %v2597_v19  ;;  %v4157_v19 = vld [vmem:[%s6719_s2 + $0xac] sm:$0xf]  ;;  %v3402_v56 = vld [vmem:[%s6719_s2 + $0x48] sm:$0xf] }
 0x197   :  { %2613 = vst [vmem:[%s6721_s6 + $0x31] sm:$0x1] %v2598_v26  ;;  %v3452_v26 = vld [vmem:[%s6719_s2 + $0xb8] sm:$0xf0]  ;;  %1285 = vmatpush.bf16.msrb.mxu1 %v3447_v7  ;;  %1298 = vmatpush.bf16.msrb.mxu2 %v3451_v18  ;;  %v4147_v17 = vld [vmem:[%s6719_s2 + $0x54] sm:$0xf0]  ;;  %v3399_v7 = vor.u32 %v4144_v9, %v3396_v43 }
 0x198   :  { %2614 = vst [vmem:[%s6721_s6 + $0x39] sm:$0x1] %v2599_v27  ;;  %v3455_v27 = vor.u32 %v4157_v19, %v3452_v26  ;;  %v3403_v18 = vor.u32 %v4147_v17, %v3402_v56  ;;  %v4145_v19 = vld [vmem:[%s6719_s2 + $0x4c] sm:$0xf]  ;;  %v3404_v26 = vld [vmem:[%s6719_s2 + $0x58] sm:$0xf0] }
 0x199   :  { %1274 = vmatpush.bf16.msrb.mxu0 %v3411_v45  ;;  %v3362_v45 = vld [vmem:[%s6719_s2] sm:$0xf] }
 0x19a   :  { %1311 = vmatpush.bf16.msrb.mxu3 %v3455_v27  ;;  %v3407_v27 = vor.u32 %v4145_v19, %v3404_v26 }
 0x19b   :  { %1286 = vmatpush.bf16.msrb.mxu1 %v3431_v36  ;;  %1299 = vmatpush.bf16.msrb.mxu2 %v3435_v37  ;;  %v3383_v36 = vor.u32 %v4140_v30, %v3380_v33  ;;  %v3387_v37 = vor.u32 %v4143_v35, %v3386_v34 }
 0x19d   :  { %1275 = vmatpush.bf16.msrb.mxu0 %v3395_v13 }
 0x19e   :  { %1312 = vmatpush.bf16.msrb.mxu3 %v3439_v41  ;;  %v122_v41 = vadd.f32 %v5090_v24, %v4869_v39 }
 0x19f   :  { %1287 = vmatpush.bf16.msrb.mxu1 %v3415_v0  ;;  %1300 = vmatpush.bf16.msrb.mxu2 %v3419_v60  ;;  %v3363_v0 = vor.u32 %v4138_v46, %v3362_v45  ;;  %v3364_v60 = vld [vmem:[%s6719_s2 + $0x10] sm:$0xf0] }
 0x1a1   :  { %1276 = vmatpush.bf16.msrb.mxu0 %v3379_v32 }
 0x1a2   :  { %1313 = vmatpush.bf16.msrb.mxu3 %v3423_v62  ;;  %v3367_v62 = vor.u32 %v4136_v48, %v3364_v60 }
 0x1a3   :  { %1288 = vmatpush.bf16.msrb.mxu1 %v3399_v7  ;;  %1301 = vmatpush.bf16.msrb.mxu2 %v3403_v18 }
 0x1a5   :  { %1277 = vmatpush.bf16.msrb.mxu0 %v3363_v0 }
 0x1a6   :  { %1314 = vmatpush.bf16.msrb.mxu3 %v3407_v27 }
 0x1a7   :  { %1289 = vmatpush.bf16.msrb.mxu1 %v3383_v36  ;;  %1302 = vmatpush.bf16.msrb.mxu2 %v3387_v37 }
 0x1aa   :  { %1315 = vmatpush.bf16.msrb.mxu3 %v3391_v42 }
 0x1ab   :  { %1290 = vmatpush.bf16.msrb.mxu1 %v3367_v62  ;;  %1303 = vmatpush.bf16.msrb.mxu2 %v3371_v1  ;;  %v4196_v62 = vld [vmem:[%s6719_s2 + $0xe4] sm:$0xf]  ;;  %v3603_v1 = vor.u32 %v4198_v57, %v3602_v55  ;;  %v3556_v57 = vld [vmem:[%s6719_s2 + $0x90] sm:$0xf0] }
 0x1ad   :  { %1542 = vmatpush.bf16.msra.mxu0 %v3603_v1  ;;  %v4187_v1 = vld [vmem:[%s6719_s2 + $0x94] sm:$0xf0] }
 0x210   :  { %v1007_v44 = vpop.f32.mrf.mxu0  ;;  %v1020_v6 = vpop.f32.mrf.mxu1 }
 0x211   :  { %v1050_v58 = vadd.f32 %v1007_v44, %v122_v41  ;;  %v1051_v24 = vadd.f32 %v1020_v6, %v4734_v8  ;;  %v4137_v8 = vld [vmem:[%s6719_s2 + $0xc] sm:$0xf] }
 0x212   :  { %v3375_v43 = vor.u32 %v4137_v8, %v3372_v3  ;;  %v3604_v8 = vld [vmem:[%s6719_s2 + $0xf0] sm:$0xf0]  ;;  %v3610_v3 = vld [vmem:[%s6719_s2 + $0xe8] sm:$0xf] }
 0x213   :  { %v1054_v9 = vmul.f32 0.5, %v1050_v58  ;;  %v1058_v13 = vmul.f32 0.5, %v1051_v24 }
 0x214   :  { %1316 = vmatpush.bf16.msrb.mxu3 %v3375_v43 }
 0x215   :  { %4328 = vtanh.f32 %v1054_v9  ;;  %v4199_v9 = vld [vmem:[%s6719_s2 + $0xf4] sm:$0xf0] }
 0x216   :  { %4330 = vtanh.f32 %v1058_v13  ;;  %v3607_v13 = vor.u32 %v4196_v62, %v3604_v8  ;;  %v3611_v43 = vor.u32 %v4199_v9, %v3610_v3  ;;  %v3562_v62 = vld [vmem:[%s6719_s2 + $0x88] sm:$0xf]  ;;  %v4185_v9 = vld [vmem:[%s6719_s2 + $0x8c] sm:$0xf] }
 0x217   :  { %v1033_v56 = vpop.f32.mrf.mxu2  ;;  %v1046_v17 = vpop.f32.mrf.mxu3  ;;  %v3563_v3 = vor.u32 %v4187_v1, %v3562_v62  ;;  %v4173_v1 = vld [vmem:[%s6719_s2 + $0x2c] sm:$0xf] }
 0x218   :  { %v1052_v7 = vadd.f32 %v1033_v56, %v4719_v61  ;;  %v1053_v18 = vadd.f32 %v1046_v17, %v4737_v11  ;;  %v1009_v19 = vpop.f32.mrf.mxu0  ;;  %v1022_v26 = vpop.f32.mrf.mxu1  ;;  %v4197_v56 = vld [vmem:[%s6719_s2 + $0xec] sm:$0xf]  ;;  %v3612_v17 = vld [vmem:[%s6719_s2 + $0xf8] sm:$0xf0]  ;;  %1555 = vmatpush.bf16.msra.mxu1 %v3607_v13  ;;  %1568 = vmatpush.bf16.msra.mxu2 %v3611_v43 }
 0x219   :  { %v4194_v19 = vld [vmem:[%s6719_s2 + $0xcc] sm:$0xf0]  ;;  %v4192_v26 = vld [vmem:[%s6719_s2 + $0xc4] sm:$0xf]  ;;  %v3564_v13 = vld [vmem:[%s6719_s2 + $0x98] sm:$0xf0] }
 0x21a   :  { %4332 = vtanh.f32 %v1052_v7  ;;  %v1063_v27 = vmul.f32 0.5, %v1053_v18  ;;  %v3615_v7 = vor.u32 %v4197_v56, %v3612_v17  ;;  %v3586_v18 = vld [vmem:[%s6719_s2 + $0xc0] sm:$0xf]  ;;  %v3567_v43 = vor.u32 %v4185_v9, %v3564_v13  ;;  %v4182_v17 = vld [vmem:[%s6719_s2 + $0x6c] sm:$0xf0] }
 0x21b   :  { %v4329_v63 = vpop.eup %4328  ;;  %v3538_v56 = vld [vmem:[%s6719_s2 + $0x60] sm:$0xf] }
 0x21c   :  { %v4331_v28 = vpop.eup %4330  ;;  %v1056_v30 = vmul.f32 0.5, %v4329_v63  ;;  %4334 = vtanh.f32 %v1063_v27  ;;  %1581 = vmatpush.bf16.msra.mxu3 %v3615_v7  ;;  %v3587_v27 = vor.u32 %v4194_v19, %v3586_v18  ;;  %v3588_v63 = vld [vmem:[%s6719_s2 + $0xd0] sm:$0xf0]  ;;  %v4180_v7 = vld [vmem:[%s6719_s2 + $0x64] sm:$0xf]  ;;  %v3539_v18 = vor.u32 %v4182_v17, %v3538_v56 }
 0x21d   :  { %v1060_v32 = vmul.f32 0.5, %v4331_v28  ;;  %v3594_v28 = vld [vmem:[%s6719_s2 + $0xc8] sm:$0xf]  ;;  %v3540_v19 = vld [vmem:[%s6719_s2 + $0x70] sm:$0xf0] }
 0x21e   :  { %v1057_v33 = vadd.f32 0.5, %v1056_v30  ;;  %v4195_v30 = vld [vmem:[%s6719_s2 + $0xd4] sm:$0xf0]  ;;  %1543 = vmatpush.bf16.msra.mxu0 %v3587_v27  ;;  %v3490_v56 = vld [vmem:[%s6719_s2] sm:$0xf] }
 0x21f   :  { %v1061_v34 = vadd.f32 0.5, %v1060_v32  ;;  %v1035_v35 = vpop.f32.mrf.mxu2  ;;  %v1048_v36 = vpop.f32.mrf.mxu3  ;;  %v3591_v32 = vor.u32 %v4192_v26, %v3588_v63  ;;  %v3546_v26 = vld [vmem:[%s6719_s2 + $0x68] sm:$0xf]  ;;  %v4183_v27 = vld [vmem:[%s6719_s2 + $0x74] sm:$0xf0]  ;;  %v3543_v63 = vor.u32 %v4180_v7, %v3540_v19 }
 0x220   :  { %v4333_v37 = vpop.eup %4332  ;;  %v3596_v35 = vld [vmem:[%s6719_s2 + $0xd8] sm:$0xf0]  ;;  %v4170_v17 = vld [vmem:[%s6719_s2 + $0xc] sm:$0xf0]  ;;  %v4168_v7 = vld [vmem:[%s6719_s2 + $0x4] sm:$0xf] }
 0x221   :  { %v1067_v38 = vmul.f32 %v1061_v34, %v5227_v52  ;;  %v1068_v40 = vmul.f32 %v4333_v37, %v1057_v33  ;;  %v3595_v33 = vor.u32 %v4195_v30, %v3594_v28  ;;  %v4193_v34 = vld [vmem:[%s6719_s2 + $0xcc] sm:$0xf]  ;;  %1556 = vmatpush.bf16.msra.mxu1 %v3591_v32  ;;  %v3570_v37 = vld [vmem:[%s6719_s2 + $0xa0] sm:$0xf]  ;;  %v3547_v28 = vor.u32 %v4183_v27, %v3546_v26  ;;  %v3548_v32 = vld [vmem:[%s6719_s2 + $0x78] sm:$0xf0] }
 0x222   :  { %v4335_v61 = vpop.eup %4334  ;;  %v3599_v36 = vor.u32 %v4193_v34, %v3596_v35  ;;  %v4181_v30 = vld [vmem:[%s6719_s2 + $0x6c] sm:$0xf]  ;;  %v3522_v34 = vld [vmem:[%s6719_s2 + $0x40] sm:$0xf]  ;;  %v4178_v35 = vld [vmem:[%s6719_s2 + $0x4c] sm:$0xf0]  ;;  %v3491_v19 = vor.u32 %v4170_v17, %v3490_v56 }
 0x223   :  { %v5464_v41 = vadd.f32 %v1068_v40, %v1067_v38  ;;  %v1065_v11 = vmul.f32 0.5, %v4335_v61  ;;  %1569 = vmatpush.bf16.msra.mxu2 %v3595_v33  ;;  %v4190_v38 = vld [vmem:[%s6719_s2 + $0xac] sm:$0xf0]  ;;  %v4188_v40 = vld [vmem:[%s6719_s2 + $0xa4] sm:$0xf]  ;;  %v3551_v33 = vor.u32 %v4181_v30, %v3548_v32 }
 0x224   :  { %1582 = vmatpush.bf16.msra.mxu3 %v3599_v36  ;;  %v3571_v61 = vor.u32 %v4190_v38, %v3570_v37  ;;  %v4176_v36 = vld [vmem:[%s6719_s2 + $0x44] sm:$0xf]  ;;  %v3523_v37 = vor.u32 %v4178_v35, %v3522_v34  ;;  %v3524_v38 = vld [vmem:[%s6719_s2 + $0x50] sm:$0xf0]  ;;  %v3498_v27 = vld [vmem:[%s6719_s2 + $0x8] sm:$0xf] }
 0x225   :  { %4336 = vtanh.f32 %v5464_v41  ;;  %v1066_v42 = vadd.f32 0.5, %v1065_v11  ;;  %v3572_v11 = vld [vmem:[%s6719_s2 + $0xb0] sm:$0xf0]  ;;  %v3500_v32 = vld [vmem:[%s6719_s2 + $0x18] sm:$0xf0] }
 0x226   :  { %1544 = vmatpush.bf16.msra.mxu0 %v3571_v61  ;;  %v4179_v61 = vld [vmem:[%s6719_s2 + $0x54] sm:$0xf0]  ;;  %v3492_v26 = vld [vmem:[%s6719_s2 + $0x10] sm:$0xf0] }
 0x22b   :  { %v4337_v44 = vpop.eup %4336 }
 0x22c   :  { %v5467_v6 = vmul.f32 %v4337_v44, %v1066_v42  ;;  %v3578_v42 = vld [vmem:[%s6719_s2 + $0xa8] sm:$0xf]  ;;  %v4191_v44 = vld [vmem:[%s6719_s2 + $0xb4] sm:$0xf0] }
 0x22e   :  { %v2640_v45 = vrot.slane %v5467_v6, 1  ;;  %v2641_v46 = vrot.slane %v5467_v6, 2  ;;  %v2642_v48 = vrot.slane %v5467_v6, 3  ;;  %2654 = vst [vmem:[%s6721_s6 + $0x2] sm:$0x1] %v5467_v6  ;;  %v2643_v52 = vrot.slane %v5467_v6, 4 }
 0x22f   :  { %v1077_v58 = vpack.c.bf16 %v5467_v6, %v5467_v6  ;;  %v2644_v24 = vrot.slane %v5467_v6, 5  ;;  %v2645_v0 = vrot.slane %v5467_v6, 6  ;;  %v2646_v60 = vrot.slane %v5467_v6, 7 }
 0x230   :  { %2655 = vst [vmem:[%s6721_s6 + $0xa] sm:$0x1] %v2640_v45  ;;  %v3575_v45 = vor.u32 %v4188_v40, %v3572_v11  ;;  %v3530_v40 = vld [vmem:[%s6719_s2 + $0x48] sm:$0xf]  ;;  %v3527_v11 = vor.u32 %v4176_v36, %v3524_v38 }
 0x231   :  { %2656 = vst [vmem:[%s6721_s6 + $0x12] sm:$0x1] %v2641_v46  ;;  %1278 = vmatmul.bf16.vlgmr.msrb.gmra.mxu0 %v1077_v58  ;;  %1291 = vmatmul.bf16.vlgmr.msrb.gmra.mxu1 %v1077_v58  ;;  %v3579_v46 = vor.u32 %v4191_v44, %v3578_v42  ;;  %v3531_v42 = vor.u32 %v4179_v61, %v3530_v40  ;;  %v4177_v44 = vld [vmem:[%s6719_s2 + $0x4c] sm:$0xf] }
 0x232   :  { %2657 = vst [vmem:[%s6721_s6 + $0x1a] sm:$0x1] %v2642_v48  ;;  %1304 = vmatmul.bf16.vlgmr.msrb.gmra.mxu2 %v1077_v58  ;;  %1317 = vmatmul.bf16.vlgmr.msrb.gmra.mxu3 %v1077_v58  ;;  %v4189_v48 = vld [vmem:[%s6719_s2 + $0xac] sm:$0xf] }
 0x233   :  { %2658 = vst [vmem:[%s6721_s6 + $0x22] sm:$0x1] %v2643_v52  ;;  %v3580_v52 = vld [vmem:[%s6719_s2 + $0xb8] sm:$0xf0]  ;;  %1557 = vmatpush.bf16.msra.mxu1 %v3575_v45  ;;  %1570 = vmatpush.bf16.msra.mxu2 %v3579_v46 }
 0x234   :  { %2659 = vst [vmem:[%s6721_s6 + $0x2a] sm:$0x1] %v2644_v24  ;;  %v3583_v58 = vor.u32 %v4189_v48, %v3580_v52  ;;  %v3554_v24 = vld [vmem:[%s6719_s2 + $0x80] sm:$0xf]  ;;  %v3532_v45 = vld [vmem:[%s6719_s2 + $0x58] sm:$0xf0] }
 0x235   :  { %2660 = vst [vmem:[%s6721_s6 + $0x32] sm:$0x1] %v2645_v0  ;;  %v4186_v0 = vld [vmem:[%s6719_s2 + $0x8c] sm:$0xf0]  ;;  %v3535_v46 = vor.u32 %v4177_v44, %v3532_v45  ;;  %v3506_v48 = vld [vmem:[%s6719_s2 + $0x20] sm:$0xf] }
 0x236   :  { %2661 = vst [vmem:[%s6721_s6 + $0x3a] sm:$0x1] %v2646_v60  ;;  %v4184_v60 = vld [vmem:[%s6719_s2 + $0x84] sm:$0xf]  ;;  %1583 = vmatpush.bf16.msra.mxu3 %v3583_v58  ;;  %v3555_v55 = vor.u32 %v4186_v0, %v3554_v24  ;;  %v4174_v52 = vld [vmem:[%s6719_s2 + $0x2c] sm:$0xf0] }
 0x237   :  { %v3559_v8 = vor.u32 %v4184_v60, %v3556_v57  ;;  %1571 = vmatpush.bf16.msra.mxu2 %v3563_v3  ;;  %v4172_v58 = vld [vmem:[%s6719_s2 + $0x24] sm:$0xf]  ;;  %v3507_v24 = vor.u32 %v4174_v52, %v3506_v48  ;;  %v3508_v0 = vld [vmem:[%s6719_s2 + $0x30] sm:$0xf0]  ;;  %v3514_v60 = vld [vmem:[%s6719_s2 + $0x28] sm:$0xf]  ;;  %v124_v3 = vadd.f32 %v5146_v59, %v4869_v39 }
 0x238   :  { %1545 = vmatpush.bf16.msra.mxu0 %v3555_v55  ;;  %v4175_v55 = vld [vmem:[%s6719_s2 + $0x34] sm:$0xf0]  ;;  %v3511_v57 = vor.u32 %v4172_v58, %v3508_v0 }
 0x239   :  { %1558 = vmatpush.bf16.msra.mxu1 %v3559_v8  ;;  %v3515_v62 = vor.u32 %v4175_v55, %v3514_v60  ;;  %v3516_v8 = vld [vmem:[%s6719_s2 + $0x38] sm:$0xf0] }
 0x23a   :  { %1584 = vmatpush.bf16.msra.mxu3 %v3567_v43  ;;  %v3519_v9 = vor.u32 %v4173_v1, %v3516_v8 }
 0x23b   :  { %1572 = vmatpush.bf16.msra.mxu2 %v3547_v28  ;;  %v3495_v28 = vor.u32 %v4168_v7, %v3492_v26  ;;  %v4228_v26 = vld [vmem:[%s6719_s2 + $0xe4] sm:$0xf] }
 0x23c   :  { %1546 = vmatpush.bf16.msra.mxu0 %v3539_v18 }
 0x23d   :  { %1559 = vmatpush.bf16.msra.mxu1 %v3543_v63  ;;  %v4171_v63 = vld [vmem:[%s6719_s2 + $0x14] sm:$0xf0] }
 0x23e   :  { %1585 = vmatpush.bf16.msra.mxu3 %v3551_v33  ;;  %v3499_v30 = vor.u32 %v4171_v63, %v3498_v27  ;;  %v3732_v63 = vld [vmem:[%s6719_s2 + $0xf0] sm:$0xf0] }
 0x23f   :  { %1573 = vmatpush.bf16.msra.mxu2 %v3531_v42 }
 0x240   :  { %1547 = vmatpush.bf16.msra.mxu0 %v3523_v37 }
 0x241   :  { %1560 = vmatpush.bf16.msra.mxu1 %v3527_v11 }
 0x242   :  { %1586 = vmatpush.bf16.msra.mxu3 %v3535_v46 }
 0x243   :  { %1574 = vmatpush.bf16.msra.mxu2 %v3515_v62 }
 0x244   :  { %1548 = vmatpush.bf16.msra.mxu0 %v3507_v24 }
 0x245   :  { %1561 = vmatpush.bf16.msra.mxu1 %v3511_v57 }
 0x246   :  { %1587 = vmatpush.bf16.msra.mxu3 %v3519_v9 }
 0x247   :  { %1575 = vmatpush.bf16.msra.mxu2 %v3499_v30  ;;  %v4231_v30 = vld [vmem:[%s6719_s2 + $0xf4] sm:$0xf0] }
 0x248   :  { %1549 = vmatpush.bf16.msra.mxu0 %v3491_v19  ;;  %v4230_v19 = vld [vmem:[%s6719_s2 + $0xec] sm:$0xf0] }
 0x249   :  { %1562 = vmatpush.bf16.msra.mxu1 %v3495_v28  ;;  %v3738_v28 = vld [vmem:[%s6719_s2 + $0xe8] sm:$0xf] }
 0x2ae   :  { %v1279_v13 = vpop.f32.mrf.mxu0  ;;  %v1292_v43 = vpop.f32.mrf.mxu1 }
 0x2af   :  { %v1322_v18 = vadd.f32 %v1279_v13, %v124_v3  ;;  %v1323_v59 = vadd.f32 %v1292_v43, %v4743_v14  ;;  %v4169_v14 = vld [vmem:[%s6719_s2 + $0xc] sm:$0xf] }
 0x2b0   :  { %v3503_v35 = vor.u32 %v4169_v14, %v3500_v32  ;;  %v3735_v14 = vor.u32 %v4228_v26, %v3732_v63  ;;  %v3739_v32 = vor.u32 %v4231_v30, %v3738_v28  ;;  %v3692_v63 = vld [vmem:[%s6719_s2 + $0x98] sm:$0xf0]  ;;  %v3666_v30 = vld [vmem:[%s6719_s2 + $0x60] sm:$0xf] }
 0x2b1   :  { %v1326_v33 = vmul.f32 0.5, %v1322_v18  ;;  %v1330_v34 = vmul.f32 0.5, %v1323_v59  ;;  %v3730_v59 = vld [vmem:[%s6719_s2 + $0xe0] sm:$0xf] }
 0x2b2   :  { %1588 = vmatpush.bf16.msra.mxu3 %v3503_v35  ;;  %v3731_v27 = vor.u32 %v4230_v19, %v3730_v59  ;;  %1827 = vmatpush.bf16.msrb.mxu1 %v3735_v14  ;;  %v4219_v59 = vld [vmem:[%s6719_s2 + $0x94] sm:$0xf0]  ;;  %v4214_v14 = vld [vmem:[%s6719_s2 + $0x6c] sm:$0xf0] }
 0x2b3   :  { %4338 = vtanh.f32 %v1326_v33  ;;  %v4229_v33 = vld [vmem:[%s6719_s2 + $0xec] sm:$0xf]  ;;  %1840 = vmatpush.bf16.msrb.mxu2 %v3739_v32  ;;  %v4212_v32 = vld [vmem:[%s6719_s2 + $0x64] sm:$0xf] }
 0x2b4   :  { %4340 = vtanh.f32 %v1330_v34  ;;  %v3740_v34 = vld [vmem:[%s6719_s2 + $0xf8] sm:$0xf0]  ;;  %1814 = vmatpush.bf16.msrb.mxu0 %v3731_v27  ;;  %v4217_v27 = vld [vmem:[%s6719_s2 + $0x8c] sm:$0xf] }
 0x2b5   :  { %v1305_v36 = vpop.f32.mrf.mxu2  ;;  %v1318_v37 = vpop.f32.mrf.mxu3  ;;  %v3743_v35 = vor.u32 %v4229_v33, %v3740_v34  ;;  %v3695_v28 = vor.u32 %v4217_v27, %v3692_v63  ;;  %v3667_v33 = vor.u32 %v4214_v14, %v3666_v30  ;;  %v3668_v34 = vld [vmem:[%s6719_s2 + $0x70] sm:$0xf0]  ;;  %v3618_v27 = vld [vmem:[%s6719_s2] sm:$0xf]  ;;  %v4202_v63 = vld [vmem:[%s6719_s2 + $0xc] sm:$0xf0] }
 0x2b6   :  { %v1324_v38 = vadd.f32 %v1305_v36, %v4731_v4  ;;  %v1325_v40 = vadd.f32 %v1318_v37, %v4755_v20  ;;  %v1281_v61 = vpop.f32.mrf.mxu0  ;;  %v1294_v11 = vpop.f32.mrf.mxu1  ;;  %v3714_v36 = vld [vmem:[%s6719_s2 + $0xc0] sm:$0xf]  ;;  %v4226_v37 = vld [vmem:[%s6719_s2 + $0xcc] sm:$0xf0]  ;;  %v3619_v14 = vor.u32 %v4202_v63, %v3618_v27 }
 0x2b7   :  { %1853 = vmatpush.bf16.msrb.mxu3 %v3743_v35  ;;  %v3716_v61 = vld [vmem:[%s6719_s2 + $0xd0] sm:$0xf0]  ;;  %v3722_v11 = vld [vmem:[%s6719_s2 + $0xc8] sm:$0xf]  ;;  %v3858_v63 = vld [vmem:[%s6719_s2 + $0xe0] sm:$0xf] }
 0x2b8   :  { %4342 = vtanh.f32 %v1324_v38  ;;  %v1335_v42 = vmul.f32 0.5, %v1325_v40  ;;  %v4224_v38 = vld [vmem:[%s6719_s2 + $0xc4] sm:$0xf]  ;;  %v3715_v40 = vor.u32 %v4226_v37, %v3714_v36  ;;  %v3674_v35 = vld [vmem:[%s6719_s2 + $0x68] sm:$0xf]  ;;  %v3671_v37 = vor.u32 %v4212_v32, %v3668_v34 }
 0x2b9   :  { %v4339_v44 = vpop.eup %4338  ;;  %v4215_v36 = vld [vmem:[%s6719_s2 + $0x74] sm:$0xf0]  ;;  %v3620_v32 = vld [vmem:[%s6719_s2 + $0x10] sm:$0xf0] }
 0x2ba   :  { %v4341_v45 = vpop.eup %4340  ;;  %v1328_v46 = vmul.f32 0.5, %v4339_v44  ;;  %4344 = vtanh.f32 %v1335_v42  ;;  %v4227_v42 = vld [vmem:[%s6719_s2 + $0xd4] sm:$0xf0]  ;;  %v3719_v44 = vor.u32 %v4224_v38, %v3716_v61  ;;  %1815 = vmatpush.bf16.msrb.mxu0 %v3715_v40  ;;  %v3675_v38 = vor.u32 %v4215_v36, %v3674_v35  ;;  %v4213_v40 = vld [vmem:[%s6719_s2 + $0x6c] sm:$0xf] }
 0x2bb   :  { %v1332_v48 = vmul.f32 0.5, %v4341_v45  ;;  %v3723_v45 = vor.u32 %v4227_v42, %v3722_v11  ;;  %v3676_v61 = vld [vmem:[%s6719_s2 + $0x78] sm:$0xf0]  ;;  %v3650_v42 = vld [vmem:[%s6719_s2 + $0x40] sm:$0xf] }
 0x2bc   :  { %v1329_v52 = vadd.f32 0.5, %v1328_v46  ;;  %v4225_v46 = vld [vmem:[%s6719_s2 + $0xcc] sm:$0xf]  ;;  %1828 = vmatpush.bf16.msrb.mxu1 %v3719_v44  ;;  %v3679_v11 = vor.u32 %v4213_v40, %v3676_v61  ;;  %v4210_v44 = vld [vmem:[%s6719_s2 + $0x4c] sm:$0xf0] }
 0x2bd   :  { %v1333_v58 = vadd.f32 0.5, %v1332_v48  ;;  %v1307_v24 = vpop.f32.mrf.mxu2  ;;  %v1320_v0 = vpop.f32.mrf.mxu3  ;;  %v3724_v48 = vld [vmem:[%s6719_s2 + $0xd8] sm:$0xf0]  ;;  %1841 = vmatpush.bf16.msrb.mxu2 %v3723_v45  ;;  %v4208_v45 = vld [vmem:[%s6719_s2 + $0x44] sm:$0xf] }
 0x2be   :  { %v4343_v60 = vpop.eup %4342  ;;  %v4222_v24 = vld [vmem:[%s6719_s2 + $0xac] sm:$0xf0]  ;;  %v4220_v0 = vld [vmem:[%s6719_s2 + $0xa4] sm:$0xf]  ;;  %v4203_v34 = vld [vmem:[%s6719_s2 + $0x14] sm:$0xf0] }
 0x2bf   :  { %v1339_v55 = vmul.f32 %v1333_v58, %v5464_v41  ;;  %v1340_v57 = vmul.f32 %v4343_v60, %v1329_v52  ;;  %v3727_v52 = vor.u32 %v4225_v46, %v3724_v48  ;;  %v3698_v58 = vld [vmem:[%s6719_s2 + $0xa0] sm:$0xf]  ;;  %v3651_v46 = vor.u32 %v4210_v44, %v3650_v42  ;;  %v3652_v48 = vld [vmem:[%s6719_s2 + $0x50] sm:$0xf0] }
 0x2c0   :  { %v4345_v4 = vpop.eup %4344  ;;  %v3699_v60 = vor.u32 %v4222_v24, %v3698_v58  ;;  %v4211_v58 = vld [vmem:[%s6719_s2 + $0x54] sm:$0xf0]  ;;  %v3655_v24 = vor.u32 %v4208_v45, %v3652_v48 }
 0x2c1   :  { %v5701_v62 = vadd.f32 %v1340_v57, %v1339_v55  ;;  %v1337_v20 = vmul.f32 0.5, %v4345_v4  ;;  %1854 = vmatpush.bf16.msrb.mxu3 %v3727_v52  ;;  %v3700_v55 = vld [vmem:[%s6719_s2 + $0xb0] sm:$0xf0]  ;;  %v3706_v57 = vld [vmem:[%s6719_s2 + $0xa8] sm:$0xf] }
 0x2c2   :  { %v4223_v4 = vld [vmem:[%s6719_s2 + $0xb4] sm:$0xf0]  ;;  %1816 = vmatpush.bf16.msrb.mxu0 %v3699_v60  ;;  %v3658_v52 = vld [vmem:[%s6719_s2 + $0x48] sm:$0xf]  ;;  %v4209_v60 = vld [vmem:[%s6719_s2 + $0x4c] sm:$0xf] }
 0x2c3   :  { %4346 = vtanh.f32 %v5701_v62  ;;  %v1338_v1 = vadd.f32 0.5, %v1337_v20  ;;  %v3703_v20 = vor.u32 %v4220_v0, %v3700_v55  ;;  %v3659_v0 = vor.u32 %v4211_v58, %v3658_v52  ;;  %v3660_v55 = vld [vmem:[%s6719_s2 + $0x58] sm:$0xf0] }
 0x2c5   :  { %1829 = vmatpush.bf16.msrb.mxu1 %v3703_v20  ;;  %v4206_v20 = vld [vmem:[%s6719_s2 + $0x2c] sm:$0xf0] }
 0x2c9   :  { %v4347_v8 = vpop.eup %4346 }
 0x2ca   :  { %v5704_v3 = vmul.f32 %v4347_v8, %v1338_v1  ;;  %v3707_v1 = vor.u32 %v4223_v4, %v3706_v57  ;;  %v4221_v8 = vld [vmem:[%s6719_s2 + $0xac] sm:$0xf]  ;;  %v3663_v57 = vor.u32 %v4209_v60, %v3660_v55  ;;  %v3634_v4 = vld [vmem:[%s6719_s2 + $0x20] sm:$0xf] }
 0x2cc   :  { %v2687_v9 = vrot.slane %v5704_v3, 1  ;;  %v2688_v13 = vrot.slane %v5704_v3, 2  ;;  %v2689_v43 = vrot.slane %v5704_v3, 3  ;;  %2701 = vst [vmem:[%s6721_s6 + $0x3] sm:$0x1] %v5704_v3  ;;  %v2690_v41 = vrot.slane %v5704_v3, 4  ;;  %1842 = vmatpush.bf16.msrb.mxu2 %v3707_v1 }
 0x2cd   :  { %v1349_v56 = vpack.c.bf16 %v5704_v3, %v5704_v3  ;;  %v2691_v17 = vrot.slane %v5704_v3, 5  ;;  %v2692_v7 = vrot.slane %v5704_v3, 6  ;;  %v2693_v18 = vrot.slane %v5704_v3, 7  ;;  %v4204_v1 = vld [vmem:[%s6719_s2 + $0x24] sm:$0xf] }
 0x2ce   :  { %2702 = vst [vmem:[%s6721_s6 + $0xb] sm:$0x1] %v2687_v9  ;;  %v3708_v9 = vld [vmem:[%s6719_s2 + $0xb8] sm:$0xf0] }
 0x2cf   :  { %2703 = vst [vmem:[%s6721_s6 + $0x13] sm:$0x1] %v2688_v13  ;;  %1550 = vmatmul.bf16.vlgmr.msra.gmra.mxu0 %v1349_v56  ;;  %1563 = vmatmul.bf16.vlgmr.msra.gmra.mxu1 %v1349_v56  ;;  %v3711_v13 = vor.u32 %v4221_v8, %v3708_v9  ;;  %v3635_v8 = vor.u32 %v4206_v20, %v3634_v4  ;;  %v3636_v9 = vld [vmem:[%s6719_s2 + $0x30] sm:$0xf0] }
 0x2d0   :  { %2704 = vst [vmem:[%s6721_s6 + $0x1b] sm:$0x1] %v2689_v43  ;;  %1576 = vmatmul.bf16.vlgmr.msra.gmra.mxu2 %v1349_v56  ;;  %1589 = vmatmul.bf16.vlgmr.msra.gmra.mxu3 %v1349_v56  ;;  %v3682_v43 = vld [vmem:[%s6719_s2 + $0x80] sm:$0xf]  ;;  %v4216_v56 = vld [vmem:[%s6719_s2 + $0x84] sm:$0xf] }
 0x2d1   :  { %2705 = vst [vmem:[%s6721_s6 + $0x23] sm:$0x1] %v2690_v41  ;;  %v4218_v41 = vld [vmem:[%s6719_s2 + $0x8c] sm:$0xf0]  ;;  %1855 = vmatpush.bf16.msrb.mxu3 %v3711_v13  ;;  %v3642_v13 = vld [vmem:[%s6719_s2 + $0x28] sm:$0xf] }
 0x2d2   :  { %2706 = vst [vmem:[%s6721_s6 + $0x2b] sm:$0x1] %v2691_v17  ;;  %v3683_v17 = vor.u32 %v4218_v41, %v3682_v43  ;;  %v4207_v43 = vld [vmem:[%s6719_s2 + $0x34] sm:$0xf0]  ;;  %v3639_v41 = vor.u32 %v4204_v1, %v3636_v9 }
 0x2d3   :  { %2707 = vst [vmem:[%s6721_s6 + $0x33] sm:$0x1] %v2692_v7  ;;  %v3684_v7 = vld [vmem:[%s6719_s2 + $0x90] sm:$0xf0] }
 0x2d4   :  { %2708 = vst [vmem:[%s6721_s6 + $0x3b] sm:$0x1] %v2693_v18  ;;  %v3690_v18 = vld [vmem:[%s6719_s2 + $0x88] sm:$0xf]  ;;  %v3687_v19 = vor.u32 %v4216_v56, %v3684_v7  ;;  %1817 = vmatpush.bf16.msrb.mxu0 %v3683_v17  ;;  %v3643_v56 = vor.u32 %v4207_v43, %v3642_v13  ;;  %v4205_v17 = vld [vmem:[%s6719_s2 + $0x2c] sm:$0xf] }
 0x2d5   :  { %v3691_v26 = vor.u32 %v4219_v59, %v3690_v18  ;;  %1856 = vmatpush.bf16.msrb.mxu3 %v3695_v28  ;;  %v3644_v7 = vld [vmem:[%s6719_s2 + $0x38] sm:$0xf0]  ;;  %v127_v18 = vadd.f32 %v4691_v50, %v4869_v39  ;;  %v4200_v28 = vld [vmem:[%s6719_s2 + $0x4] sm:$0xf] }
 0x2d6   :  { %1830 = vmatpush.bf16.msrb.mxu1 %v3687_v19  ;;  %v3647_v59 = vor.u32 %v4205_v17, %v3644_v7  ;;  %v3623_v35 = vor.u32 %v4200_v28, %v3620_v32  ;;  %v4262_v28 = vld [vmem:[%s6719_s2 + $0xec] sm:$0xf0]  ;;  %v3866_v32 = vld [vmem:[%s6719_s2 + $0xe8] sm:$0xf] }
 0x2d7   :  { %1843 = vmatpush.bf16.msrb.mxu2 %v3691_v26 }
 0x2d8   :  { %1818 = vmatpush.bf16.msrb.mxu0 %v3667_v33  ;;  %v3626_v33 = vld [vmem:[%s6719_s2 + $0x8] sm:$0xf] }
 0x2d9   :  { %1857 = vmatpush.bf16.msrb.mxu3 %v3679_v11  ;;  %v3627_v36 = vor.u32 %v4203_v34, %v3626_v33  ;;  %v4263_v33 = vld [vmem:[%s6719_s2 + $0xf4] sm:$0xf0] }
 0x2da   :  { %1831 = vmatpush.bf16.msrb.mxu1 %v3671_v37  ;;  %v3628_v37 = vld [vmem:[%s6719_s2 + $0x18] sm:$0xf0] }
 0x2db   :  { %1844 = vmatpush.bf16.msrb.mxu2 %v3675_v38 }
 0x2dc   :  { %1819 = vmatpush.bf16.msrb.mxu0 %v3651_v46 }
 0x2dd   :  { %1858 = vmatpush.bf16.msrb.mxu3 %v3663_v57 }
 0x2de   :  { %1832 = vmatpush.bf16.msrb.mxu1 %v3655_v24 }
 0x2df   :  { %1845 = vmatpush.bf16.msrb.mxu2 %v3659_v0 }
 0x2e0   :  { %1820 = vmatpush.bf16.msrb.mxu0 %v3635_v8 }
 0x2e1   :  { %1859 = vmatpush.bf16.msrb.mxu3 %v3647_v59 }
 0x2e2   :  { %1833 = vmatpush.bf16.msrb.mxu1 %v3639_v41 }
 0x2e3   :  { %1846 = vmatpush.bf16.msrb.mxu2 %v3643_v56 }
 0x2e4   :  { %1821 = vmatpush.bf16.msrb.mxu0 %v3619_v14  ;;  %v3860_v14 = vld [vmem:[%s6719_s2 + $0xf0] sm:$0xf0] }
 0x2e6   :  { %1834 = vmatpush.bf16.msrb.mxu1 %v3623_v35  ;;  %v3867_v35 = vor.u32 %v4263_v33, %v3866_v32  ;;  %v4244_v32 = vld [vmem:[%s6719_s2 + $0x64] sm:$0xf] }
 0x2e7   :  { %1847 = vmatpush.bf16.msrb.mxu2 %v3627_v36  ;;  %v4261_v36 = vld [vmem:[%s6719_s2 + $0xec] sm:$0xf] }
 0x2eb   :  { %2112 = vmatpush.bf16.msra.mxu2 %v3867_v35  ;;  %v3802_v35 = vld [vmem:[%s6719_s2 + $0x68] sm:$0xf] }
 0x34c   :  { %v1551_v19 = vpop.f32.mrf.mxu0  ;;  %v1564_v26 = vpop.f32.mrf.mxu1 }
 0x34d   :  { %v1594_v30 = vadd.f32 %v1551_v19, %v127_v18  ;;  %v1595_v50 = vadd.f32 %v1564_v26, %v4776_v31  ;;  %v4201_v31 = vld [vmem:[%s6719_s2 + $0xc] sm:$0xf] }
 0x34e   :  { %v3631_v61 = vor.u32 %v4201_v31, %v3628_v37  ;;  %v3868_v31 = vld [vmem:[%s6719_s2 + $0xf8] sm:$0xf0] }
 0x34f   :  { %v1598_v38 = vmul.f32 0.5, %v1594_v30  ;;  %v1602_v40 = vmul.f32 0.5, %v1595_v50  ;;  %v4260_v30 = vld [vmem:[%s6719_s2 + $0xe4] sm:$0xf]  ;;  %v3859_v50 = vor.u32 %v4262_v28, %v3858_v63  ;;  %v3871_v37 = vor.u32 %v4261_v36, %v3868_v31  ;;  %v4249_v63 = vld [vmem:[%s6719_s2 + $0x8c] sm:$0xf] }
 0x350   :  { %1860 = vmatpush.bf16.msrb.mxu3 %v3631_v61  ;;  %v3863_v34 = vor.u32 %v4260_v30, %v3860_v14  ;;  %v4256_v61 = vld [vmem:[%s6719_s2 + $0xc4] sm:$0xf]  ;;  %v3820_v28 = vld [vmem:[%s6719_s2 + $0x98] sm:$0xf0]  ;;  %v4246_v14 = vld [vmem:[%s6719_s2 + $0x6c] sm:$0xf0] }
 0x351   :  { %4348 = vtanh.f32 %v1598_v38  ;;  %2086 = vmatpush.bf16.msra.mxu0 %v3859_v50  ;;  %v3842_v38 = vld [vmem:[%s6719_s2 + $0xc0] sm:$0xf]  ;;  %v3823_v30 = vor.u32 %v4249_v63, %v3820_v28  ;;  %v4247_v36 = vld [vmem:[%s6719_s2 + $0x74] sm:$0xf0] }
 0x352   :  { %4350 = vtanh.f32 %v1602_v40  ;;  %2099 = vmatpush.bf16.msra.mxu1 %v3863_v34  ;;  %v4258_v40 = vld [vmem:[%s6719_s2 + $0xcc] sm:$0xf0]  ;;  %v3794_v50 = vld [vmem:[%s6719_s2 + $0x60] sm:$0xf]  ;;  %v3796_v34 = vld [vmem:[%s6719_s2 + $0x70] sm:$0xf0] }
 0x353   :  { %v1577_v11 = vpop.f32.mrf.mxu2  ;;  %v1590_v42 = vpop.f32.mrf.mxu3  ;;  %v3795_v33 = vor.u32 %v4246_v14, %v3794_v50  ;;  %v3799_v31 = vor.u32 %v4244_v32, %v3796_v34  ;;  %v3754_v50 = vld [vmem:[%s6719_s2 + $0x8] sm:$0xf]  ;;  %v4235_v14 = vld [vmem:[%s6719_s2 + $0x14] sm:$0xf0]  ;;  %v3756_v34 = vld [vmem:[%s6719_s2 + $0x18] sm:$0xf0] }
 0x354   :  { %v1596_v44 = vadd.f32 %v1577_v11, %v4740_v12  ;;  %v1597_v45 = vadd.f32 %v1590_v42, %v4803_v47  ;;  %v1553_v46 = vpop.f32.mrf.mxu0  ;;  %v1566_v48 = vpop.f32.mrf.mxu1  ;;  %2125 = vmatpush.bf16.msra.mxu3 %v3871_v37  ;;  %v3843_v11 = vor.u32 %v4258_v40, %v3842_v38  ;;  %v3844_v42 = vld [vmem:[%s6719_s2 + $0xd0] sm:$0xf0]  ;;  %v3803_v37 = vor.u32 %v4247_v36, %v3802_v35  ;;  %v4245_v38 = vld [vmem:[%s6719_s2 + $0x6c] sm:$0xf]  ;;  %v3804_v40 = vld [vmem:[%s6719_s2 + $0x78] sm:$0xf0] }
 0x355   :  { %v3847_v46 = vor.u32 %v4256_v61, %v3844_v42  ;;  %v3807_v61 = vor.u32 %v4245_v38, %v3804_v40  ;;  %v4242_v42 = vld [vmem:[%s6719_s2 + $0x4c] sm:$0xf0]  ;;  %v3970_v40 = vld [vmem:[%s6719_s2 + $0xc0] sm:$0xf] }
 0x356   :  { %4352 = vtanh.f32 %v1596_v44  ;;  %v1607_v52 = vmul.f32 0.5, %v1597_v45  ;;  %v3850_v44 = vld [vmem:[%s6719_s2 + $0xc8] sm:$0xf]  ;;  %v4259_v45 = vld [vmem:[%s6719_s2 + $0xd4] sm:$0xf0]  ;;  %2087 = vmatpush.bf16.msra.mxu0 %v3843_v11 }
 0x357   :  { %v4349_v58 = vpop.eup %4348  ;;  %v3851_v48 = vor.u32 %v4259_v45, %v3850_v44  ;;  %2100 = vmatpush.bf16.msra.mxu1 %v3847_v46  ;;  %v3778_v11 = vld [vmem:[%s6719_s2 + $0x40] sm:$0xf]  ;;  %v4240_v44 = vld [vmem:[%s6719_s2 + $0x44] sm:$0xf]  ;;  %v3780_v46 = vld [vmem:[%s6719_s2 + $0x50] sm:$0xf0] }
 0x358   :  { %v4351_v24 = vpop.eup %4350  ;;  %v1600_v0 = vmul.f32 0.5, %v4349_v58  ;;  %4354 = vtanh.f32 %v1607_v52  ;;  %v4257_v52 = vld [vmem:[%s6719_s2 + $0xcc] sm:$0xf]  ;;  %v3852_v58 = vld [vmem:[%s6719_s2 + $0xd8] sm:$0xf0]  ;;  %v3779_v45 = vor.u32 %v4242_v42, %v3778_v11 }
 0x359   :  { %v1604_v60 = vmul.f32 0.5, %v4351_v24  ;;  %v3855_v24 = vor.u32 %v4257_v52, %v3852_v58  ;;  %2113 = vmatpush.bf16.msra.mxu2 %v3851_v48  ;;  %v3786_v48 = vld [vmem:[%s6719_s2 + $0x48] sm:$0xf]  ;;  %v4243_v52 = vld [vmem:[%s6719_s2 + $0x54] sm:$0xf0]  ;;  %v3783_v58 = vor.u32 %v4240_v44, %v3780_v46 }
 0x35a   :  { %v1601_v55 = vadd.f32 0.5, %v1600_v0  ;;  %v3826_v0 = vld [vmem:[%s6719_s2 + $0xa0] sm:$0xf]  ;;  %v4294_v38 = vld [vmem:[%s6719_s2 + $0xec] sm:$0xf0] }
 0x35b   :  { %v1605_v57 = vadd.f32 0.5, %v1604_v60  ;;  %v1579_v4 = vpop.f32.mrf.mxu2  ;;  %v1592_v20 = vpop.f32.mrf.mxu3  ;;  %2126 = vmatpush.bf16.msra.mxu3 %v3855_v24  ;;  %v4254_v60 = vld [vmem:[%s6719_s2 + $0xac] sm:$0xf0]  ;;  %v3787_v24 = vor.u32 %v4243_v52, %v3786_v48 }
 0x35c   :  { %v4353_v1 = vpop.eup %4352  ;;  %v3828_v4 = vld [vmem:[%s6719_s2 + $0xb0] sm:$0xf0]  ;;  %v3834_v20 = vld [vmem:[%s6719_s2 + $0xa8] sm:$0xf]  ;;  %v4290_v44 = vld [vmem:[%s6719_s2 + $0xcc] sm:$0xf0] }
 0x35d   :  { %v1611_v8 = vmul.f32 %v1605_v57, %v5701_v62  ;;  %v1612_v9 = vmul.f32 %v4353_v1, %v1601_v55  ;;  %v4252_v55 = vld [vmem:[%s6719_s2 + $0xa4] sm:$0xf]  ;;  %v3827_v57 = vor.u32 %v4254_v60, %v3826_v0  ;;  %v4255_v1 = vld [vmem:[%s6719_s2 + $0xb4] sm:$0xf0]  ;;  %v4241_v0 = vld [vmem:[%s6719_s2 + $0x4c] sm:$0xf] }
 0x35e   :  { %v4355_v12 = vpop.eup %4354  ;;  %v3788_v60 = vld [vmem:[%s6719_s2 + $0x58] sm:$0xf0] }
 0x35f   :  { %v5938_v13 = vadd.f32 %v1612_v9, %v1611_v8  ;;  %v1609_v47 = vmul.f32 0.5, %v4355_v12  ;;  %v3831_v8 = vor.u32 %v4252_v55, %v3828_v4  ;;  %v3835_v9 = vor.u32 %v4255_v1, %v3834_v20  ;;  %v4253_v12 = vld [vmem:[%s6719_s2 + $0xac] sm:$0xf]  ;;  %2088 = vmatpush.bf16.msra.mxu0 %v3827_v57  ;;  %v3762_v57 = vld [vmem:[%s6719_s2 + $0x20] sm:$0xf] }
 0x360   :  { %v3791_v55 = vor.u32 %v4241_v0, %v3788_v60  ;;  %v4238_v4 = vld [vmem:[%s6719_s2 + $0x2c] sm:$0xf0]  ;;  %v4236_v20 = vld [vmem:[%s6719_s2 + $0x24] sm:$0xf]  ;;  %v3954_v0 = vld [vmem:[%s6719_s2 + $0xa0] sm:$0xf] }
 0x361   :  { %4356 = vtanh.f32 %v5938_v13  ;;  %v1610_v43 = vadd.f32 0.5, %v1609_v47  ;;  %v3836_v47 = vld [vmem:[%s6719_s2 + $0xb8] sm:$0xf0]  ;;  %2101 = vmatpush.bf16.msra.mxu1 %v3831_v8  ;;  %2114 = vmatpush.bf16.msra.mxu2 %v3835_v9  ;;  %v3763_v1 = vor.u32 %v4238_v4, %v3762_v57  ;;  %v3764_v8 = vld [vmem:[%s6719_s2 + $0x30] sm:$0xf0] }
 0x362   :  { %v3770_v9 = vld [vmem:[%s6719_s2 + $0x28] sm:$0xf]  ;;  %v4286_v60 = vld [vmem:[%s6719_s2 + $0xac] sm:$0xf0] }
 0x367   :  { %v4357_v41 = vpop.eup %4356 }
 0x368   :  { %v5941_v56 = vmul.f32 %v4357_v41, %v1610_v43  ;;  %v3839_v43 = vor.u32 %v4253_v12, %v3836_v47  ;;  %v3810_v41 = vld [vmem:[%s6719_s2 + $0x80] sm:$0xf]  ;;  %v4239_v12 = vld [vmem:[%s6719_s2 + $0x34] sm:$0xf0]  ;;  %v3767_v47 = vor.u32 %v4236_v20, %v3764_v8  ;;  %v4282_v8 = vld [vmem:[%s6719_s2 + $0x8c] sm:$0xf0] }
 0x36a   :  { %v2734_v17 = vrot.slane %v5941_v56, 1  ;;  %v2735_v7 = vrot.slane %v5941_v56, 2  ;;  %v2736_v18 = vrot.slane %v5941_v56, 3  ;;  %2748 = vst [vmem:[%s6721_s6 + $0x4] sm:$0x1] %v5941_v56  ;;  %v2737_v62 = vrot.slane %v5941_v56, 4  ;;  %2127 = vmatpush.bf16.msra.mxu3 %v3839_v43 }
 0x36b   :  { %v1621_v59 = vpack.c.bf16 %v5941_v56, %v5941_v56  ;;  %v2738_v19 = vrot.slane %v5941_v56, 5  ;;  %v2739_v26 = vrot.slane %v5941_v56, 6  ;;  %v2740_v27 = vrot.slane %v5941_v56, 7 }
 0x36c   :  { %2749 = vst [vmem:[%s6721_s6 + $0xc] sm:$0x1] %v2734_v17  ;;  %v4250_v17 = vld [vmem:[%s6719_s2 + $0x8c] sm:$0xf0]  ;;  %v3771_v43 = vor.u32 %v4239_v12, %v3770_v9 }
 0x36d   :  { %2750 = vst [vmem:[%s6721_s6 + $0x14] sm:$0x1] %v2735_v7  ;;  %1822 = vmatmul.bf16.vlgmr.msrb.gmra.mxu0 %v1621_v59  ;;  %1835 = vmatmul.bf16.vlgmr.msrb.gmra.mxu1 %v1621_v59  ;;  %v4248_v7 = vld [vmem:[%s6719_s2 + $0x84] sm:$0xf] }
 0x36e   :  { %2751 = vst [vmem:[%s6721_s6 + $0x1c] sm:$0x1] %v2736_v18  ;;  %1848 = vmatmul.bf16.vlgmr.msrb.gmra.mxu2 %v1621_v59  ;;  %1861 = vmatmul.bf16.vlgmr.msrb.gmra.mxu3 %v1621_v59  ;;  %v3811_v18 = vor.u32 %v4250_v17, %v3810_v41  ;;  %v3818_v59 = vld [vmem:[%s6719_s2 + $0x88] sm:$0xf]  ;;  %v4237_v41 = vld [vmem:[%s6719_s2 + $0x2c] sm:$0xf] }
 0x36f   :  { %2752 = vst [vmem:[%s6721_s6 + $0x24] sm:$0x1] %v2737_v62  ;;  %v3812_v62 = vld [vmem:[%s6719_s2 + $0x90] sm:$0xf0]  ;;  %2128 = vmatpush.bf16.msra.mxu3 %v3823_v30  ;;  %v3772_v17 = vld [vmem:[%s6719_s2 + $0x38] sm:$0xf0] }
 0x370   :  { %2753 = vst [vmem:[%s6721_s6 + $0x2c] sm:$0x1] %v2738_v19  ;;  %v4251_v19 = vld [vmem:[%s6719_s2 + $0x94] sm:$0xf0]  ;;  %2089 = vmatpush.bf16.msra.mxu0 %v3811_v18  ;;  %v3775_v18 = vor.u32 %v4237_v41, %v3772_v17  ;;  %v3748_v30 = vld [vmem:[%s6719_s2 + $0x10] sm:$0xf0] }
 0x371   :  { %2754 = vst [vmem:[%s6721_s6 + $0x34] sm:$0x1] %v2739_v26  ;;  %v3815_v26 = vor.u32 %v4248_v7, %v3812_v62  ;;  %v129_v7 = vadd.f32 %v4697_v53, %v4869_v39 }
 0x372   :  { %2755 = vst [vmem:[%s6721_s6 + $0x3c] sm:$0x1] %v2740_v27  ;;  %v3819_v27 = vor.u32 %v4251_v19, %v3818_v59  ;;  %v3746_v19 = vld [vmem:[%s6719_s2] sm:$0xf] }
 0x373   :  { %2102 = vmatpush.bf16.msra.mxu1 %v3815_v26  ;;  %2129 = vmatpush.bf16.msra.mxu3 %v3807_v61  ;;  %v4234_v26 = vld [vmem:[%s6719_s2 + $0xc] sm:$0xf0] }
 0x374   :  { %2115 = vmatpush.bf16.msra.mxu2 %v3819_v27  ;;  %2090 = vmatpush.bf16.msra.mxu0 %v3795_v33  ;;  %v4232_v27 = vld [vmem:[%s6719_s2 + $0x4] sm:$0xf]  ;;  %v3747_v28 = vor.u32 %v4234_v26, %v3746_v19  ;;  %v3755_v33 = vor.u32 %v4235_v14, %v3754_v50 }
 0x375   :  { %v3751_v32 = vor.u32 %v4232_v27, %v3748_v30 }
 0x377   :  { %2103 = vmatpush.bf16.msra.mxu1 %v3799_v31  ;;  %2130 = vmatpush.bf16.msra.mxu3 %v3791_v55 }
 0x378   :  { %2116 = vmatpush.bf16.msra.mxu2 %v3803_v37  ;;  %2091 = vmatpush.bf16.msra.mxu0 %v3779_v45  ;;  %v3986_v37 = vld [vmem:[%s6719_s2 + $0xe0] sm:$0xf] }
 0x379   :  { %v3987_v42 = vor.u32 %v4294_v38, %v3986_v37  ;;  %v3996_v37 = vld [vmem:[%s6719_s2 + $0xf8] sm:$0xf0] }
 0x37b   :  { %2104 = vmatpush.bf16.msra.mxu1 %v3783_v58  ;;  %2131 = vmatpush.bf16.msra.mxu3 %v3775_v18  ;;  %v3971_v58 = vor.u32 %v4290_v44, %v3970_v40  ;;  %v4288_v44 = vld [vmem:[%s6719_s2 + $0xc4] sm:$0xf] }
 0x37c   :  { %2117 = vmatpush.bf16.msra.mxu2 %v3787_v24  ;;  %2092 = vmatpush.bf16.msra.mxu0 %v3763_v1  ;;  %v3938_v1 = vld [vmem:[%s6719_s2 + $0x80] sm:$0xf] }
 0x37f   :  { %2105 = vmatpush.bf16.msra.mxu1 %v3767_v47 }
 0x380   :  { %2118 = vmatpush.bf16.msra.mxu2 %v3771_v43  ;;  %2093 = vmatpush.bf16.msra.mxu0 %v3747_v28 }
 0x383   :  { %2106 = vmatpush.bf16.msra.mxu1 %v3751_v32 }
 0x384   :  { %2119 = vmatpush.bf16.msra.mxu2 %v3755_v33  ;;  %2358 = vmatpush.bf16.msrb.mxu0 %v3987_v42  ;;  %v4292_v33 = vld [vmem:[%s6719_s2 + $0xe4] sm:$0xf] }
 0x388   :  { %2359 = vmatpush.bf16.msrb.mxu0 %v3971_v58  ;;  %v4289_v58 = vld [vmem:[%s6719_s2 + $0xcc] sm:$0xf] }
 0x3ea   :  { %v1823_v62 = vpop.f32.mrf.mxu0  ;;  %v1836_v59 = vpop.f32.mrf.mxu1 }
 0x3eb   :  { %v1866_v63 = vadd.f32 %v1823_v62, %v129_v7  ;;  %v1867_v53 = vadd.f32 %v1836_v59, %v4809_v49  ;;  %v4233_v49 = vld [vmem:[%s6719_s2 + $0xc] sm:$0xf]  ;;  %v3939_v7 = vor.u32 %v4282_v8, %v3938_v1  ;;  %v4287_v8 = vld [vmem:[%s6719_s2 + $0xb4] sm:$0xf0] }
 0x3ec   :  { %v3759_v31 = vor.u32 %v4233_v49, %v3756_v34  ;;  %v3988_v49 = vld [vmem:[%s6719_s2 + $0xf0] sm:$0xf0]  ;;  %v3994_v34 = vld [vmem:[%s6719_s2 + $0xe8] sm:$0xf] }
 0x3ed   :  { %v1870_v35 = vmul.f32 0.5, %v1866_v63  ;;  %v1874_v36 = vmul.f32 0.5, %v1867_v53 }
 0x3ee   :  { %2132 = vmatpush.bf16.msra.mxu3 %v3759_v31  ;;  %v4293_v31 = vld [vmem:[%s6719_s2 + $0xec] sm:$0xf] }
 0x3ef   :  { %4358 = vtanh.f32 %v1870_v35  ;;  %v3991_v35 = vor.u32 %v4292_v33, %v3988_v49  ;;  %v3999_v40 = vor.u32 %v4293_v31, %v3996_v37  ;;  %v4276_v33 = vld [vmem:[%s6719_s2 + $0x64] sm:$0xf]  ;;  %v3924_v49 = vld [vmem:[%s6719_s2 + $0x70] sm:$0xf0]  ;;  %v4277_v31 = vld [vmem:[%s6719_s2 + $0x6c] sm:$0xf] }
 0x3f0   :  { %4360 = vtanh.f32 %v1874_v36  ;;  %v4295_v36 = vld [vmem:[%s6719_s2 + $0xf4] sm:$0xf0]  ;;  %v3932_v37 = vld [vmem:[%s6719_s2 + $0x78] sm:$0xf0] }
 0x3f1   :  { %v1849_v61 = vpop.f32.mrf.mxu2  ;;  %v1862_v11 = vpop.f32.mrf.mxu3  ;;  %v3995_v38 = vor.u32 %v4295_v36, %v3994_v34  ;;  %2371 = vmatpush.bf16.msrb.mxu1 %v3991_v35  ;;  %v3930_v34 = vld [vmem:[%s6719_s2 + $0x68] sm:$0xf]  ;;  %v3927_v35 = vor.u32 %v4276_v33, %v3924_v49  ;;  %v4279_v36 = vld [vmem:[%s6719_s2 + $0x74] sm:$0xf0] }
 0x3f2   :  { %v1868_v45 = vadd.f32 %v1849_v61, %v4767_v25  ;;  %v1869_v46 = vadd.f32 %v1862_v11, %v4836_v21  ;;  %v1825_v48 = vpop.f32.mrf.mxu0  ;;  %v1838_v52 = vpop.f32.mrf.mxu1  ;;  %v3955_v21 = vor.u32 %v4286_v60, %v3954_v0  ;;  %v3922_v61 = vld [vmem:[%s6719_s2 + $0x60] sm:$0xf]  ;;  %v4278_v11 = vld [vmem:[%s6719_s2 + $0x6c] sm:$0xf0]  ;;  %2397 = vmatpush.bf16.msrb.mxu3 %v3999_v40  ;;  %v3935_v40 = vor.u32 %v4277_v31, %v3932_v37 }
 0x3f3   :  { %2384 = vmatpush.bf16.msrb.mxu2 %v3995_v38  ;;  %v3923_v42 = vor.u32 %v4278_v11, %v3922_v61  ;;  %v4291_v52 = vld [vmem:[%s6719_s2 + $0xd4] sm:$0xf0]  ;;  %v3931_v38 = vor.u32 %v4279_v36, %v3930_v34  ;;  %v4272_v11 = vld [vmem:[%s6719_s2 + $0x44] sm:$0xf]  ;;  %v4298_v36 = vld [vmem:[%s6722_s4 + $0x10] sm:$0xff] }
 0x3f4   :  { %4362 = vtanh.f32 %v1868_v45  ;;  %v1879_v24 = vmul.f32 0.5, %v1869_v46  ;;  %2360 = vmatpush.bf16.msrb.mxu0 %v3955_v21  ;;  %v3972_v45 = vld [vmem:[%s6719_s2 + $0xd0] sm:$0xf0]  ;;  %v3978_v46 = vld [vmem:[%s6719_s2 + $0xc8] sm:$0xf]  ;;  %v4303_v61 = vld [vmem:[%s6722_s4 + $0x38] sm:$0xff] }
 0x3f5   :  { %v4359_v55 = vpop.eup %4358  ;;  %v3975_v48 = vor.u32 %v4288_v44, %v3972_v45  ;;  %v3979_v0 = vor.u32 %v4291_v52, %v3978_v46  ;;  %v3956_v21 = vld [vmem:[%s6719_s2 + $0xb0] sm:$0xf0]  ;;  %v3914_v44 = vld [vmem:[%s6719_s2 + $0x48] sm:$0xf]  ;;  %v4275_v46 = vld [vmem:[%s6719_s2 + $0x54] sm:$0xf0] }
 0x3f6   :  { %v4361_v57 = vpop.eup %4360  ;;  %v1872_v4 = vmul.f32 0.5, %v4359_v55  ;;  %4364 = vtanh.f32 %v1879_v24  ;;  %v3980_v24 = vld [vmem:[%s6719_s2 + $0xd8] sm:$0xf0]  ;;  %v3906_v55 = vld [vmem:[%s6719_s2 + $0x40] sm:$0xf] }
 0x3f7   :  { %v1876_v25 = vmul.f32 0.5, %v4361_v57  ;;  %v3983_v60 = vor.u32 %v4289_v58, %v3980_v24  ;;  %2372 = vmatpush.bf16.msrb.mxu1 %v3975_v48  ;;  %2385 = vmatpush.bf16.msrb.mxu2 %v3979_v0  ;;  %v4274_v57 = vld [vmem:[%s6719_s2 + $0x4c] sm:$0xf0]  ;;  %v4273_v48 = vld [vmem:[%s6719_s2 + $0x4c] sm:$0xf]  ;;  %v3915_v58 = vor.u32 %v4275_v46, %v3914_v44 }
 0x3f8   :  { %v1873_v20 = vadd.f32 0.5, %v1872_v4  ;;  %2361 = vmatpush.bf16.msrb.mxu0 %v3939_v7  ;;  %v3907_v4 = vor.u32 %v4274_v57, %v3906_v55  ;;  %v3916_v52 = vld [vmem:[%s6719_s2 + $0x58] sm:$0xf0]  ;;  %v4302_v0 = vld [vmem:[%s6722_s4 + $0x30] sm:$0xff]  ;;  %v3898_v57 = vld [vmem:[%s6719_s2 + $0x28] sm:$0xf] }
 0x3f9   :  { %v1877_v9 = vadd.f32 0.5, %v1876_v25  ;;  %v1851_v12 = vpop.f32.mrf.mxu2  ;;  %v1864_v47 = vpop.f32.mrf.mxu3  ;;  %2398 = vmatpush.bf16.msrb.mxu3 %v3983_v60  ;;  %v4284_v25 = vld [vmem:[%s6719_s2 + $0xa4] sm:$0xf]  ;;  %v3919_v24 = vor.u32 %v4273_v48, %v3916_v52  ;;  %v3892_v55 = vld [vmem:[%s6719_s2 + $0x30] sm:$0xf0] }
 0x3fa   :  { %v4363_v43 = vpop.eup %4362  ;;  %v3959_v1 = vor.u32 %v4284_v25, %v3956_v21  ;;  %v3964_v12 = vld [vmem:[%s6719_s2 + $0xb8] sm:$0xf0]  ;;  %v4268_v60 = vld [vmem:[%s6719_s2 + $0x24] sm:$0xf]  ;;  %v4271_v25 = vld [vmem:[%s6719_s2 + $0x34] sm:$0xf0] }
 0x3fb   :  { %v1883_v41 = vmul.f32 %v1877_v9, %v5938_v13  ;;  %v1884_v17 = vmul.f32 %v4363_v43, %v1873_v20  ;;  %v3962_v20 = vld [vmem:[%s6719_s2 + $0xa8] sm:$0xf]  ;;  %v4285_v9 = vld [vmem:[%s6719_s2 + $0xac] sm:$0xf]  ;;  %v4296_v52 = vld [vmem:[%s6722_s4] sm:$0xff] }
 0x3fc   :  { %v4365_v18 = vpop.eup %4364  ;;  %2362 = vmatpush.bf16.msrb.mxu0 %v3923_v42  ;;  %v3963_v47 = vor.u32 %v4287_v8, %v3962_v20  ;;  %v3967_v43 = vor.u32 %v4285_v9, %v3964_v12  ;;  %2373 = vmatpush.bf16.msrb.mxu1 %v3959_v1  ;;  %v3908_v42 = vld [vmem:[%s6719_s2 + $0x50] sm:$0xf0]  ;;  %v4269_v21 = vld [vmem:[%s6719_s2 + $0x2c] sm:$0xf]  ;;  %v3900_v20 = vld [vmem:[%s6719_s2 + $0x38] sm:$0xf0]  ;;  %v3899_v1 = vor.u32 %v4271_v25, %v3898_v57 }
 0x3fd   :  { %v6199_v62 = vadd.f32 %v1884_v17, %v1883_v41  ;;  %v1881_v59 = vmul.f32 0.5, %v4365_v18  ;;  %v3890_v41 = vld [vmem:[%s6719_s2 + $0x20] sm:$0xf]  ;;  %v4270_v17 = vld [vmem:[%s6719_s2 + $0x2c] sm:$0xf0]  ;;  %v3911_v45 = vor.u32 %v4272_v11, %v3908_v42  ;;  %v3903_v8 = vor.u32 %v4269_v21, %v3900_v20  ;;  %v4301_v9 = vld [vmem:[%s6722_s4 + $0x28] sm:$0xff] }
 0x3fe   :  { %2386 = vmatpush.bf16.msrb.mxu2 %v3963_v47  ;;  %2399 = vmatpush.bf16.msrb.mxu3 %v3967_v43  ;;  %v3891_v7 = vor.u32 %v4270_v17, %v3890_v41  ;;  %v4280_v18 = vld [vmem:[%s6719_s2 + $0x84] sm:$0xf]  ;;  %v132_v12 = vadd.f32 %v4693_v51, %v4869_v39  ;;  %v3876_v17 = vld [vmem:[%s6719_s2 + $0x10] sm:$0xf0] }
 0x3ff   :  { %4366 = vtanh.f32 %v6199_v62  ;;  %v1882_v19 = vadd.f32 0.5, %v1881_v59  ;;  %v3940_v59 = vld [vmem:[%s6719_s2 + $0x90] sm:$0xf0]  ;;  %v4264_v41 = vld [vmem:[%s6719_s2 + $0x4] sm:$0xf] }
 0x400   :  { %2363 = vmatpush.bf16.msrb.mxu0 %v3907_v4  ;;  %v3895_v4 = vor.u32 %v4268_v60, %v3892_v55 }
 0x404   :  { %2364 = vmatpush.bf16.msrb.mxu0 %v3891_v7  ;;  %v3882_v7 = vld [vmem:[%s6719_s2 + $0x8] sm:$0xf] }
 0x405   :  { %v4367_v26 = vpop.eup %4366 }
 0x406   :  { %v6202_v27 = vmul.f32 %v4367_v26, %v1882_v19  ;;  %v3946_v19 = vld [vmem:[%s6719_s2 + $0x88] sm:$0xf]  ;;  %v3943_v26 = vor.u32 %v4280_v18, %v3940_v59  ;;  %v3879_v59 = vor.u32 %v4264_v41, %v3876_v17  ;;  %v134_v41 = vadd.f32 %v4699_v54, %v4869_v39 }
 0x408   :  { %v2781_v63 = vrot.slane %v6202_v27, 1  ;;  %v2782_v53 = vrot.slane %v6202_v27, 2  ;;  %v2783_v13 = vrot.slane %v6202_v27, 3  ;;  %2795 = vst [vmem:[%s6721_s6 + $0x5] sm:$0x1] %v6202_v27  ;;  %v2784_v28 = vrot.slane %v6202_v27, 4  ;;  %2374 = vmatpush.bf16.msrb.mxu1 %v3943_v26 }
 0x409   :  { %v1893_v30 = vpack.c.bf16 %v6202_v27, %v6202_v27  ;;  %v2785_v50 = vrot.slane %v6202_v27, 5  ;;  %v2786_v14 = vrot.slane %v6202_v27, 6  ;;  %v2787_v32 = vrot.slane %v6202_v27, 7  ;;  %v4265_v26 = vld [vmem:[%s6719_s2 + $0xc] sm:$0xf] }
 0x40a   :  { %2796 = vst [vmem:[%s6721_s6 + $0xd] sm:$0x1] %v2781_v63  ;;  %v4283_v63 = vld [vmem:[%s6719_s2 + $0x94] sm:$0xf0] }
 0x40b   :  { %2797 = vst [vmem:[%s6721_s6 + $0x15] sm:$0x1] %v2782_v53  ;;  %2094 = vmatmul.bf16.vlgmr.msra.gmra.mxu0 %v1893_v30  ;;  %2107 = vmatmul.bf16.vlgmr.msra.gmra.mxu1 %v1893_v30  ;;  %v4281_v53 = vld [vmem:[%s6719_s2 + $0x8c] sm:$0xf] }
 0x40c   :  { %2798 = vst [vmem:[%s6721_s6 + $0x1d] sm:$0x1] %v2783_v13  ;;  %2120 = vmatmul.bf16.vlgmr.msra.gmra.mxu2 %v1893_v30  ;;  %2133 = vmatmul.bf16.vlgmr.msra.gmra.mxu3 %v1893_v30  ;;  %v3948_v13 = vld [vmem:[%s6719_s2 + $0x98] sm:$0xf0] }
 0x40d   :  { %2799 = vst [vmem:[%s6721_s6 + $0x25] sm:$0x1] %v2784_v28  ;;  %v3947_v28 = vor.u32 %v4283_v63, %v3946_v19  ;;  %v3951_v30 = vor.u32 %v4281_v53, %v3948_v13  ;;  %2375 = vmatpush.bf16.msrb.mxu1 %v3927_v35  ;;  %v4267_v19 = vld [vmem:[%s6719_s2 + $0x14] sm:$0xf0]  ;;  %v3884_v63 = vld [vmem:[%s6719_s2 + $0x18] sm:$0xf0] }
 0x40e   :  { %2800 = vst [vmem:[%s6721_s6 + $0x2d] sm:$0x1] %v2785_v50  ;;  %v3874_v50 = vld [vmem:[%s6719_s2] sm:$0xf]  ;;  %v3883_v53 = vor.u32 %v4267_v19, %v3882_v7  ;;  %v3887_v13 = vor.u32 %v4265_v26, %v3884_v63 }
 0x40f   :  { %2801 = vst [vmem:[%s6721_s6 + $0x35] sm:$0x1] %v2786_v14  ;;  %v4266_v14 = vld [vmem:[%s6719_s2 + $0xc] sm:$0xf0]  ;;  %2387 = vmatpush.bf16.msrb.mxu2 %v3947_v28  ;;  %2400 = vmatpush.bf16.msrb.mxu3 %v3951_v30 }
 0x410   :  { %2802 = vst [vmem:[%s6721_s6 + $0x3d] sm:$0x1] %v2787_v32  ;;  %v3875_v32 = vor.u32 %v4266_v14, %v3874_v50  ;;  %v4299_v50 = vld [vmem:[%s6722_s4 + $0x18] sm:$0xff] }
 0x411   :  { %2376 = vmatpush.bf16.msrb.mxu1 %v3911_v45 }
 0x412   :  { %2365 = vmatpush.bf16.msrb.mxu0 %v3875_v32 }
 0x413   :  { %2388 = vmatpush.bf16.msrb.mxu2 %v3931_v38  ;;  %2401 = vmatpush.bf16.msrb.mxu3 %v3935_v40 }
 0x415   :  { %2377 = vmatpush.bf16.msrb.mxu1 %v3895_v4 }
 0x416   :  { %2515 = vmatpush.bf16.msra.mxu0 %v4303_v61 }
 0x417   :  { %2389 = vmatpush.bf16.msrb.mxu2 %v3915_v58  ;;  %2402 = vmatpush.bf16.msrb.mxu3 %v3919_v24 }
 0x419   :  { %2378 = vmatpush.bf16.msrb.mxu1 %v3879_v59 }
 0x41a   :  { %2516 = vmatpush.bf16.msra.mxu0 %v4302_v0 }
 0x41b   :  { %2390 = vmatpush.bf16.msrb.mxu2 %v3899_v1  ;;  %2403 = vmatpush.bf16.msrb.mxu3 %v3903_v8 }
 0x41e   :  { %2517 = vmatpush.bf16.msra.mxu0 %v4301_v9 }
 0x41f   :  { %2391 = vmatpush.bf16.msrb.mxu2 %v3883_v53  ;;  %2404 = vmatpush.bf16.msrb.mxu3 %v3887_v13 }
 0x488   :  { %v2095_v47 = vpop.f32.mrf.mxu0  ;;  %v2108_v43 = vpop.f32.mrf.mxu1 }
 0x489   :  { %v2138_v18 = vadd.f32 %v2095_v47, %v132_v12  ;;  %v2139_v51 = vadd.f32 %v2108_v43, %v4851_v29  ;;  %v4300_v29 = vld [vmem:[%s6722_s4 + $0x20] sm:$0xff]  ;;  %v2443_v12 = vpack.c.bf16 %v5230_v15, %v4986_v16  ;;  %v2444_v47 = vpack.c.bf16 %v5704_v3, %v5467_v6 }
 0x48a   :  { %2518 = vmatpush.bf16.msra.mxu0 %v4300_v29  ;;  %v2445_v43 = vpack.c.bf16 %v6202_v27, %v5941_v56 }
 0x48b   :  { %v2142_v28 = vmul.f32 0.5, %v2138_v18  ;;  %v2146_v30 = vmul.f32 0.5, %v2139_v51 }
 0x48d   :  { %4368 = vtanh.f32 %v2142_v28 }
 0x48e   :  { %4370 = vtanh.f32 %v2146_v30  ;;  %2519 = vmatpush.bf16.msra.mxu0 %v4299_v50 }
 0x48f   :  { %v2121_v14 = vpop.f32.mrf.mxu2  ;;  %v2134_v32 = vpop.f32.mrf.mxu3 }
 0x490   :  { %v2140_v33 = vadd.f32 %v2121_v14, %v4806_v5  ;;  %v2141_v49 = vadd.f32 %v2134_v32, %v4897_v10  ;;  %v2097_v34 = vpop.f32.mrf.mxu0  ;;  %v2110_v35 = vpop.f32.mrf.mxu1  ;;  %v4297_v5 = vld [vmem:[%s6722_s4 + $0x8] sm:$0xff] }
 0x492   :  { %4372 = vtanh.f32 %v2140_v33  ;;  %v2151_v31 = vmul.f32 0.5, %v2141_v49  ;;  %2520 = vmatpush.bf16.msra.mxu0 %v4298_v36 }
 0x493   :  { %v4369_v37 = vpop.eup %4368 }
 0x494   :  { %v4371_v38 = vpop.eup %4370  ;;  %v2144_v40 = vmul.f32 0.5, %v4369_v37  ;;  %4374 = vtanh.f32 %v2151_v31 }
 0x495   :  { %v2148_v61 = vmul.f32 0.5, %v4371_v38 }
 0x496   :  { %v2145_v10 = vadd.f32 0.5, %v2144_v40  ;;  %2521 = vmatpush.bf16.msra.mxu0 %v4297_v5 }
 0x497   :  { %v2149_v11 = vadd.f32 0.5, %v2148_v61  ;;  %v2123_v42 = vpop.f32.mrf.mxu2  ;;  %v2136_v44 = vpop.f32.mrf.mxu3 }
 0x498   :  { %v4373_v45 = vpop.eup %4372 }
 0x499   :  { %v2155_v46 = vmul.f32 %v2149_v11, %v6199_v62  ;;  %v2156_v48 = vmul.f32 %v4373_v45, %v2145_v10 }
 0x49a   :  { %v4375_v58 = vpop.eup %4374  ;;  %2522 = vmatpush.bf16.msra.mxu0 %v4296_v52 }
 0x49b   :  { %v6436_v24 = vadd.f32 %v2156_v48, %v2155_v46  ;;  %v2153_v0 = vmul.f32 0.5, %v4375_v58 }
 0x49d   :  { %4376 = vtanh.f32 %v6436_v24  ;;  %v2154_v60 = vadd.f32 0.5, %v2153_v0 }
 0x4a3   :  { %v4377_v55 = vpop.eup %4376 }
 0x4a4   :  { %v6439_v57 = vmul.f32 %v4377_v55, %v2154_v60 }
 0x4a6   :  { %v2828_v4 = vrot.slane %v6439_v57, 1  ;;  %v2829_v62 = vrot.slane %v6439_v57, 2  ;;  %v2830_v25 = vrot.slane %v6439_v57, 3  ;;  %2842 = vst [vmem:[%s6721_s6 + $0x6] sm:$0x1] %v6439_v57  ;;  %v2831_v21 = vrot.slane %v6439_v57, 4 }
 0x4a7   :  { %v2165_v20 = vpack.c.bf16 %v6439_v57, %v6439_v57  ;;  %v2832_v1 = vrot.slane %v6439_v57, 5  ;;  %v2833_v8 = vrot.slane %v6439_v57, 6  ;;  %v2834_v9 = vrot.slane %v6439_v57, 7 }
 0x4a8   :  { %2843 = vst [vmem:[%s6721_s6 + $0xe] sm:$0x1] %v2828_v4 }
 0x4a9   :  { %2844 = vst [vmem:[%s6721_s6 + $0x16] sm:$0x1] %v2829_v62  ;;  %2366 = vmatmul.bf16.vlgmr.msrb.gmra.mxu0 %v2165_v20  ;;  %2379 = vmatmul.bf16.vlgmr.msrb.gmra.mxu1 %v2165_v20 }
 0x4aa   :  { %2845 = vst [vmem:[%s6721_s6 + $0x1e] sm:$0x1] %v2830_v25  ;;  %2392 = vmatmul.bf16.vlgmr.msrb.gmra.mxu2 %v2165_v20  ;;  %2405 = vmatmul.bf16.vlgmr.msrb.gmra.mxu3 %v2165_v20 }
 0x4ab   :  { %2846 = vst [vmem:[%s6721_s6 + $0x26] sm:$0x1] %v2831_v21 }
 0x4ac   :  { %2847 = vst [vmem:[%s6721_s6 + $0x2e] sm:$0x1] %v2832_v1 }
 0x4ad   :  { %2848 = vst [vmem:[%s6721_s6 + $0x36] sm:$0x1] %v2833_v8 }
 0x4ae   :  { %2849 = vst [vmem:[%s6721_s6 + $0x3e] sm:$0x1] %v2834_v9 }
 0x4b9   :  { %2523 = vmatmul.bf16.vlgmr.msra.gmra.mxu0 %v2443_v12 }
 0x4c9   :  { %2528 = vmatmul.bf16.gmra.mxu0 %v2444_v47 }
 0x4d9   :  { %2533 = vmatmul.bf16.gmra.mxu0 %v2445_v43 }
 0x526   :  { %v2367_v17 = vpop.f32.mrf.mxu0  ;;  %v2380_v7 = vpop.f32.mrf.mxu1 }
 0x527   :  { %v2410_v18 = vadd.f32 %v2367_v17, %v134_v41  ;;  %v2411_v51 = vadd.f32 %v2380_v7, %v4909_v22  ;;  %v6489_v22 = vld [vmem:[%s6723_s5] ss:$0 sm:$0xff] }
 0x529   :  { %v2414_v59 = vmul.f32 0.5, %v2410_v18  ;;  %v2418_v19 = vmul.f32 0.5, %v2411_v51 }
 0x52b   :  { %4378 = vtanh.f32 %v2414_v59 }
 0x52c   :  { %4380 = vtanh.f32 %v2418_v19 }
 0x52d   :  { %v2393_v16 = vpop.f32.mrf.mxu2  ;;  %v2406_v15 = vpop.f32.mrf.mxu3 }
 0x52e   :  { %v2412_v6 = vadd.f32 %v2393_v16, %v4839_v23  ;;  %v2413_v3 = vadd.f32 %v2406_v15, %v4953_v2  ;;  %v2369_v56 = vpop.f32.mrf.mxu0  ;;  %v2382_v27 = vpop.f32.mrf.mxu1 }
 0x530   :  { %4382 = vtanh.f32 %v2412_v6  ;;  %v2423_v26 = vmul.f32 0.5, %v2413_v3 }
 0x531   :  { %v4379_v54 = vpop.eup %4378 }
 0x532   :  { %v4381_v39 = vpop.eup %4380  ;;  %v2416_v63 = vmul.f32 0.5, %v4379_v54  ;;  %4384 = vtanh.f32 %v2423_v26 }
 0x533   :  { %v2420_v53 = vmul.f32 0.5, %v4381_v39 }
 0x534   :  { %v2417_v13 = vadd.f32 0.5, %v2416_v63 }
 0x535   :  { %v2421_v29 = vadd.f32 0.5, %v2420_v53  ;;  %v2395_v28 = vpop.f32.mrf.mxu2  ;;  %v2408_v23 = vpop.f32.mrf.mxu3 }
 0x536   :  { %v4383_v30 = vpop.eup %4382  ;;  %v2524_v2 = vpop.f32.mrf.mxu0 }
 0x537   :  { %v2427_v50 = vmul.f32 %v2421_v29, %v6436_v24  ;;  %v2428_v14 = vmul.f32 %v4383_v30, %v2417_v13  ;;  %v2525_v32 = vadd.f32 %v6489_v22, %v2524_v2 }
 0x538   :  { %v4385_v33 = vpop.eup %4384 }
 0x539   :  { %v2429_v49 = vadd.f32 %v2428_v14, %v2427_v50  ;;  %v2569_v34 = vrot.slane %v2525_v32, 1  ;;  %v2570_v35 = vrot.slane %v2525_v32, 2  ;;  %2583 = vst [vmem:[%s6724_s7] sm:$0x1] %v2525_v32  ;;  %v2571_v36 = vrot.slane %v2525_v32, 3 }
 0x53a   :  { %v2572_v31 = vrot.slane %v2525_v32, 4  ;;  %v2573_v37 = vrot.slane %v2525_v32, 5  ;;  %v2425_v38 = vmul.f32 0.5, %v4385_v33  ;;  %v2574_v40 = vrot.slane %v2525_v32, 6 }
 0x53b   :  { %4386 = vtanh.f32 %v2429_v49  ;;  %2584 = vst [vmem:[%s6724_s7 + $0x8] sm:$0x1] %v2569_v34  ;;  %v2575_v61 = vrot.slane %v2525_v32, 7 }
 0x53c   :  { %2585 = vst [vmem:[%s6724_s7 + $0x10] sm:$0x1] %v2570_v35  ;;  %v2426_v11 = vadd.f32 0.5, %v2425_v38 }
 0x53d   :  { %2586 = vst [vmem:[%s6724_s7 + $0x18] sm:$0x1] %v2571_v36 }
 0x53e   :  { %2587 = vst [vmem:[%s6724_s7 + $0x20] sm:$0x1] %v2572_v31  ;;  %v2526_v5 = vpop.f32.mrf.mxu0 }
 0x53f   :  { %2588 = vst [vmem:[%s6724_s7 + $0x28] sm:$0x1] %v2573_v37  ;;  %v2527_v10 = vadd.f32 %v6489_v22, %v2526_v5 }
 0x540   :  { %2589 = vst [vmem:[%s6724_s7 + $0x30] sm:$0x1] %v2574_v40 }
 0x541   :  { %v4387_v42 = vpop.eup %4386  ;;  %2590 = vst [vmem:[%s6724_s7 + $0x38] sm:$0x1] %v2575_v61  ;;  %v2616_v44 = vrot.slane %v2527_v10, 1  ;;  %v2617_v45 = vrot.slane %v2527_v10, 2  ;;  %v2619_v25 = vrot.slane %v2527_v10, 4  ;;  %v2620_v21 = vrot.slane %v2527_v10, 5 }
 0x542   :  { %v2431_v46 = vmul.f32 %v4387_v42, %v2426_v11  ;;  %2630 = vst [vmem:[%s6724_s7 + $0x1] sm:$0x1] %v2527_v10  ;;  %v2621_v1 = vrot.slane %v2527_v10, 6  ;;  %v2622_v8 = vrot.slane %v2527_v10, 7 }
 0x543   :  { %2631 = vst [vmem:[%s6724_s7 + $0x9] sm:$0x1] %v2616_v44 }
 0x544   :  { %v2875_v48 = vrot.slane %v2431_v46, 1  ;;  %v2876_v52 = vrot.slane %v2431_v46, 2  ;;  %v2877_v58 = vrot.slane %v2431_v46, 3  ;;  %2889 = vst [vmem:[%s6721_s6 + $0x7] sm:$0x1] %v2431_v46  ;;  %v2878_v24 = vrot.slane %v2431_v46, 4 }
 0x545   :  { %2632 = vst [vmem:[%s6724_s7 + $0x11] sm:$0x1] %v2617_v45  ;;  %v2446_v0 = vpack.c.bf16 %v2431_v46, %v6439_v57  ;;  %v2879_v60 = vrot.slane %v2431_v46, 5  ;;  %v2880_v4 = vrot.slane %v2431_v46, 6  ;;  %v2881_v62 = vrot.slane %v2431_v46, 7 }
 0x546   :  { %2890 = vst [vmem:[%s6721_s6 + $0xf] sm:$0x1] %v2875_v48  ;;  %v2529_v55 = vpop.f32.mrf.mxu0  ;;  %v2618_v57 = vrot.slane %v2527_v10, 3 }
 0x547   :  { %2891 = vst [vmem:[%s6721_s6 + $0x17] sm:$0x1] %v2876_v52  ;;  %2538 = vmatmul.bf16.gmra.mxu0 %v2446_v0  ;;  %v2530_v20 = vadd.f32 %v6489_v22, %v2529_v55 }
 0x548   :  { %2892 = vst [vmem:[%s6721_s6 + $0x1f] sm:$0x1] %v2877_v58 }
 0x549   :  { %2893 = vst [vmem:[%s6721_s6 + $0x27] sm:$0x1] %v2878_v24  ;;  %v2663_v12 = vrot.slane %v2530_v20, 1  ;;  %v2664_v47 = vrot.slane %v2530_v20, 2  ;;  %v2665_v43 = vrot.slane %v2530_v20, 3  ;;  %v2666_v41 = vrot.slane %v2530_v20, 4 }
 0x54a   :  { %2894 = vst [vmem:[%s6721_s6 + $0x2f] sm:$0x1] %v2879_v60  ;;  %v2667_v17 = vrot.slane %v2530_v20, 5  ;;  %v2668_v18 = vrot.slane %v2530_v20, 6  ;;  %v2669_v51 = vrot.slane %v2530_v20, 7 }
 0x54b   :  { %2895 = vst [vmem:[%s6721_s6 + $0x37] sm:$0x1] %v2880_v4 }
 0x54c   :  { %2896 = vst [vmem:[%s6721_s6 + $0x3f] sm:$0x1] %v2881_v62 }
 0x54d   :  { %2633 = vst [vmem:[%s6724_s7 + $0x19] sm:$0x1] %v2618_v57 }
 0x54e   :  { %2634 = vst [vmem:[%s6724_s7 + $0x21] sm:$0x1] %v2619_v25  ;;  %v2531_v9 = vpop.f32.mrf.mxu0 }
 0x54f   :  { %2635 = vst [vmem:[%s6724_s7 + $0x29] sm:$0x1] %v2620_v21  ;;  %v2532_v7 = vadd.f32 %v6489_v22, %v2531_v9 }
 0x550   :  { %2636 = vst [vmem:[%s6724_s7 + $0x31] sm:$0x1] %v2621_v1 }
 0x551   :  { %2637 = vst [vmem:[%s6724_s7 + $0x39] sm:$0x1] %v2622_v8  ;;  %v2710_v19 = vrot.slane %v2532_v7, 1  ;;  %v2711_v16 = vrot.slane %v2532_v7, 2  ;;  %v2712_v15 = vrot.slane %v2532_v7, 3  ;;  %v2713_v6 = vrot.slane %v2532_v7, 4 }
 0x552   :  { %2677 = vst [vmem:[%s6724_s7 + $0x2] sm:$0x1] %v2530_v20  ;;  %v2714_v3 = vrot.slane %v2532_v7, 5  ;;  %v2715_v27 = vrot.slane %v2532_v7, 6  ;;  %v2716_v26 = vrot.slane %v2532_v7, 7 }
 0x553   :  { %2678 = vst [vmem:[%s6724_s7 + $0xa] sm:$0x1] %v2663_v12 }
 0x554   :  { %2679 = vst [vmem:[%s6724_s7 + $0x12] sm:$0x1] %v2664_v47 }
 0x555   :  { %2680 = vst [vmem:[%s6724_s7 + $0x1a] sm:$0x1] %v2665_v43 }
 0x556   :  { %2681 = vst [vmem:[%s6724_s7 + $0x22] sm:$0x1] %v2666_v41  ;;  %v2534_v59 = vpop.f32.mrf.mxu0 }
 0x557   :  { %2682 = vst [vmem:[%s6724_s7 + $0x2a] sm:$0x1] %v2667_v17  ;;  %v2535_v56 = vadd.f32 %v6489_v22, %v2534_v59 }
 0x558   :  { %2683 = vst [vmem:[%s6724_s7 + $0x32] sm:$0x1] %v2668_v18 }
 0x559   :  { %2684 = vst [vmem:[%s6724_s7 + $0x3a] sm:$0x1] %v2669_v51  ;;  %v2757_v54 = vrot.slane %v2535_v56, 1  ;;  %v2758_v39 = vrot.slane %v2535_v56, 2  ;;  %v2759_v53 = vrot.slane %v2535_v56, 3  ;;  %v2760_v13 = vrot.slane %v2535_v56, 4 }
 0x55a   :  { %2724 = vst [vmem:[%s6724_s7 + $0x3] sm:$0x1] %v2532_v7  ;;  %v2761_v29 = vrot.slane %v2535_v56, 5  ;;  %v2762_v23 = vrot.slane %v2535_v56, 6  ;;  %v2763_v30 = vrot.slane %v2535_v56, 7 }
 0x55b   :  { %2725 = vst [vmem:[%s6724_s7 + $0xb] sm:$0x1] %v2710_v19 }
 0x55c   :  { %2726 = vst [vmem:[%s6724_s7 + $0x13] sm:$0x1] %v2711_v16 }
 0x55d   :  { %2727 = vst [vmem:[%s6724_s7 + $0x1b] sm:$0x1] %v2712_v15 }
 0x55e   :  { %2728 = vst [vmem:[%s6724_s7 + $0x23] sm:$0x1] %v2713_v6  ;;  %v2536_v63 = vpop.f32.mrf.mxu0 }
 0x55f   :  { %2729 = vst [vmem:[%s6724_s7 + $0x2b] sm:$0x1] %v2714_v3  ;;  %v2537_v28 = vadd.f32 %v6489_v22, %v2536_v63 }
 0x560   :  { %2730 = vst [vmem:[%s6724_s7 + $0x33] sm:$0x1] %v2715_v27 }
 0x561   :  { %2731 = vst [vmem:[%s6724_s7 + $0x3b] sm:$0x1] %v2716_v26  ;;  %v2804_v2 = vrot.slane %v2537_v28, 1  ;;  %v2805_v50 = vrot.slane %v2537_v28, 2  ;;  %v2806_v14 = vrot.slane %v2537_v28, 3  ;;  %v2807_v32 = vrot.slane %v2537_v28, 4 }
 0x562   :  { %2771 = vst [vmem:[%s6724_s7 + $0x4] sm:$0x1] %v2535_v56  ;;  %v2808_v33 = vrot.slane %v2537_v28, 5  ;;  %v2809_v49 = vrot.slane %v2537_v28, 6  ;;  %v2810_v34 = vrot.slane %v2537_v28, 7 }
 0x563   :  { %2772 = vst [vmem:[%s6724_s7 + $0xc] sm:$0x1] %v2757_v54 }
 0x564   :  { %2773 = vst [vmem:[%s6724_s7 + $0x14] sm:$0x1] %v2758_v39 }
 0x565   :  { %2774 = vst [vmem:[%s6724_s7 + $0x1c] sm:$0x1] %v2759_v53 }
 0x566   :  { %2775 = vst [vmem:[%s6724_s7 + $0x24] sm:$0x1] %v2760_v13 }
 0x567   :  { %2776 = vst [vmem:[%s6724_s7 + $0x2c] sm:$0x1] %v2761_v29 }
 0x568   :  { %2777 = vst [vmem:[%s6724_s7 + $0x34] sm:$0x1] %v2762_v23 }
 0x569   :  { %2778 = vst [vmem:[%s6724_s7 + $0x3c] sm:$0x1] %v2763_v30 }
 0x56a   :  { %2818 = vst [vmem:[%s6724_s7 + $0x5] sm:$0x1] %v2537_v28 }
 0x56b   :  { %2819 = vst [vmem:[%s6724_s7 + $0xd] sm:$0x1] %v2804_v2 }
 0x56c   :  { %2820 = vst [vmem:[%s6724_s7 + $0x15] sm:$0x1] %v2805_v50 }
 0x56d   :  { %2821 = vst [vmem:[%s6724_s7 + $0x1d] sm:$0x1] %v2806_v14 }
 0x56e   :  { %2822 = vst [vmem:[%s6724_s7 + $0x25] sm:$0x1] %v2807_v32 }
 0x56f   :  { %2823 = vst [vmem:[%s6724_s7 + $0x2d] sm:$0x1] %v2808_v33 }
 0x570   :  { %2824 = vst [vmem:[%s6724_s7 + $0x35] sm:$0x1] %v2809_v49 }
 0x571   :  { %2825 = vst [vmem:[%s6724_s7 + $0x3d] sm:$0x1] %v2810_v34 }
 0x5c4   :  { %v2539_v35 = vpop.f32.mrf.mxu0 }
 0x5c5   :  { %v2540_v36 = vadd.f32 %v6489_v22, %v2539_v35 }
 0x5c7   :  { %v2851_v31 = vrot.slane %v2540_v36, 1  ;;  %v2852_v37 = vrot.slane %v2540_v36, 2  ;;  %v2853_v38 = vrot.slane %v2540_v36, 3  ;;  %2865 = vst [vmem:[%s6724_s7 + $0x6] sm:$0x1] %v2540_v36  ;;  %v2854_v40 = vrot.slane %v2540_v36, 4 }
 0x5c8   :  { %v2855_v61 = vrot.slane %v2540_v36, 5  ;;  %v2856_v5 = vrot.slane %v2540_v36, 6  ;;  %v2857_v10 = vrot.slane %v2540_v36, 7 }
 0x5c9   :  { %2866 = vst [vmem:[%s6724_s7 + $0xe] sm:$0x1] %v2851_v31 }
 0x5ca   :  { %2867 = vst [vmem:[%s6724_s7 + $0x16] sm:$0x1] %v2852_v37 }
 0x5cb   :  { %2868 = vst [vmem:[%s6724_s7 + $0x1e] sm:$0x1] %v2853_v38 }
 0x5cc   :  { %2869 = vst [vmem:[%s6724_s7 + $0x26] sm:$0x1] %v2854_v40  ;;  %v2541_v11 = vpop.f32.mrf.mxu0 }
 0x5cd   :  { %2870 = vst [vmem:[%s6724_s7 + $0x2e] sm:$0x1] %v2855_v61  ;;  %v2542_v42 = vadd.f32 %v6489_v22, %v2541_v11 }
 0x5ce   :  { %2871 = vst [vmem:[%s6724_s7 + $0x36] sm:$0x1] %v2856_v5 }
 0x5cf   :  { %2872 = vst [vmem:[%s6724_s7 + $0x3e] sm:$0x1] %v2857_v10  ;;  %v2898_v44 = vrot.slane %v2542_v42, 1  ;;  %v2899_v45 = vrot.slane %v2542_v42, 2  ;;  %v2900_v46 = vrot.slane %v2542_v42, 3  ;;  %v2901_v48 = vrot.slane %v2542_v42, 4 }
 0x5d0   :  { %2912 = vst [vmem:[%s6724_s7 + $0x7] sm:$0x1] %v2542_v42  ;;  %v2902_v52 = vrot.slane %v2542_v42, 5  ;;  %v2903_v22 = vrot.slane %v2542_v42, 6  ;;  %v2904_v58 = vrot.slane %v2542_v42, 7 }
 0x5d1   :  { %2913 = vst [vmem:[%s6724_s7 + $0xf] sm:$0x1] %v2898_v44 }
 0x5d2   :  { %2914 = vst [vmem:[%s6724_s7 + $0x17] sm:$0x1] %v2899_v45 }
 0x5d3   :  { %2915 = vst [vmem:[%s6724_s7 + $0x1f] sm:$0x1] %v2900_v46 }
 0x5d4   :  { %2916 = vst [vmem:[%s6724_s7 + $0x27] sm:$0x1] %v2901_v48 }
 0x5d5   :  { %2917 = vst [vmem:[%s6724_s7 + $0x2f] sm:$0x1] %v2902_v52 }
 0x5d6   :  { %2918 = vst [vmem:[%s6724_s7 + $0x37] sm:$0x1] %v2903_v22 }
 0x5d7   :  { %2919 = vst [vmem:[%s6724_s7 + $0x3f] sm:$0x1] %v2904_v58 }

</bundles_post_ra>
